<compile_context>
chip_gen: v7x
topology: tpu7x:2x2x1
jax: 0.10.0
libtpu: 0.0.40
codegen_flags: <defaults>
</compile_context>

<pallas_src>
import math
import functools

import numpy as np
import jax
import jax.numpy as jnp
from jax import lax
from jax.experimental import pallas as pl
from jax.experimental.pallas import tpu as pltpu

_NEG_BIG = -1e30  # finite "masked" value: avoids NaN on fully-masked rows


# ----------------------------------------------------------------------------
# helpers
# ----------------------------------------------------------------------------
def _layer_norm(v, g, b, eps=1e-5):
    mu = jnp.mean(v, axis=-1, keepdims=True)
    var = jnp.mean((v - mu) ** 2, axis=-1, keepdims=True)
    return (v - mu) / jnp.sqrt(var + eps) * g + b


def _rel_shift_heads(x, *, causal):
    """Transformer-XL _rel_shift on the last two dims of (H, q, k), q == k.

        out[h, i, j] = x[h, i, j + k - 1 - i]   if j <= i
                     = 0                        if j == i + 1
                     = x[h, i + 1, j - i - 2]   if j >= i + 2

    Implemented as a log2(k)-step per-row lane rotation ("skew") using
    pltpu.roll (XLU) plus masked selects.  When `causal` is True the j > i
    region is masked downstream, so only the cheap j <= i branch is
    materialized (no (2H, q, k) buffer, no cross-sublane roll, half the
    roll/select passes).
    """
    nh, q, k = x.shape
    # per-row left-rotation amount rot_i = k - 1 - i, applied in binary steps
    rot = (k - 1) - lax.broadcasted_iota(jnp.int32, (q, 1), 0)        # (q, 1)

    if causal:
        y = x
        for b in range((k - 1).bit_length()):
            amt = 1 << b                                              # amt < k
            rolled = pltpu.roll(y, shift=k - amt, axis=2)             # left-rotate by amt
            y = jnp.where(((rot & amt) != 0)[None], rolled, y)
        return y                # y[h,i,j] = x[h,i,(j+k-1-i) % k]; exact for j <= i

    # general path (arbitrary mask): also build the j >= i+2 branch
    xu = pltpu.roll(x, shift=q - 1, axis=1) if q > 1 else x           # row i -> row i+1
    both = jnp.concatenate([x, xu], axis=0)                           # (2H, q, k)
    for b in range((k - 1).bit_length()):
        amt = 1 << b
        rolled = pltpu.roll(both, shift=k - amt, axis=2)
        both = jnp.where(((rot & amt) != 0)[None], rolled, both)
    y = both[:nh]               # y[h,i,j] = x[h, i,   (j + k-1-i) % k]
    z = both[nh:]
    if k > 1:
        z = pltpu.roll(z, shift=1, axis=2)   # z[h,i,j] = x[h, i+1, (j + k-2-i) % k]

    ii = lax.broadcasted_iota(jnp.int32, (q, k), 0)
    jj = lax.broadcasted_iota(jnp.int32, (q, k), 1)
    zero = jnp.zeros((), x.dtype)
    return jnp.where((jj <= ii)[None], y,
                     jnp.where((jj == ii + 1)[None], zero, z))


# ----------------------------------------------------------------------------
# Pallas kernel: one grid step == one batch element
# ----------------------------------------------------------------------------
def _decoder_layer_kernel(w_ref, maskb_ref, wqkv_ref, rwb_ref, remb_ref, rbias_ref,
                          wo_ref, ln1g_ref, ln1b_ref,
                          w1_ref, b1_ref, w2_ref, b2_ref, ln2g_ref, ln2b_ref,
                          out_ref, *, n_head, d_head, causal):
    bf16, f32 = jnp.bfloat16, jnp.float32

    x = w_ref[0]                                   # (qlen, d_model) f32
    qlen, d_model = x.shape
    klen = remb_ref.shape[1]
    hd = n_head * d_head
    scale = 1.0 / math.sqrt(d_head)

    # fused QKV projection (bf16 operands, f32 accumulation on the MXU)
    heads = jnp.dot(x.astype(bf16), wqkv_ref[...],
                    preferred_element_type=f32)    # (q, 3*H*Dh) f32

    # head-major split: (q, H*Dh) lane slices -> (H, q, Dh)
    # TODO(synk): replace the O(H) slice+stack with one pltpu.einshape relayout.
    def split_heads(m2d):
        return jnp.stack([m2d[:, h * d_head:(h + 1) * d_head] for h in range(n_head)],
                         axis=0)

    q_hm = split_heads(heads[:, :hd])                                   # (H, q, Dh) f32
    k_hm = split_heads(heads[:, hd:2 * hd]).astype(bf16)                # (H, k, Dh)
    v_hm = split_heads(heads[:, 2 * hd:]).astype(bf16)                  # (H, k, Dh)

    rwq = (q_hm + rwb_ref[...][:, None, :]).astype(bf16)                # (H, q, Dh)

    # One wide batched score matmul against [K ; r_emb]: doubles the MXU N
    # dimension per weight push vs. two separate d_head-deep einsums.
    kr = jnp.concatenate([k_hm, remb_ref[...]], axis=1)                 # (H, 2k, Dh)
    big = jnp.einsum('hqd,hkd->hqk', rwq, kr,
                     preferred_element_type=f32)                        # (H, q, 2k) f32
    AC = big[:, :, :klen]
    # rbias_ref already carries r_bias - r_w_bias . r_emb^T (folded in the
    # wrapper), so big[..., klen:] + rbias == q . r_emb^T + r_bias.
    BD = _rel_shift_heads(big[:, :, klen:] + rbias_ref[...][:, None, :],
                          causal=causal)                                # (H, q, k)

    # scale + relative term + additive mask bias fused into one expression
    score = (AC + BD) * scale + maskb_ref[...][None]

    # softmax over the key axis (f32); reciprocal on the EUP
    smax = jnp.max(score, axis=-1, keepdims=True)
    unnorm = jnp.exp(score - smax)
    denom = jnp.sum(unnorm, axis=-1, keepdims=True)
    prob = unnorm * pl.reciprocal(denom, approx=True)

    av = jnp.einsum('hqk,hkd->hqd', prob.astype(bf16), v_hm,
                    preferred_element_type=f32)                         # (H, q, Dh) f32

    # fused output projection: (q, H*Dh) x (H*Dh, d_model), deep contraction
    av_flat = jnp.concatenate([av[h] for h in range(n_head)], axis=1).astype(bf16)
    attn_out = jnp.dot(av_flat, wo_ref[...], preferred_element_type=f32)

    # post-layernorm residual (pre_lnorm == False)
    out1 = _layer_norm(x + attn_out, ln1g_ref[...], ln1b_ref[...])

    # PositionwiseFF (post-layernorm)
    h1 = jnp.maximum(jnp.dot(out1.astype(bf16), w1_ref[...],
                             preferred_element_type=f32) + b1_ref[...], 0.0)
    core = jnp.dot(h1.astype(bf16), w2_ref[...],
                   preferred_element_type=f32) + b2_ref[...]
    out2 = _layer_norm(out1 + core, ln2g_ref[...], ln2b_ref[...])

    out_ref[0] = out2.astype(out_ref.dtype)


# ----------------------------------------------------------------------------
# wrapper-side helpers
# ----------------------------------------------------------------------------
def prepare_params(params):
    """One-time weight prep (transpose + bf16 cast), hoisted out of the forward."""
    f32, bf16 = jnp.float32, jnp.bfloat16
    d_inner, d_model = params["W1"].shape
    return {
        "wqkv_t": jnp.asarray(params["Wqkv"]).T.astype(bf16),   # (d_model, 3*H*Dh)
        "wo_t":   jnp.asarray(params["Wo"]).T.astype(bf16),     # (H*Dh, d_model)
        "w1_t":   jnp.asarray(params["W1"]).T.astype(bf16),     # (d_model, d_inner)
        "w2_t":   jnp.asarray(params["W2"]).T.astype(bf16),     # (d_inner, d_model)
        "b1":     jnp.asarray(params["b1"]).reshape(1, d_inner).astype(f32),
        "b2":     jnp.asarray(params["b2"]).reshape(1, d_model).astype(f32),
        "ln1g":   jnp.asarray(params["ln1_g"]).reshape(1, d_model).astype(f32),
        "ln1b":   jnp.asarray(params["ln1_b"]).reshape(1, d_model).astype(f32),
        "ln2g":   jnp.asarray(params["ln2_g"]).reshape(1, d_model).astype(f32),
        "ln2b":   jnp.asarray(params["ln2_b"]).reshape(1, d_model).astype(f32),
    }


def _detect_causal(mask):
    """True iff `mask` is concretely the standard triu(ones, k=1) causal mask."""
    if mask is None:
        return False
    try:
        m = np.asarray(mask)
    except Exception:          # traced value -> use the general rel_shift path
        return False
    if m.ndim != 2 or m.shape[0] != m.shape[1]:
        return False
    return bool(np.array_equal(m != 0, np.triu(np.ones(m.shape, dtype=bool), k=1)))


def _vmem_budget(qlen, klen, d_model, d_inner, n_head, d_head):
    """Rough working-set estimate (bytes) used as the explicit scoped-VMEM limit."""
    hd = n_head * d_head
    w_bf16 = 2 * (d_model * 3 * hd + hd * d_model + 2 * d_model * d_inner
                  + n_head * klen * d_head)
    small_f32 = 4 * (qlen * klen + n_head * klen + n_head * d_head
                     + 6 * d_model + d_inner)
    act_f32 = 4 * qlen * (d_model + 3 * hd + d_inner)
    score_f32 = 4 * n_head * qlen * 2 * klen
    est = 2 * (w_bf16 + small_f32 + 4 * qlen * d_model) + 4 * act_f32 + 8 * score_f32
    est += 4 << 20
    return int(min(max(est, 32 << 20), 128 << 20))


# ----------------------------------------------------------------------------
# wrapper: PyTorch layout in / out, pallas_call plumbing
# ----------------------------------------------------------------------------
def rel_learnable_decoder_layer(dec_inp, r_emb, r_w_bias, r_bias, dec_attn_mask, params):
    # dec_inp: (qlen, bsz, d_model); r_emb: (klen, H, Dh); r_w_bias: (H, Dh)
    # r_bias: (klen, H); dec_attn_mask: (qlen, klen) 0/1 (1 = masked)
    qlen, bsz, d_model = dec_inp.shape
    klen, n_head, d_head = r_emb.shape
    assert qlen == klen, "mems path not supported"  # TODO(synk): mems (klen > qlen)
    hd = n_head * d_head

    prep = params if "wqkv_t" in params else prepare_params(params)
    d_inner = prep["w1_t"].shape[1]
    f32, bf16 = jnp.float32, jnp.bfloat16

    causal = _detect_causal(dec_attn_mask)

    # TODO(synk): read the PyTorch layout directly with a squeezed-batch
    # BlockSpec to drop these activation transposes (one HBM round trip each).
    w_b = jnp.transpose(dec_inp, (1, 0, 2)).astype(f32)          # (bsz, qlen, d_model)
    remb_hm = jnp.transpose(r_emb, (1, 0, 2)).astype(f32)        # (H, klen, Dh)

    # Fold the rank-1 r_w_bias . r_emb^T term (introduced by the fused
    # [K ; r_emb] score matmul in the kernel) into r_bias, in f32, once per call.
    corr = jnp.einsum('hd,hkd->hk', r_w_bias.astype(f32), remb_hm,
                      precision=lax.Precision.HIGHEST)            # (H, klen)
    rbias_adj = jnp.transpose(r_bias, (1, 0)).astype(f32) - corr  # (H, klen)

    # additive attention-mask bias (replaces the in-kernel select); bf16 halves
    # the mask DMA and is exact for the 0 / -1e30 values involved.
    if dec_attn_mask is None:
        mask_bias = jnp.zeros((qlen, klen), bf16)
    else:
        mask_bias = dec_attn_mask.astype(bf16) * _NEG_BIG

    full = lambda shape: pl.BlockSpec(shape, lambda b: (0,) * len(shape))

    grid_spec = pltpu.PrefetchScalarGridSpec(
        num_scalar_prefetch=0,
        grid=(bsz,),
        in_specs=[
            pl.BlockSpec((1, qlen, d_model), lambda b: (b, 0, 0)),   # activations
            full((qlen, klen)),                                      # additive mask bias
            full((d_model, 3 * hd)),                                 # Wqkv^T (bf16)
            full((n_head, d_head)),                                  # r_w_bias
            full((n_head, klen, d_head)),                            # r_emb (bf16)
            full((n_head, klen)),                                    # adjusted r_bias
            full((hd, d_model)),                                     # Wo^T (bf16)
            full((1, d_model)), full((1, d_model)),                  # ln1 gamma/beta
            full((d_model, d_inner)), full((1, d_inner)),            # FF W1^T (bf16), b1
            full((d_inner, d_model)), full((1, d_model)),            # FF W2^T (bf16), b2
            full((1, d_model)), full((1, d_model)),                  # ln2 gamma/beta
        ],
        out_specs=pl.BlockSpec((1, qlen, d_model), lambda b: (b, 0, 0)),
    )

    kernel = functools.partial(_decoder_layer_kernel,
                               n_head=n_head, d_head=d_head, causal=causal)
    out_b = pl.pallas_call(
        kernel,
        out_shape=jax.ShapeDtypeStruct((bsz, qlen, d_model), f32),
        grid_spec=grid_spec,
        compiler_params=pltpu.CompilerParams(
            # TODO(synk): pltpu.CORE_PARALLEL on v7x (2 TCs/chip)
            dimension_semantics=("parallel",),
            vmem_limit_bytes=_vmem_budget(qlen, klen, d_model, d_inner,
                                          n_head, d_head)),
    )(w_b, mask_bias, prep["wqkv_t"], r_w_bias.astype(f32), remb_hm.astype(bf16),
      rbias_adj, prep["wo_t"], prep["ln1g"], prep["ln1b"],
      prep["w1_t"], prep["b1"], prep["w2_t"], prep["b2"],
      prep["ln2g"], prep["ln2b"])

    return jnp.transpose(out_b, (1, 0, 2))                        # (qlen, bsz, d_model)


# ----------------------------------------------------------------------------
# pure-JAX f32 reference (mirrors the PyTorch module, HIGHEST matmul precision)
# ----------------------------------------------------------------------------
def _rel_shift_ref(x):
    q, k, b, n = x.shape
    zero_pad = jnp.zeros((q, 1, b, n), x.dtype)
    x_padded = jnp.concatenate([zero_pad, x], axis=1)
    x_padded = x_padded.reshape(k + 1, q, b, n)
    return x_padded[1:].reshape(q, k, b, n)


def reference_forward(dec_inp, r_emb, r_w_bias, r_bias, dec_attn_mask, params):
    P = lax.Precision.HIGHEST
    qlen, bsz, d_model = dec_inp.shape
    klen, n_head, d_head = r_emb.shape
    scale = 1.0 / math.sqrt(d_head)

    w_heads = jnp.einsum("qbm,fm->qbf", dec_inp, params["Wqkv"], precision=P)
    q_, k_, v_ = jnp.split(w_heads, 3, axis=-1)
    q_ = q_.reshape(qlen, bsz, n_head, d_head)
    k_ = k_.reshape(klen, bsz, n_head, d_head)
    v_ = v_.reshape(klen, bsz, n_head, d_head)

    rw_q = q_ + r_w_bias[None, None]
    AC = jnp.einsum("ibnd,jbnd->ijbn", rw_q, k_, precision=P)
    B_ = jnp.einsum("ibnd,jnd->ijbn", q_, r_emb, precision=P)
    D_ = r_bias[None, :, None, :]
    BD = _rel_shift_ref(B_ + D_)

    score = (AC + BD) * scale
    score = jnp.where(dec_attn_mask[:, :, None, None] > 0, -jnp.inf, score)
    prob = jax.nn.softmax(score, axis=1)

    attn_vec = jnp.einsum("ijbn,jbnd->ibnd", prob, v_, precision=P)
    attn_vec = attn_vec.reshape(qlen, bsz, n_head * d_head)
    attn_out = jnp.einsum("qbf,mf->qbm", attn_vec, params["Wo"], precision=P)
    out1 = _layer_norm(dec_inp + attn_out, params["ln1_g"], params["ln1_b"])

    h1 = jax.nn.relu(jnp.einsum("qbm,fm->qbf", out1, params["W1"], precision=P)
                     + params["b1"])
    core = jnp.einsum("qbf,mf->qbm", h1, params["W2"], precision=P) + params["b2"]
    return _layer_norm(out1 + core, params["ln2_g"], params["ln2_b"])


# ----------------------------------------------------------------------------
if __name__ == "__main__":
    qlen, bsz = 128, 2
    n_head, d_head = 2, 16
    d_model, d_inner = 32, 64
    klen = qlen

    key = jax.random.PRNGKey(0)
    keys = jax.random.split(key, 12)

    dec_inp = jax.random.normal(keys[0], (qlen, bsz, d_model), jnp.float32)
    r_emb = 0.1 * jax.random.normal(keys[1], (klen, n_head, d_head), jnp.float32)
    r_w_bias = 0.1 * jax.random.normal(keys[2], (n_head, d_head), jnp.float32)
    r_bias = 0.1 * jax.random.normal(keys[3], (klen, n_head), jnp.float32)
    # causal mask (1 = masked), same as torch.triu(ones(q, k), diagonal=1)
    dec_attn_mask = jnp.triu(jnp.ones((qlen, klen), jnp.float32), k=1)

    params = {
        "Wqkv": 0.05 * jax.random.normal(keys[4], (3 * n_head * d_head, d_model), jnp.float32),
        "Wo":   0.05 * jax.random.normal(keys[5], (d_model, n_head * d_head), jnp.float32),
        "ln1_g": jnp.ones((d_model,), jnp.float32),
        "ln1_b": jnp.zeros((d_model,), jnp.float32),
        "W1":   0.05 * jax.random.normal(keys[6], (d_inner, d_model), jnp.float32),
        "b1":   0.05 * jax.random.normal(keys[7], (d_inner,), jnp.float32),
        "W2":   0.05 * jax.random.normal(keys[8], (d_model, d_inner), jnp.float32),
        "b2":   0.05 * jax.random.normal(keys[9], (d_model,), jnp.float32),
        "ln2_g": jnp.ones((d_model,), jnp.float32),
        "ln2_b": jnp.zeros((d_model,), jnp.float32),
    }

    # one-time weight prep (hoisted out of the per-call forward path)
    prep = prepare_params(params)

    # 1) causal mask -> fast rel_shift path
    out_kernel = rel_learnable_decoder_layer(dec_inp, r_emb, r_w_bias, r_bias,
                                             dec_attn_mask, prep)
    out_kernel = jax.block_until_ready(out_kernel)
    out_ref = reference_forward(dec_inp, r_emb, r_w_bias, r_bias, dec_attn_mask, params)
    # kernel matmuls run with bf16 operands (f32 accumulation); reference is
    # f32/HIGHEST, so allow bf16-level tolerances.
    np.testing.assert_allclose(np.asarray(out_kernel), np.asarray(out_ref),
                               rtol=2e-2, atol=2e-2)

    # 2) non-causal (banded) mask -> general rel_shift path
    band_mask = jnp.triu(jnp.ones((qlen, klen), jnp.float32), k=2)
    out_kernel2 = rel_learnable_decoder_layer(dec_inp, r_emb, r_w_bias, r_bias,
                                              band_mask, prep)
    out_kernel2 = jax.block_until_ready(out_kernel2)
    out_ref2 = reference_forward(dec_inp, r_emb, r_w_bias, r_bias, band_mask, params)
    np.testing.assert_allclose(np.asarray(out_kernel2), np.asarray(out_ref2),
                               rtol=2e-2, atol=2e-2)

    print("KERNEL_OK")
</pallas_src>

<mosaic_0001>
module attributes {stable_mosaic.version = 11 : i64} {
  func.func @_decoder_layer_kernel(%arg0: i32, %arg1: memref<1x128x32xf32, #tpu.memory_space<vmem>>, %arg2: memref<128x128xbf16, #tpu.memory_space<vmem>>, %arg3: memref<32x96xbf16, #tpu.memory_space<vmem>>, %arg4: memref<2x16xf32, #tpu.memory_space<vmem>>, %arg5: memref<2x128x16xbf16, #tpu.memory_space<vmem>>, %arg6: memref<2x128xf32, #tpu.memory_space<vmem>>, %arg7: memref<32x32xbf16, #tpu.memory_space<vmem>>, %arg8: memref<1x32xf32, #tpu.memory_space<vmem>>, %arg9: memref<1x32xf32, #tpu.memory_space<vmem>>, %arg10: memref<32x64xbf16, #tpu.memory_space<vmem>>, %arg11: memref<1x64xf32, #tpu.memory_space<vmem>>, %arg12: memref<64x32xbf16, #tpu.memory_space<vmem>>, %arg13: memref<1x32xf32, #tpu.memory_space<vmem>>, %arg14: memref<1x32xf32, #tpu.memory_space<vmem>>, %arg15: memref<1x32xf32, #tpu.memory_space<vmem>>, %arg16: memref<1x128x32xf32, #tpu.memory_space<vmem>>) attributes {dimension_semantics = [#tpu.dimension_semantics<parallel>], iteration_bounds = array<i64: 2>, scalar_prefetch = 0 : i64, scratch_operands = 0 : i64, tpu.core_type = #tpu.core_type<tc>, window_params = [{transform_indices = @transform_0, window_bounds = array<i64: 1, 128, 32>}, {pipeline_mode = #tpu.pipeline_mode<synchronous>, transform_indices = @transform_1, window_bounds = array<i64: 128, 128>}, {pipeline_mode = #tpu.pipeline_mode<synchronous>, transform_indices = @transform_2, window_bounds = array<i64: 32, 96>}, {pipeline_mode = #tpu.pipeline_mode<synchronous>, transform_indices = @transform_3, window_bounds = array<i64: 2, 16>}, {pipeline_mode = #tpu.pipeline_mode<synchronous>, transform_indices = @transform_4, window_bounds = array<i64: 2, 128, 16>}, {pipeline_mode = #tpu.pipeline_mode<synchronous>, transform_indices = @transform_5, window_bounds = array<i64: 2, 128>}, {pipeline_mode = #tpu.pipeline_mode<synchronous>, transform_indices = @transform_6, window_bounds = array<i64: 32, 32>}, {pipeline_mode = #tpu.pipeline_mode<synchronous>, transform_indices = @transform_7, window_bounds = array<i64: 1, 32>}, {pipeline_mode = #tpu.pipeline_mode<synchronous>, transform_indices = @transform_8, window_bounds = array<i64: 1, 32>}, {pipeline_mode = #tpu.pipeline_mode<synchronous>, transform_indices = @transform_9, window_bounds = array<i64: 32, 64>}, {pipeline_mode = #tpu.pipeline_mode<synchronous>, transform_indices = @transform_10, window_bounds = array<i64: 1, 64>}, {pipeline_mode = #tpu.pipeline_mode<synchronous>, transform_indices = @transform_11, window_bounds = array<i64: 64, 32>}, {pipeline_mode = #tpu.pipeline_mode<synchronous>, transform_indices = @transform_12, window_bounds = array<i64: 1, 32>}, {pipeline_mode = #tpu.pipeline_mode<synchronous>, transform_indices = @transform_13, window_bounds = array<i64: 1, 32>}, {pipeline_mode = #tpu.pipeline_mode<synchronous>, transform_indices = @transform_14, window_bounds = array<i64: 1, 32>}, {transform_indices = @transform_15, window_bounds = array<i64: 1, 128, 32>}]} {
    %c0 = arith.constant 0 : index
    %c0_0 = arith.constant 0 : index
    %c0_1 = arith.constant 0 : index
    %0 = vector.load %arg1[%c0, %c0_0, %c0_1] : memref<1x128x32xf32, #tpu.memory_space<vmem>>, vector<1x128x32xf32>
    %1 = vector.shape_cast %0 : vector<1x128x32xf32> to vector<128x32xf32>
    %2 = arith.truncf %1 : vector<128x32xf32> to vector<128x32xbf16>
    %c0_2 = arith.constant 0 : index
    %c0_3 = arith.constant 0 : index
    %3 = vector.load %arg3[%c0_2, %c0_3] : memref<32x96xbf16, #tpu.memory_space<vmem>>, vector<32x96xbf16>
    %cst = arith.constant dense<0.000000e+00> : vector<128x96xf32>
    %4 = tpu.matmul %2, %3, %cst {dimension_numbers = #tpu.dot_dimension_numbers<[1], [0], [0], [1], [0, 0, 1, 1], [], []>} : vector<128x32xbf16>, vector<32x96xbf16>, vector<128x96xf32> -> vector<128x96xf32>
    %5 = vector.extract_strided_slice %4 {offsets = [0, 0], sizes = [128, 32], strides = [1, 1]} : vector<128x96xf32> to vector<128x32xf32>
    %6 = vector.extract_strided_slice %5 {offsets = [0, 0], sizes = [128, 16], strides = [1, 1]} : vector<128x32xf32> to vector<128x16xf32>
    %7 = vector.extract_strided_slice %5 {offsets = [0, 16], sizes = [128, 16], strides = [1, 1]} : vector<128x32xf32> to vector<128x16xf32>
    %8 = vector.shape_cast %6 : vector<128x16xf32> to vector<1x128x16xf32>
    %9 = vector.shape_cast %7 : vector<128x16xf32> to vector<1x128x16xf32>
    %10 = tpu.concatenate %8, %9 in 0 : vector<1x128x16xf32>, vector<1x128x16xf32> -> vector<2x128x16xf32>
    %11 = vector.extract_strided_slice %4 {offsets = [0, 32], sizes = [128, 32], strides = [1, 1]} : vector<128x96xf32> to vector<128x32xf32>
    %12 = vector.extract_strided_slice %11 {offsets = [0, 0], sizes = [128, 16], strides = [1, 1]} : vector<128x32xf32> to vector<128x16xf32>
    %13 = vector.extract_strided_slice %11 {offsets = [0, 16], sizes = [128, 16], strides = [1, 1]} : vector<128x32xf32> to vector<128x16xf32>
    %14 = vector.shape_cast %12 : vector<128x16xf32> to vector<1x128x16xf32>
    %15 = vector.shape_cast %13 : vector<128x16xf32> to vector<1x128x16xf32>
    %16 = tpu.concatenate %14, %15 in 0 : vector<1x128x16xf32>, vector<1x128x16xf32> -> vector<2x128x16xf32>
    %17 = arith.truncf %16 : vector<2x128x16xf32> to vector<2x128x16xbf16>
    %18 = vector.extract_strided_slice %4 {offsets = [0, 64], sizes = [128, 32], strides = [1, 1]} : vector<128x96xf32> to vector<128x32xf32>
    %19 = vector.extract_strided_slice %18 {offsets = [0, 0], sizes = [128, 16], strides = [1, 1]} : vector<128x32xf32> to vector<128x16xf32>
    %20 = vector.extract_strided_slice %18 {offsets = [0, 16], sizes = [128, 16], strides = [1, 1]} : vector<128x32xf32> to vector<128x16xf32>
    %21 = vector.shape_cast %19 : vector<128x16xf32> to vector<1x128x16xf32>
    %22 = vector.shape_cast %20 : vector<128x16xf32> to vector<1x128x16xf32>
    %23 = tpu.concatenate %21, %22 in 0 : vector<1x128x16xf32>, vector<1x128x16xf32> -> vector<2x128x16xf32>
    %24 = arith.truncf %23 : vector<2x128x16xf32> to vector<2x128x16xbf16>
    %c0_4 = arith.constant 0 : index
    %c0_5 = arith.constant 0 : index
    %25 = vector.load %arg4[%c0_4, %c0_5] : memref<2x16xf32, #tpu.memory_space<vmem>>, vector<2x16xf32>
    %26 = vector.shape_cast %25 : vector<2x16xf32> to vector<2x1x16xf32>
    %27 = vector.broadcast %26 : vector<2x1x16xf32> to vector<2x128x16xf32>
    %28 = arith.addf %10, %27 : vector<2x128x16xf32>
    %29 = arith.truncf %28 : vector<2x128x16xf32> to vector<2x128x16xbf16>
    %c0_6 = arith.constant 0 : index
    %c0_7 = arith.constant 0 : index
    %c0_8 = arith.constant 0 : index
    %30 = vector.load %arg5[%c0_6, %c0_7, %c0_8] : memref<2x128x16xbf16, #tpu.memory_space<vmem>>, vector<2x128x16xbf16>
    %31 = tpu.concatenate %17, %30 in 1 : vector<2x128x16xbf16>, vector<2x128x16xbf16> -> vector<2x256x16xbf16>
    "tpu.trace_start"() <{level = 10 : i32, message = "hqd,hkd->hqk"}> : () -> ()
    %cst_9 = arith.constant dense<0.000000e+00> : vector<2x128x256xf32>
    %32 = tpu.matmul %29, %31, %cst_9 {dimension_numbers = #tpu.dot_dimension_numbers<[2], [2], [1], [1], [0, 0, 0, 1, 1, 1], [0], [0]>} : vector<2x128x16xbf16>, vector<2x256x16xbf16>, vector<2x128x256xf32> -> vector<2x128x256xf32>
    "tpu.trace_stop"() : () -> ()
    %33 = vector.extract_strided_slice %32 {offsets = [0, 0, 0], sizes = [2, 128, 128], strides = [1, 1, 1]} : vector<2x128x256xf32> to vector<2x128x128xf32>
    %34 = vector.extract_strided_slice %32 {offsets = [0, 0, 128], sizes = [2, 128, 128], strides = [1, 1, 1]} : vector<2x128x256xf32> to vector<2x128x128xf32>
    %c0_10 = arith.constant 0 : index
    %c0_11 = arith.constant 0 : index
    %35 = vector.load %arg6[%c0_10, %c0_11] : memref<2x128xf32, #tpu.memory_space<vmem>>, vector<2x128xf32>
    %36 = vector.shape_cast %35 : vector<2x128xf32> to vector<2x1x128xf32>
    %37 = vector.broadcast %36 : vector<2x1x128xf32> to vector<2x128x128xf32>
    %38 = arith.addf %34, %37 : vector<2x128x128xf32>
    %39 = tpu.iota {dimensions = array<i32: 0>} : vector<128x1xi32>
    %c127_i32 = arith.constant 127 : i32
    %40 = vector.broadcast %c127_i32 : i32 to vector<128x1xi32>
    %41 = arith.subi %40, %39 : vector<128x1xi32>
    %c127_i32_12 = arith.constant 127 : i32
    %42 = tpu.dynamic_rotate %38 by %c127_i32_12 dim 2 : vector<2x128x128xf32>, i32 -> vector<2x128x128xf32>
    %c1_i32 = arith.constant 1 : i32
    %43 = vector.broadcast %c1_i32 : i32 to vector<128x1xi32>
    %44 = arith.andi %41, %43 : vector<128x1xi32>
    %c0_i32 = arith.constant 0 : i32
    %45 = vector.broadcast %c0_i32 : i32 to vector<128x1xi32>
    %46 = arith.cmpi ne, %44, %45 : vector<128x1xi32>
    %47 = vector.shape_cast %46 : vector<128x1xi1> to vector<1x128x1xi1>
    %48 = vector.shape_cast %47 : vector<1x128x1xi1> to vector<1x128x1xi1>
    %49 = vector.broadcast %48 : vector<1x128x1xi1> to vector<2x128x128xi1>
    %50 = arith.select %49, %42, %38 : vector<2x128x128xi1>, vector<2x128x128xf32>
    %c126_i32 = arith.constant 126 : i32
    %51 = tpu.dynamic_rotate %50 by %c126_i32 dim 2 : vector<2x128x128xf32>, i32 -> vector<2x128x128xf32>
    %c2_i32 = arith.constant 2 : i32
    %52 = vector.broadcast %c2_i32 : i32 to vector<128x1xi32>
    %53 = arith.andi %41, %52 : vector<128x1xi32>
    %c0_i32_13 = arith.constant 0 : i32
    %54 = vector.broadcast %c0_i32_13 : i32 to vector<128x1xi32>
    %55 = arith.cmpi ne, %53, %54 : vector<128x1xi32>
    %56 = vector.shape_cast %55 : vector<128x1xi1> to vector<1x128x1xi1>
    %57 = vector.shape_cast %56 : vector<1x128x1xi1> to vector<1x128x1xi1>
    %58 = vector.broadcast %57 : vector<1x128x1xi1> to vector<2x128x128xi1>
    %59 = arith.select %58, %51, %50 : vector<2x128x128xi1>, vector<2x128x128xf32>
    %c124_i32 = arith.constant 124 : i32
    %60 = tpu.dynamic_rotate %59 by %c124_i32 dim 2 : vector<2x128x128xf32>, i32 -> vector<2x128x128xf32>
    %c4_i32 = arith.constant 4 : i32
    %61 = vector.broadcast %c4_i32 : i32 to vector<128x1xi32>
    %62 = arith.andi %41, %61 : vector<128x1xi32>
    %c0_i32_14 = arith.constant 0 : i32
    %63 = vector.broadcast %c0_i32_14 : i32 to vector<128x1xi32>
    %64 = arith.cmpi ne, %62, %63 : vector<128x1xi32>
    %65 = vector.shape_cast %64 : vector<128x1xi1> to vector<1x128x1xi1>
    %66 = vector.shape_cast %65 : vector<1x128x1xi1> to vector<1x128x1xi1>
    %67 = vector.broadcast %66 : vector<1x128x1xi1> to vector<2x128x128xi1>
    %68 = arith.select %67, %60, %59 : vector<2x128x128xi1>, vector<2x128x128xf32>
    %c120_i32 = arith.constant 120 : i32
    %69 = tpu.dynamic_rotate %68 by %c120_i32 dim 2 : vector<2x128x128xf32>, i32 -> vector<2x128x128xf32>
    %c8_i32 = arith.constant 8 : i32
    %70 = vector.broadcast %c8_i32 : i32 to vector<128x1xi32>
    %71 = arith.andi %41, %70 : vector<128x1xi32>
    %c0_i32_15 = arith.constant 0 : i32
    %72 = vector.broadcast %c0_i32_15 : i32 to vector<128x1xi32>
    %73 = arith.cmpi ne, %71, %72 : vector<128x1xi32>
    %74 = vector.shape_cast %73 : vector<128x1xi1> to vector<1x128x1xi1>
    %75 = vector.shape_cast %74 : vector<1x128x1xi1> to vector<1x128x1xi1>
    %76 = vector.broadcast %75 : vector<1x128x1xi1> to vector<2x128x128xi1>
    %77 = arith.select %76, %69, %68 : vector<2x128x128xi1>, vector<2x128x128xf32>
    %c112_i32 = arith.constant 112 : i32
    %78 = tpu.dynamic_rotate %77 by %c112_i32 dim 2 : vector<2x128x128xf32>, i32 -> vector<2x128x128xf32>
    %c16_i32 = arith.constant 16 : i32
    %79 = vector.broadcast %c16_i32 : i32 to vector<128x1xi32>
    %80 = arith.andi %41, %79 : vector<128x1xi32>
    %c0_i32_16 = arith.constant 0 : i32
    %81 = vector.broadcast %c0_i32_16 : i32 to vector<128x1xi32>
    %82 = arith.cmpi ne, %80, %81 : vector<128x1xi32>
    %83 = vector.shape_cast %82 : vector<128x1xi1> to vector<1x128x1xi1>
    %84 = vector.shape_cast %83 : vector<1x128x1xi1> to vector<1x128x1xi1>
    %85 = vector.broadcast %84 : vector<1x128x1xi1> to vector<2x128x128xi1>
    %86 = arith.select %85, %78, %77 : vector<2x128x128xi1>, vector<2x128x128xf32>
    %c96_i32 = arith.constant 96 : i32
    %87 = tpu.dynamic_rotate %86 by %c96_i32 dim 2 : vector<2x128x128xf32>, i32 -> vector<2x128x128xf32>
    %c32_i32 = arith.constant 32 : i32
    %88 = vector.broadcast %c32_i32 : i32 to vector<128x1xi32>
    %89 = arith.andi %41, %88 : vector<128x1xi32>
    %c0_i32_17 = arith.constant 0 : i32
    %90 = vector.broadcast %c0_i32_17 : i32 to vector<128x1xi32>
    %91 = arith.cmpi ne, %89, %90 : vector<128x1xi32>
    %92 = vector.shape_cast %91 : vector<128x1xi1> to vector<1x128x1xi1>
    %93 = vector.shape_cast %92 : vector<1x128x1xi1> to vector<1x128x1xi1>
    %94 = vector.broadcast %93 : vector<1x128x1xi1> to vector<2x128x128xi1>
    %95 = arith.select %94, %87, %86 : vector<2x128x128xi1>, vector<2x128x128xf32>
    %c64_i32 = arith.constant 64 : i32
    %96 = tpu.dynamic_rotate %95 by %c64_i32 dim 2 : vector<2x128x128xf32>, i32 -> vector<2x128x128xf32>
    %c64_i32_18 = arith.constant 64 : i32
    %97 = vector.broadcast %c64_i32_18 : i32 to vector<128x1xi32>
    %98 = arith.andi %41, %97 : vector<128x1xi32>
    %c0_i32_19 = arith.constant 0 : i32
    %99 = vector.broadcast %c0_i32_19 : i32 to vector<128x1xi32>
    %100 = arith.cmpi ne, %98, %99 : vector<128x1xi32>
    %101 = vector.shape_cast %100 : vector<128x1xi1> to vector<1x128x1xi1>
    %102 = vector.shape_cast %101 : vector<1x128x1xi1> to vector<1x128x1xi1>
    %103 = vector.broadcast %102 : vector<1x128x1xi1> to vector<2x128x128xi1>
    %104 = arith.select %103, %96, %95 : vector<2x128x128xi1>, vector<2x128x128xf32>
    %105 = arith.addf %33, %104 : vector<2x128x128xf32>
    %cst_20 = arith.constant 2.500000e-01 : f32
    %106 = vector.broadcast %cst_20 : f32 to vector<2x128x128xf32>
    %107 = arith.mulf %105, %106 : vector<2x128x128xf32>
    %c0_21 = arith.constant 0 : index
    %c0_22 = arith.constant 0 : index
    %108 = vector.load %arg2[%c0_21, %c0_22] : memref<128x128xbf16, #tpu.memory_space<vmem>>, vector<128x128xbf16>
    %109 = vector.shape_cast %108 : vector<128x128xbf16> to vector<1x128x128xbf16>
    %110 = arith.extf %109 : vector<1x128x128xbf16> to vector<1x128x128xf32>
    %111 = vector.broadcast %110 : vector<1x128x128xf32> to vector<2x128x128xf32>
    %112 = arith.addf %107, %111 : vector<2x128x128xf32>
    %cst_23 = arith.constant dense<0xFF800000> : vector<2x128xf32>
    %113 = vector.multi_reduction <maximumf>, %112, %cst_23 [2] : vector<2x128x128xf32> to vector<2x128xf32>
    %114 = vector.shape_cast %113 : vector<2x128xf32> to vector<2x128x1xf32>
    %115 = vector.broadcast %114 : vector<2x128x1xf32> to vector<2x128x128xf32>
    %116 = arith.subf %112, %115 : vector<2x128x128xf32>
    %117 = math.exp %116 : vector<2x128x128xf32>
    %cst_24 = arith.constant dense<0.000000e+00> : vector<2x128xf32>
    %118 = vector.multi_reduction <add>, %117, %cst_24 [2] : vector<2x128x128xf32> to vector<2x128xf32>
    %119 = vector.shape_cast %118 : vector<2x128xf32> to vector<2x128x1xf32>
    %120 = tpu.reciprocal %119 {approx = true} : vector<2x128x1xf32> -> vector<2x128x1xf32>
    %121 = vector.broadcast %120 : vector<2x128x1xf32> to vector<2x128x128xf32>
    %122 = arith.mulf %117, %121 : vector<2x128x128xf32>
    %123 = arith.truncf %122 : vector<2x128x128xf32> to vector<2x128x128xbf16>
    "tpu.trace_start"() <{level = 10 : i32, message = "hqk,hkd->hqd"}> : () -> ()
    %cst_25 = arith.constant dense<0.000000e+00> : vector<2x128x16xf32>
    %124 = tpu.matmul %123, %24, %cst_25 {dimension_numbers = #tpu.dot_dimension_numbers<[2], [1], [1], [2], [0, 0, 0, 1, 1, 2], [0], [0]>} : vector<2x128x128xbf16>, vector<2x128x16xbf16>, vector<2x128x16xf32> -> vector<2x128x16xf32>
    "tpu.trace_stop"() : () -> ()
    %125 = vector.extract_strided_slice %124 {offsets = [0, 0, 0], sizes = [1, 128, 16], strides = [1, 1, 1]} : vector<2x128x16xf32> to vector<1x128x16xf32>
    %126 = vector.shape_cast %125 : vector<1x128x16xf32> to vector<128x16xf32>
    %127 = vector.extract_strided_slice %124 {offsets = [1, 0, 0], sizes = [1, 128, 16], strides = [1, 1, 1]} : vector<2x128x16xf32> to vector<1x128x16xf32>
    %128 = vector.shape_cast %127 : vector<1x128x16xf32> to vector<128x16xf32>
    %129 = tpu.concatenate %126, %128 in 1 : vector<128x16xf32>, vector<128x16xf32> -> vector<128x32xf32>
    %130 = arith.truncf %129 : vector<128x32xf32> to vector<128x32xbf16>
    %c0_26 = arith.constant 0 : index
    %c0_27 = arith.constant 0 : index
    %131 = vector.load %arg7[%c0_26, %c0_27] : memref<32x32xbf16, #tpu.memory_space<vmem>>, vector<32x32xbf16>
    %cst_28 = arith.constant dense<0.000000e+00> : vector<128x32xf32>
    %132 = tpu.matmul %130, %131, %cst_28 {dimension_numbers = #tpu.dot_dimension_numbers<[1], [0], [0], [1], [0, 0, 1, 1], [], []>} : vector<128x32xbf16>, vector<32x32xbf16>, vector<128x32xf32> -> vector<128x32xf32>
    %133 = arith.addf %1, %132 : vector<128x32xf32>
    %c0_29 = arith.constant 0 : index
    %c0_30 = arith.constant 0 : index
    %134 = vector.load %arg8[%c0_29, %c0_30] : memref<1x32xf32, #tpu.memory_space<vmem>>, vector<1x32xf32>
    %c0_31 = arith.constant 0 : index
    %c0_32 = arith.constant 0 : index
    %135 = vector.load %arg9[%c0_31, %c0_32] : memref<1x32xf32, #tpu.memory_space<vmem>>, vector<1x32xf32>
    %cst_33 = arith.constant dense<0.000000e+00> : vector<128xf32>
    %136 = vector.multi_reduction <add>, %133, %cst_33 [1] : vector<128x32xf32> to vector<128xf32>
    %137 = vector.shape_cast %136 : vector<128xf32> to vector<128x1xf32>
    %cst_34 = arith.constant 3.200000e+01 : f32
    %138 = vector.broadcast %cst_34 : f32 to vector<128x1xf32>
    %139 = arith.divf %137, %138 : vector<128x1xf32>
    %140 = vector.broadcast %139 : vector<128x1xf32> to vector<128x32xf32>
    %141 = arith.subf %133, %140 : vector<128x32xf32>
    %142 = arith.mulf %141, %141 : vector<128x32xf32>
    %cst_35 = arith.constant dense<0.000000e+00> : vector<128xf32>
    %143 = vector.multi_reduction <add>, %142, %cst_35 [1] : vector<128x32xf32> to vector<128xf32>
    %144 = vector.shape_cast %143 : vector<128xf32> to vector<128x1xf32>
    %cst_36 = arith.constant 3.200000e+01 : f32
    %145 = vector.broadcast %cst_36 : f32 to vector<128x1xf32>
    %146 = arith.divf %144, %145 : vector<128x1xf32>
    %147 = vector.broadcast %139 : vector<128x1xf32> to vector<128x32xf32>
    %148 = arith.subf %133, %147 : vector<128x32xf32>
    %cst_37 = arith.constant 9.99999974E-6 : f32
    %149 = vector.broadcast %cst_37 : f32 to vector<128x1xf32>
    %150 = arith.addf %146, %149 : vector<128x1xf32>
    %151 = math.sqrt %150 : vector<128x1xf32>
    %152 = vector.broadcast %151 : vector<128x1xf32> to vector<128x32xf32>
    %153 = arith.divf %148, %152 : vector<128x32xf32>
    %154 = vector.broadcast %134 : vector<1x32xf32> to vector<128x32xf32>
    %155 = arith.mulf %153, %154 : vector<128x32xf32>
    %156 = vector.broadcast %135 : vector<1x32xf32> to vector<128x32xf32>
    %157 = arith.addf %155, %156 : vector<128x32xf32>
    %158 = arith.truncf %157 : vector<128x32xf32> to vector<128x32xbf16>
    %c0_38 = arith.constant 0 : index
    %c0_39 = arith.constant 0 : index
    %159 = vector.load %arg10[%c0_38, %c0_39] : memref<32x64xbf16, #tpu.memory_space<vmem>>, vector<32x64xbf16>
    %cst_40 = arith.constant dense<0.000000e+00> : vector<128x64xf32>
    %160 = tpu.matmul %158, %159, %cst_40 {dimension_numbers = #tpu.dot_dimension_numbers<[1], [0], [0], [1], [0, 0, 1, 1], [], []>} : vector<128x32xbf16>, vector<32x64xbf16>, vector<128x64xf32> -> vector<128x64xf32>
    %c0_41 = arith.constant 0 : index
    %c0_42 = arith.constant 0 : index
    %161 = vector.load %arg11[%c0_41, %c0_42] : memref<1x64xf32, #tpu.memory_space<vmem>>, vector<1x64xf32>
    %162 = vector.broadcast %161 : vector<1x64xf32> to vector<128x64xf32>
    %163 = arith.addf %160, %162 : vector<128x64xf32>
    %cst_43 = arith.constant 0.000000e+00 : f32
    %164 = vector.broadcast %cst_43 : f32 to vector<128x64xf32>
    %165 = arith.maximumf %163, %164 : vector<128x64xf32>
    %166 = arith.truncf %165 : vector<128x64xf32> to vector<128x64xbf16>
    %c0_44 = arith.constant 0 : index
    %c0_45 = arith.constant 0 : index
    %167 = vector.load %arg12[%c0_44, %c0_45] : memref<64x32xbf16, #tpu.memory_space<vmem>>, vector<64x32xbf16>
    %cst_46 = arith.constant dense<0.000000e+00> : vector<128x32xf32>
    %168 = tpu.matmul %166, %167, %cst_46 {dimension_numbers = #tpu.dot_dimension_numbers<[1], [0], [0], [1], [0, 0, 1, 1], [], []>} : vector<128x64xbf16>, vector<64x32xbf16>, vector<128x32xf32> -> vector<128x32xf32>
    %c0_47 = arith.constant 0 : index
    %c0_48 = arith.constant 0 : index
    %169 = vector.load %arg13[%c0_47, %c0_48] : memref<1x32xf32, #tpu.memory_space<vmem>>, vector<1x32xf32>
    %170 = vector.broadcast %169 : vector<1x32xf32> to vector<128x32xf32>
    %171 = arith.addf %168, %170 : vector<128x32xf32>
    %172 = arith.addf %157, %171 : vector<128x32xf32>
    %c0_49 = arith.constant 0 : index
    %c0_50 = arith.constant 0 : index
    %173 = vector.load %arg14[%c0_49, %c0_50] : memref<1x32xf32, #tpu.memory_space<vmem>>, vector<1x32xf32>
    %c0_51 = arith.constant 0 : index
    %c0_52 = arith.constant 0 : index
    %174 = vector.load %arg15[%c0_51, %c0_52] : memref<1x32xf32, #tpu.memory_space<vmem>>, vector<1x32xf32>
    %cst_53 = arith.constant dense<0.000000e+00> : vector<128xf32>
    %175 = vector.multi_reduction <add>, %172, %cst_53 [1] : vector<128x32xf32> to vector<128xf32>
    %176 = vector.shape_cast %175 : vector<128xf32> to vector<128x1xf32>
    %cst_54 = arith.constant 3.200000e+01 : f32
    %177 = vector.broadcast %cst_54 : f32 to vector<128x1xf32>
    %178 = arith.divf %176, %177 : vector<128x1xf32>
    %179 = vector.broadcast %178 : vector<128x1xf32> to vector<128x32xf32>
    %180 = arith.subf %172, %179 : vector<128x32xf32>
    %181 = arith.mulf %180, %180 : vector<128x32xf32>
    %cst_55 = arith.constant dense<0.000000e+00> : vector<128xf32>
    %182 = vector.multi_reduction <add>, %181, %cst_55 [1] : vector<128x32xf32> to vector<128xf32>
    %183 = vector.shape_cast %182 : vector<128xf32> to vector<128x1xf32>
    %cst_56 = arith.constant 3.200000e+01 : f32
    %184 = vector.broadcast %cst_56 : f32 to vector<128x1xf32>
    %185 = arith.divf %183, %184 : vector<128x1xf32>
    %186 = vector.broadcast %178 : vector<128x1xf32> to vector<128x32xf32>
    %187 = arith.subf %172, %186 : vector<128x32xf32>
    %cst_57 = arith.constant 9.99999974E-6 : f32
    %188 = vector.broadcast %cst_57 : f32 to vector<128x1xf32>
    %189 = arith.addf %185, %188 : vector<128x1xf32>
    %190 = math.sqrt %189 : vector<128x1xf32>
    %191 = vector.broadcast %190 : vector<128x1xf32> to vector<128x32xf32>
    %192 = arith.divf %187, %191 : vector<128x32xf32>
    %193 = vector.broadcast %173 : vector<1x32xf32> to vector<128x32xf32>
    %194 = arith.mulf %192, %193 : vector<128x32xf32>
    %195 = vector.broadcast %174 : vector<1x32xf32> to vector<128x32xf32>
    %196 = arith.addf %194, %195 : vector<128x32xf32>
    %c0_58 = arith.constant 0 : index
    %c0_59 = arith.constant 0 : index
    %c0_60 = arith.constant 0 : index
    %197 = vector.load %arg16[%c0_58, %c0_59, %c0_60] : memref<1x128x32xf32, #tpu.memory_space<vmem>>, vector<1x128x32xf32>
    %198 = vector.shape_cast %197 : vector<1x128x32xf32> to vector<128x32xf32>
    %199 = vector.shape_cast %196 : vector<128x32xf32> to vector<1x128x32xf32>
    tpu.vector_store %arg16[%c0_58, %c0_59, %c0_60], %199 {strides = array<i32>} : memref<1x128x32xf32, #tpu.memory_space<vmem>>, vector<1x128x32xf32>,
    return
  }
  func.func @transform_0(%arg0: i32) -> (i32, i32, i32) {
    %c0_i32 = arith.constant 0 : i32
    %c0_i32_0 = arith.constant 0 : i32
    %c0_i32_1 = arith.constant 0 : i32
    return %arg0, %c0_i32, %c0_i32_0 : i32, i32, i32
  }
  func.func @transform_1(%arg0: i32) -> (i32, i32) {
    %c0_i32 = arith.constant 0 : i32
    %c0_i32_0 = arith.constant 0 : i32
    %c0_i32_1 = arith.constant 0 : i32
    return %c0_i32, %c0_i32_0 : i32, i32
  }
  func.func @transform_2(%arg0: i32) -> (i32, i32) {
    %c0_i32 = arith.constant 0 : i32
    %c0_i32_0 = arith.constant 0 : i32
    %c0_i32_1 = arith.constant 0 : i32
    return %c0_i32, %c0_i32_0 : i32, i32
  }
  func.func @transform_3(%arg0: i32) -> (i32, i32) {
    %c0_i32 = arith.constant 0 : i32
    %c0_i32_0 = arith.constant 0 : i32
    %c0_i32_1 = arith.constant 0 : i32
    return %c0_i32, %c0_i32_0 : i32, i32
  }
  func.func @transform_4(%arg0: i32) -> (i32, i32, i32) {
    %c0_i32 = arith.constant 0 : i32
    %c0_i32_0 = arith.constant 0 : i32
    %c0_i32_1 = arith.constant 0 : i32
    %c0_i32_2 = arith.constant 0 : i32
    return %c0_i32, %c0_i32_0, %c0_i32_1 : i32, i32, i32
  }
  func.func @transform_5(%arg0: i32) -> (i32, i32) {
    %c0_i32 = arith.constant 0 : i32
    %c0_i32_0 = arith.constant 0 : i32
    %c0_i32_1 = arith.constant 0 : i32
    return %c0_i32, %c0_i32_0 : i32, i32
  }
  func.func @transform_6(%arg0: i32) -> (i32, i32) {
    %c0_i32 = arith.constant 0 : i32
    %c0_i32_0 = arith.constant 0 : i32
    %c0_i32_1 = arith.constant 0 : i32
    return %c0_i32, %c0_i32_0 : i32, i32
  }
  func.func @transform_7(%arg0: i32) -> (i32, i32) {
    %c0_i32 = arith.constant 0 : i32
    %c0_i32_0 = arith.constant 0 : i32
    %c0_i32_1 = arith.constant 0 : i32
    return %c0_i32, %c0_i32_0 : i32, i32
  }
  func.func @transform_8(%arg0: i32) -> (i32, i32) {
    %c0_i32 = arith.constant 0 : i32
    %c0_i32_0 = arith.constant 0 : i32
    %c0_i32_1 = arith.constant 0 : i32
    return %c0_i32, %c0_i32_0 : i32, i32
  }
  func.func @transform_9(%arg0: i32) -> (i32, i32) {
    %c0_i32 = arith.constant 0 : i32
    %c0_i32_0 = arith.constant 0 : i32
    %c0_i32_1 = arith.constant 0 : i32
    return %c0_i32, %c0_i32_0 : i32, i32
  }
  func.func @transform_10(%arg0: i32) -> (i32, i32) {
    %c0_i32 = arith.constant 0 : i32
    %c0_i32_0 = arith.constant 0 : i32
    %c0_i32_1 = arith.constant 0 : i32
    return %c0_i32, %c0_i32_0 : i32, i32
  }
  func.func @transform_11(%arg0: i32) -> (i32, i32) {
    %c0_i32 = arith.constant 0 : i32
    %c0_i32_0 = arith.constant 0 : i32
    %c0_i32_1 = arith.constant 0 : i32
    return %c0_i32, %c0_i32_0 : i32, i32
  }
  func.func @transform_12(%arg0: i32) -> (i32, i32) {
    %c0_i32 = arith.constant 0 : i32
    %c0_i32_0 = arith.constant 0 : i32
    %c0_i32_1 = arith.constant 0 : i32
    return %c0_i32, %c0_i32_0 : i32, i32
  }
  func.func @transform_13(%arg0: i32) -> (i32, i32) {
    %c0_i32 = arith.constant 0 : i32
    %c0_i32_0 = arith.constant 0 : i32
    %c0_i32_1 = arith.constant 0 : i32
    return %c0_i32, %c0_i32_0 : i32, i32
  }
  func.func @transform_14(%arg0: i32) -> (i32, i32) {
    %c0_i32 = arith.constant 0 : i32
    %c0_i32_0 = arith.constant 0 : i32
    %c0_i32_1 = arith.constant 0 : i32
    return %c0_i32, %c0_i32_0 : i32, i32
  }
  func.func @transform_15(%arg0: i32) -> (i32, i32, i32) {
    %c0_i32 = arith.constant 0 : i32
    %c0_i32_0 = arith.constant 0 : i32
    %c0_i32_1 = arith.constant 0 : i32
    return %arg0, %c0_i32, %c0_i32_0 : i32, i32, i32
  }
}

</mosaic_0001>

<bundles_post_ra>
// kernel: tpu_custom_call.1
= control target key start
LH: loop header
LB: loop body
LE: loop exit
PB: predicated region body
PF: predicated region fallthrough
CT: control target
= control target key end

     0   :  { %s5600_s18 = smov 0   ;;  %s8646_s0 = inlined_call_operand.vmem [shape: f32[2,128,32], index: 0, kind: input, shape index: {}]   ;;  %s8647_s1 = inlined_call_operand.vmem [shape: bf16[128,128], index: 1, kind: input, shape index: {}]   ;;  %s8648_s2 = inlined_call_operand.vmem [shape: bf16[32,96], index: 2, kind: input, shape index: {}]   ;;  %s8649_s3 = inlined_call_operand.vmem [shape: f32[2,16], index: 3, kind: input, shape index: {}]   ;;  %s8650_s4 = inlined_call_operand.vmem [shape: bf16[2,128,16], index: 4, kind: input, shape index: {}]   ;;  %s8651_s5 = inlined_call_operand.vmem [shape: f32[2,128], index: 5, kind: input, shape index: {}]   ;;  %s8652_s6 = inlined_call_operand.vmem [shape: bf16[32,32], index: 6, kind: input, shape index: {}]   ;;  %s8653_s7 = inlined_call_operand.vmem [shape: f32[1,32], index: 7, kind: input, shape index: {}]   ;;  %s8654_s8 = inlined_call_operand.vmem [shape: f32[1,32], index: 8, kind: input, shape index: {}]   ;;  %s8655_s9 = inlined_call_operand.vmem [shape: bf16[32,64], index: 9, kind: input, shape index: {}]   ;;  %s8656_s10 = inlined_call_operand.vmem [shape: f32[1,64], index: 10, kind: input, shape index: {}]   ;;  %s8657_s11 = inlined_call_operand.vmem [shape: bf16[64,32], index: 11, kind: input, shape index: {}]   ;;  %s8658_s12 = inlined_call_operand.vmem [shape: f32[1,32], index: 12, kind: input, shape index: {}]   ;;  %s8659_s13 = inlined_call_operand.vmem [shape: f32[1,32], index: 13, kind: input, shape index: {}]   ;;  %s8660_s14 = inlined_call_operand.vmem [shape: f32[1,32], index: 14, kind: input, shape index: {}]   ;;  %s8661_s15 = inlined_call_operand.vmem [shape: f32[2,128,32], index: 15, kind: output, shape index: {}]  }
   0x1 LB: > { %s4706_s19 = sadd.s32 4294967295, %s5508_s18   ;;  %p4710_p0 = scmp.ge.s32.totalorder %s5508_s18, 1  ;;  %s5508_s18 = sphi %s5600_s18, %s25_s18  }
   0x2   : > { %p437_p1 = scmp.lt.s32.totalorder %s5508_s18, 3 }
   0x4   : > { %p438_p2 = pnand %p4710_p0, %p437_p1 }
   0x6   : > { %441 = sbr.rel (%p438_p2) target bundleno = 3902 (0xf3e), region = 80 }
   0xd   : > { %v5204_v0 = vld [vmem:[%s8648_s2] sm:$0xff]   ;;  %p485_p3 = scmp.lt.s32.totalorder %s4706_s19, 1  ;;  %v5205_v1 = vld [vmem:[%s8648_s2 + $0x8] sm:$0xff]   ;;  %s5510_s29 = smov 32   ;;  %v5208_v4 = vld [vmem:[%s8650_s4 + $0x50] sm:$0xff]   ;;  %vm8676_vm0 = vcmask 261120   ;;  %v751_v50 = vlaneseq }
   0xe   : > { %4978 = vmatprep.subr.bf16.mxu0 %v5204_v0  ;;  %v5206_v2 = vld [vmem:[%s8650_s4 + $0x40] sm:$0xff]   ;;  %v5207_v3 = vld [vmem:[%s8650_s4 + $0x48] sm:$0xff]   ;;  %952 = vrot.lane.b32.xlu0 %v5208_v4, %s5510_s29  ;;  %v5209_v14 = vld [vmem:[%s8650_s4 + $0x58] sm:$0xff]   ;;  %s5511_s26 = smov 96   ;;  %v5512_v48 = vmov 1966171168  }
   0xf   : > { %s9008_s19 = smov (!%p485_p3, %s4706_s19), 1  ;;  %4979 = vmatpush3.bf16.msra.mxu0 %v5204_v0  ;;  %948 = vrot.lane.b32.xlu1 %v5206_v2, %s5510_s29  ;;  %v5210_v19 = vld [vmem:[%s8650_s4 + $0x60] sm:$0xff]   ;;  %v5211_v20 = vld [vmem:[%s8650_s4 + $0x68] sm:$0xff]   ;;  %v5212_v22 = vld [vmem:[%s8650_s4 + $0x70] sm:$0xff]   ;;  %v749_v49 = vunpack.c.l.s4 %v5512_v48  ;;  %v5715_v52 = vshrl.u32 %v751_v50, 7  ;;  %s5513_s16 = smov 112  }
  0x10   : > { %4980 = vmatprep.subr.bf16.mxu0 %v5205_v1  ;;  %s4799_s28 = sshll.u32 %s9008_s19, 7  ;;  %v5213_v24 = vld [vmem:[%s8650_s4 + $0x78] sm:$0xff]   ;;  %v5214_v28 = vld [vmem:[%s8650_s4] sm:$0xff]   ;;  %v5215_v30 = vld [vmem:[%s8650_s4 + $0x8] sm:$0xff]   ;;  %vm8677_vm1 = vcmask 130048   ;;  %s5515_s24 = smov 127  }
  0x11   : > { %s5632_s21 = scalar_lea.vmem %s8646_s0, %s4799_s28  ;;  %v5216_v31 = vld [vmem:[%s8650_s4 + $0x10] sm:$0xff]   ;;  %v5217_v33 = vld [vmem:[%s8650_s4 + $0x18] sm:$0xff]   ;;  %v5218_v35 = vld [vmem:[%s8650_s4 + $0x20] sm:$0xff]   ;;  %v750_v51 = vunpack.c.0.s8 %v749_v49  ;;  %v5730_v57 = vsub.s32 0, %v5715_v52  ;;  %s5516_s25 = smov 126  }
  0x12   : > { %v496_v5 = vld [vmem:[%s5632_s21] sm:$0xff]  ;;  %v497_v6 = vld [vmem:[%s5632_s21 + $0x8] sm:$0xff]  ;;  %v498_v7 = vld [vmem:[%s5632_s21 + $0x10] sm:$0xff]  ;;  %956 = vrot.lane.b32.xlu0 %v5210_v19, %s5510_s29  ;;  %s5517_s27 = smov 124   ;;  %s5518_s30 = smov 120  }
  0x13   : > { %4981 = vmatpush3.bf16.msra.mxu0 %v5205_v1  ;;  %v512_v8 = vpack.c.bf16 %v497_v6, %v496_v5  ;;  %v499_v9 = vld [vmem:[%s5632_s21 + $0x18] sm:$0xff]  ;;  %v500_v10 = vld [vmem:[%s5632_s21 + $0x20] sm:$0xff]  ;;  %v501_v11 = vld [vmem:[%s5632_s21 + $0x28] sm:$0xff]  ;;  %950 = vrot.lane.b32.xlu1 %v5207_v3, %s5510_s29  ;;  %v5718_v53 = vsub.s32 %v750_v51, %v5715_v52  ;;  %s5519_s20 = smov 16   ;;  %s8491_s22 = scalar_lea.vmem %s8661_s15, %s4799_s28 }
  0x14   : > { %v513_v12 = vpack.c.bf16 %v499_v9, %v498_v7  ;;  %v514_v13 = vpack.c.bf16 %v501_v11, %v500_v10  ;;  %v502_v15 = vld [vmem:[%s5632_s21 + $0x30] sm:$0xff]  ;;  %v503_v16 = vld [vmem:[%s5632_s21 + $0x38] sm:$0xff]  ;;  %v504_v17 = vld [vmem:[%s5632_s21 + $0x40] sm:$0xff] }
  0x15   : > { %4982 = vmatprep.mubr.msk.bf16.mxu0 %vm8676_vm0, %v512_v8  ;;  %v505_v18 = vld [vmem:[%s5632_s21 + $0x48] sm:$0xff]  ;;  %v515_v21 = vpack.c.bf16 %v503_v16, %v502_v15  ;;  %v506_v25 = vld [vmem:[%s5632_s21 + $0x50] sm:$0xff]  ;;  %v507_v26 = vld [vmem:[%s5632_s21 + $0x58] sm:$0xff] }
  0x16   : > { %4983 = vmatmul.mubr.msk.bf16.vlgmr.msra.gmra.mrb[0].mxu0 %vm8676_vm0, %v513_v12  ;;  %v516_v23 = vpack.c.bf16 %v505_v18, %v504_v17  ;;  %v508_v27 = vld [vmem:[%s5632_s21 + $0x60] sm:$0xff]  ;;  %960 = vrot.lane.b32.xlu0 %v5212_v22, %s5510_s29  ;;  %v509_v29 = vld [vmem:[%s5632_s21 + $0x68] sm:$0xff]  ;;  %v517_v32 = vpack.c.bf16 %v507_v26, %v506_v25  ;;  %v510_v36 = vld [vmem:[%s5632_s21 + $0x70] sm:$0xff] }
  0x17   : > { %4986 = vmatprep.mubr.msk.bf16.mxu0 %vm8676_vm0, %v514_v13  ;;  %954 = vrot.lane.b32.xlu1 %v5209_v14, %s5510_s29  ;;  %v518_v34 = vpack.c.bf16 %v509_v29, %v508_v27  ;;  %v511_v37 = vld [vmem:[%s5632_s21 + $0x78] sm:$0xff]  ;;  %v5220_v38 = vld [vmem:[%s8650_s4 + $0x28] sm:$0xff]   ;;  %v5219_v40 = vld [vmem:[%s8650_s4 + $0x30] sm:$0xff]  }
  0x18   : > { %v519_v39 = vpack.c.bf16 %v511_v37, %v510_v36  ;;  %v5723_v54 = vld.sshfl [vmem:[%s8649_s3] sm:$0x11 pattern:$0x75316420]  ;;  %v5221_v22 = vld [vmem:[%s8650_s4 + $0x38] sm:$0xff]  }
  0x19   : > { %v754_v56 = vrot.slane %v5723_v54, %v5718_v53 }
  0x1a   : > { %932 = vrot.lane.b32.xlu0 %v5214_v28, %s5510_s29 }
  0x1b   : > { %958 = vrot.lane.b32.xlu1 %v5211_v20, %s5510_s29  ;;  %v5735_v59 = vrot.slane %v754_v56, %v5730_v57 }
  0x1e   : > { %4987 = vmatmul.mubr.msk.bf16.gmra.mrb[4].mxu0 %vm8676_vm0, %v515_v21  ;;  %936 = vrot.lane.b32.xlu0 %v5216_v31, %s5510_s29 }
  0x1f   : > { %4990 = vmatprep.mubr.msk.bf16.mxu0 %vm8676_vm0, %v516_v23  ;;  %962 = vrot.lane.b32.xlu1 %v5213_v24, %s5510_s29 }
  0x22   : > { %940 = vrot.lane.b32.xlu0 %v5218_v35, %s5510_s29 }
  0x23   : > { %934 = vrot.lane.b32.xlu1 %v5215_v30, %s5510_s29 }
  0x26   : > { %4991 = vmatmul.mubr.msk.bf16.gmra.mrb[8].mxu0 %vm8676_vm0, %v517_v32  ;;  %944 = vrot.lane.b32.xlu0 %v5219_v40, %s5510_s29 }
  0x27   : > { %4994 = vmatprep.mubr.msk.bf16.mxu0 %vm8676_vm0, %v518_v34  ;;  %938 = vrot.lane.b32.xlu1 %v5217_v33, %s5510_s29 }
  0x2b   : > { %942 = vrot.lane.b32.xlu1 %v5220_v38, %s5510_s29 }
  0x2e   : > { %4995 = vmatmul.mubr.msk.bf16.gmra.mrb[12].mxu0 %vm8676_vm0, %v519_v39 }
  0x80   : > { %v953_v42 = vpop.permute.xlu0 %952 }
  0x81   : > { %v949_v41 = vpop.permute.xlu1 %948 }
  0x82   : > { %1214 = vrot.lane.b32.xlu0 %v949_v41, %s5511_s26 }
  0x84   : > { %v957_v45 = vpop.permute.xlu0 %956 }
  0x85   : > { %v951_v43 = vpop.permute.xlu1 %950 }
  0x86   : > { %1216 = vrot.lane.b32.xlu1 %v951_v43, %s5511_s26  ;;  %1218 = vrot.lane.b32.xlu0 %v953_v42, %s5511_s26 }
  0x88   : > { %v961_v47 = vpop.permute.xlu0 %960 }
  0x89   : > { %v955_v44 = vpop.permute.xlu1 %954 }
  0x8a   : > { %1220 = vrot.lane.b32.xlu1 %v955_v44, %s5511_s26  ;;  %1222 = vrot.lane.b32.xlu0 %v957_v45, %s5511_s26 }
  0x8c   : > { %v5725_v55 = vpop.permute.xlu0 %932 }
  0x8d   : > { %v959_v46 = vpop.permute.xlu1 %958 }
  0x8e   : > { %1224 = vrot.lane.b32.xlu1 %v959_v46, %s5511_s26  ;;  %1226 = vrot.lane.b32.xlu0 %v961_v47, %s5511_s26 }
  0x90   : > { %v5732_v58 = vpop.permute.xlu0 %936 }
  0x91   : > { %v963_v27 = vpop.permute.xlu1 %962 }
  0x94   : > { %v5737_v61 = vpop.permute.xlu0 %940 }
  0x95   : > { %v935_v49 = vpop.permute.xlu1 %934 }
  0x98   : > { %v5754_v9 = vpop.permute.xlu0 %944 }
  0x99   : > { %v939_v50 = vpop.permute.xlu1 %938 }
  0x9d   : > { %v943_v51 = vpop.permute.xlu1 %942 }
  0xe9   : > { %v4984_v60 = vpop.f32.mrb[0].mxu0 }
  0xea   : > { %v774_v62 = vadd.f32 %v4984_v60, %v5735_v59  ;;  %678 = vrot.lane.b32.xlu1 %v4984_v60, %s5513_s16  ;;  %v595_v63 = vpop.f32.mrb[1].mxu0 }
  0xeb   : > { %674 = vrot.lane.b32.xlu0 %v595_v63, %s5513_s16  ;;  %v4985_v0 = vpop.f32.mrb[2].mxu0  ;;  %v772_v5 = vadd.f32 %v5735_v59, %v595_v63 }
  0xec   : > { %v5742_v1 = vpack.c.bf16 %v4985_v0, %v4984_v60  ;;  %v775_v2 = vadd.f32 %v4985_v0, %v5735_v59  ;;  %v598_v3 = vpop.f32.mrb[3].mxu0 }
  0xed   : > { %v5745_v4 = vpack.c.bf16 %v598_v3, %v595_v63  ;;  %v773_v6 = vadd.f32 %v5735_v59, %v598_v3  ;;  %v747_v63 = vcombine.high %v5723_v54, %v5723_v54 }
  0xee   : > { %8691 = vst [vmem:[#allocation2_spill] sm:$0xff] %v5742_v1  ;;  %v5749_v7 = vpack.c.bf16 %v775_v2, %v774_v62 }
  0xef   : > { %680 = vrot.lane.b32.xlu0 %v4985_v0, %s5513_s16  ;;  %v5752_v8 = vpack.c.bf16 %v773_v6, %v772_v5  ;;  %v761_v2 = vrot.slane %v747_v63, %v5718_v53 }
  0xf1   : > { %v4988_v10 = vpop.f32.mrb[4].mxu0  ;;  %4866 = vmatprep.mubr.msk.bf16.mxu1 %vm8677_vm1, %v5752_v8  ;;  %v5849_v6 = vrot.slane %v761_v2, %v5730_v57 }
  0xf2   : > { %v778_v11 = vadd.f32 %v4988_v10, %v5735_v59  ;;  %686 = vrot.lane.b32.xlu1 %v4988_v10, %s5513_s16  ;;  %v611_v12 = vpop.f32.mrb[5].mxu0 }
  0xf3   : > { %676 = vrot.lane.b32.xlu0 %v598_v3, %s5513_s16  ;;  %v776_v13 = vadd.f32 %v5735_v59, %v611_v12  ;;  %v4989_v14 = vpop.f32.mrb[6].mxu0 }
  0xf4   : > { %v5762_v15 = vpack.c.bf16 %v4989_v14, %v4988_v10  ;;  %v779_v16 = vadd.f32 %v4989_v14, %v5735_v59  ;;  %v614_v17 = vpop.f32.mrb[7].mxu0  ;;  %v1215_v20 = vpop.permute.xlu0 %1214 }
  0xf5   : > { %v5765_v18 = vpack.c.bf16 %v614_v17, %v611_v12  ;;  %v777_v19 = vadd.f32 %v5735_v59, %v614_v17  ;;  %5138 = vmatprep.subr.msk.bf16.mxu0 %vm8677_vm1, %v1215_v20 }
  0xf6   : > { %8692 = vst [vmem:[#allocation3_spill] sm:$0xff] %v5762_v15  ;;  %v5768_v21 = vpack.c.bf16 %v779_v16, %v778_v11  ;;  %684 = vrot.lane.b32.xlu1 %v614_v17, %s5513_s16 }
  0xf7   : > { %8693 = vst [vmem:[#allocation4_spill] sm:$0xff] %v5765_v18  ;;  %v5775_v23 = vpack.c.bf16 %v777_v19, %v776_v13  ;;  %682 = vrot.lane.b32.xlu0 %v611_v12, %s5513_s16 }
  0xf8   : > { %v5831_v56 = vpop.permute.xlu1 %1216 }
  0xf9   : > { %v4992_v24 = vpop.f32.mrb[8].mxu0 }
  0xfa   : > { %946 = vrot.lane.b32.xlu1 %v5221_v22, %s5510_s29  ;;  %v782_v25 = vadd.f32 %v4992_v24, %v5735_v59  ;;  %v627_v26 = vpop.f32.mrb[9].mxu0  ;;  %s5514_s29 = smov 64  }
  0xfb   : > { %688 = vrot.lane.b32.xlu0 %v4989_v14, %s5513_s16  ;;  %v780_v28 = vadd.f32 %v5735_v59, %v627_v26  ;;  %v4993_v29 = vpop.f32.mrb[10].mxu0 }
  0xfc   : > { %v5782_v30 = vpack.c.bf16 %v4993_v29, %v4992_v24  ;;  %v783_v31 = vadd.f32 %v4993_v29, %v5735_v59  ;;  %v630_v32 = vpop.f32.mrb[11].mxu0  ;;  %v5835_v60 = vpop.permute.xlu1 %1220 }
  0xfd   : > { %v5785_v33 = vpack.c.bf16 %v630_v32, %v627_v26  ;;  %v781_v34 = vadd.f32 %v5735_v59, %v630_v32 }
  0xfe   : > { %8694 = vst [vmem:[#allocation5_spill] sm:$0xff] %v5782_v30  ;;  %1228 = vrot.lane.b32.xlu1 %v963_v27, %s5511_s26  ;;  %v5789_v35 = vpack.c.bf16 %v783_v31, %v782_v25 }
  0xff   : > { %8695 = vst [vmem:[#allocation6_spill] sm:$0xff] %v5785_v33  ;;  %972 = vrot.lane.b32.xlu0 %v5745_v4, %s5511_s26  ;;  %v5793_v36 = vpack.c.bf16 %v781_v34, %v780_v28 }
 0x101   : > { %v4996_v37 = vpop.f32.mrb[12].mxu0 }
 0x102   : > { %694 = vrot.lane.b32.xlu1 %v4992_v24, %s5513_s16  ;;  %v786_v38 = vadd.f32 %v4996_v37, %v5735_v59  ;;  %v643_v39 = vpop.f32.mrb[13].mxu0 }
 0x103   : > { %690 = vrot.lane.b32.xlu0 %v627_v26, %s5513_s16  ;;  %v784_v40 = vadd.f32 %v5735_v59, %v643_v39  ;;  %v4997_v41 = vpop.f32.mrb[14].mxu0 }
 0x104   : > { %v5799_v42 = vpack.c.bf16 %v4997_v41, %v4996_v37  ;;  %v787_v43 = vadd.f32 %v4997_v41, %v5735_v59  ;;  %v646_v44 = vpop.f32.mrb[15].mxu0 }
 0x105   : > { %v5802_v45 = vpack.c.bf16 %v646_v44, %v643_v39  ;;  %v785_v46 = vadd.f32 %v5735_v59, %v646_v44 }
 0x106   : > { %8696 = vst [vmem:[#allocation7_spill] sm:$0xff] %v5799_v42  ;;  %692 = vrot.lane.b32.xlu1 %v630_v32, %s5513_s16  ;;  %v5806_v47 = vpack.c.bf16 %v787_v43, %v786_v38 }
 0x107   : > { %8697 = vst [vmem:[#allocation8_spill] sm:$0xff] %v5802_v45  ;;  %696 = vrot.lane.b32.xlu0 %v4993_v29, %s5513_s16  ;;  %v5809_v48 = vpack.c.bf16 %v785_v46, %v784_v40 }
 0x10a   : > { %988 = vrot.lane.b32.xlu1 %v5725_v55, %s5511_s26  ;;  %v5829_v55 = vpop.permute.xlu0 %1218 }
 0x10b   : > { %974 = vrot.lane.b32.xlu0 %v5742_v1, %s5511_s26 }
 0x10e   : > { %990 = vrot.lane.b32.xlu1 %v935_v49, %s5511_s26  ;;  %v5833_v59 = vpop.permute.xlu0 %1222 }
 0x10f   : > { %976 = vrot.lane.b32.xlu0 %v5765_v18, %s5511_s26 }
 0x112   : > { %702 = vrot.lane.b32.xlu1 %v4996_v37, %s5513_s16  ;;  %v5837_v62 = vpop.permute.xlu0 %1226 }
 0x113   : > { %698 = vrot.lane.b32.xlu0 %v643_v39, %s5513_s16 }
 0x116   : > { %700 = vrot.lane.b32.xlu1 %v646_v44, %s5513_s16 }
 0x117   : > { %704 = vrot.lane.b32.xlu0 %v4997_v41, %s5513_s16 }
 0x11a   : > { %992 = vrot.lane.b32.xlu1 %v5732_v58, %s5511_s26  ;;  %v5839_v58 = vpop.permute.xlu1 %1224 }
 0x11b   : > { %978 = vrot.lane.b32.xlu0 %v5762_v15, %s5511_s26 }
 0x11e   : > { %994 = vrot.lane.b32.xlu1 %v939_v50, %s5511_s26 }
 0x11f   : > { %980 = vrot.lane.b32.xlu0 %v5785_v33, %s5511_s26 }
 0x15c   : > { %v5844_v3 = vpop.permute.xlu1 %678 }
 0x15d   : > { %v675_v0 = vpop.permute.xlu0 %674 }
 0x15e   : > { %v788_v54 = vadd.f32 %v5849_v6, %v675_v0 }
 0x161   : > { %v5846_v5 = vpop.permute.xlu0 %680 }
 0x162   : > { %v731_v10 = vpack.c.bf16 %v5846_v5, %v5844_v3 }
 0x164   : > { %v5853_v11 = vpop.permute.xlu1 %686  ;;  %1200 = vrot.lane.b32.xlu0 %v731_v10, %s5511_s26 }
 0x165   : > { %v677_v12 = vpop.permute.xlu0 %676 }
 0x166   : > { %v730_v13 = vpack.c.bf16 %v677_v12, %v675_v0  ;;  %v789_v14 = vadd.f32 %v5849_v6, %v677_v12 }
 0x168   : > { %v5858_v16 = vpack.c.bf16 %v789_v14, %v788_v54  ;;  %v5860_v17 = vpop.permute.xlu1 %684  ;;  %982 = vrot.lane.b32.xlu0 %v5782_v30, %s5511_s26  ;;  %1198 = vrot.lane.b32.xlu1 %v730_v13, %s5511_s26 }
 0x169   : > { %v5865_v19 = vpop.permute.xlu0 %682 }
 0x16a   : > { %4898 = vmatprep.mubr.msk.bf16.mxu0 %vm8677_vm1, %v5858_v16  ;;  %v732_v27 = vpack.c.bf16 %v5860_v17, %v5865_v19 }
 0x16c   : > { %v947_v20 = vpop.permute.xlu1 %946  ;;  %996 = vrot.lane.b32.xlu1 %v5737_v61, %s5511_s26  ;;  %984 = vrot.lane.b32.xlu0 %v5802_v45, %s5511_s26 }
 0x16d   : > { %v5873_v22 = vpop.permute.xlu0 %688 }
 0x16e   : > { %v733_v24 = vpack.c.bf16 %v5873_v22, %v5853_v11 }
 0x170   : > { %v5877_v25 = vpop.permute.xlu1 %1228  ;;  %998 = vrot.lane.b32.xlu1 %v943_v51, %s5511_s26  ;;  %986 = vrot.lane.b32.xlu0 %v5799_v42, %s5511_s26 }
 0x171   : > { %v973_v26 = vpop.permute.xlu0 %972 }
 0x172   : > { %v1030_v37 = vsel %vm8677_vm1, %v973_v26, 0 }
 0x174   : > { %v5884_v61 = vpop.permute.xlu1 %694  ;;  %1000 = vrot.lane.b32.xlu1 %v5754_v9, %s5511_s26  ;;  %1204 = vrot.lane.b32.xlu0 %v733_v24, %s5511_s26 }
 0x175   : > { %v5889_v28 = vpop.permute.xlu0 %690 }
 0x178   : > { %v5891_v29 = vpop.permute.xlu1 %692  ;;  %1202 = vrot.lane.b32.xlu1 %v732_v27, %s5511_s26  ;;  %3191 = vrot.lane.b32.xlu0 %v732_v27, %s5514_s29 }
 0x179   : > { %v5895_v31 = vpop.permute.xlu0 %696  ;;  %v734_v40 = vpack.c.bf16 %v5891_v29, %v5889_v28 }
 0x17a   : > { %v735_v32 = vpack.c.bf16 %v5895_v31, %v5884_v61 }
 0x17c   : > { %v989_v34 = vpop.permute.xlu1 %988  ;;  %1002 = vrot.lane.b32.xlu1 %v947_v20, %s5511_s26  ;;  %1208 = vrot.lane.b32.xlu0 %v735_v32, %s5511_s26 }
 0x17d   : > { %v975_v9 = vpop.permute.xlu0 %974  ;;  %5130 = vmatprep.subr.msk.bf16.mxu1 %vm8677_vm1, %v989_v34 }
 0x17e   : > { %4851 = vmatpush3.bf16.xpose.msra.mxu1 %v1030_v37  ;;  %v1033_v44 = vsel %vm8677_vm1, %v975_v9, 0 }
 0x180   : > { %v991_v38 = vpop.permute.xlu1 %990  ;;  %3187 = vrot.lane.b32.xlu1 %v730_v13, %s5514_s29  ;;  %3197 = vrot.lane.b32.xlu0 %v735_v32, %s5514_s29 }
 0x181   : > { %v977_v39 = vpop.permute.xlu0 %976  ;;  %5131 = vmatprep.subr.msk.bf16.mxu1 %vm8677_vm1, %v991_v38 }
 0x182   : > { %v1036_v63 = vsel %vm8677_vm1, %v977_v39, 0 }
 0x184   : > { %v5908_v41 = vpop.permute.xlu1 %702  ;;  %3189 = vrot.lane.b32.xlu1 %v731_v10, %s5514_s29  ;;  %3195 = vrot.lane.b32.xlu0 %v734_v40, %s5514_s29 }
 0x185   : > { %v5912_v43 = vpop.permute.xlu0 %698 }
 0x186   : > { %4853 = vmatpush3.bf16.xpose.msra.mxu1 %v1033_v44 }
 0x188   : > { %1206 = vrot.lane.b32.xlu1 %v734_v40, %s5511_s26  ;;  %v5916_v46 = vpop.permute.xlu1 %700 }
 0x189   : > { %v5918_v49 = vpop.permute.xlu0 %704  ;;  %v736_v0 = vpack.c.bf16 %v5916_v46, %v5912_v43 }
 0x18a   : > { %v737_v50 = vpack.c.bf16 %v5918_v49, %v5908_v41 }
 0x18c   : > { %3193 = vrot.lane.b32.xlu1 %v733_v24, %s5514_s29  ;;  %v993_v51 = vpop.permute.xlu1 %992  ;;  %1212 = vrot.lane.b32.xlu0 %v737_v50, %s5511_s26 }
 0x18d   : > { %5132 = vmatprep.subr.msk.bf16.mxu1 %vm8677_vm1, %v993_v51  ;;  %v979_v10 = vpop.permute.xlu0 %978 }
 0x18e   : > { %4855 = vmatpush3.bf16.xpose.msra.mxu1 %v1036_v63  ;;  %v1039_v12 = vsel %vm8677_vm1, %v979_v10, 0 }
 0x190   : > { %3066 = vrot.lane.b32.xlu1 %v5745_v4, %s5514_s29  ;;  %v995_v2 = vpop.permute.xlu1 %994  ;;  %3201 = vrot.lane.b32.xlu0 %v737_v50, %s5514_s29 }
 0x191   : > { %5133 = vmatprep.subr.msk.bf16.mxu1 %vm8677_vm1, %v995_v2  ;;  %v981_v54 = vpop.permute.xlu0 %980 }
 0x192   : > { %v1042_v24 = vsel %vm8677_vm1, %v981_v54, 0 }
 0x194   : > { %1210 = vrot.lane.b32.xlu1 %v736_v0, %s5511_s26 }
 0x196   : > { %4857 = vmatpush3.bf16.xpose.msra.mxu1 %v1039_v12 }
 0x198   : > { %3199 = vrot.lane.b32.xlu1 %v736_v0, %s5514_s29 }
 0x1d6   : > { %v1201_v20 = vpop.permute.xlu0 %1200 }
 0x1d7   : > { %v1258_v32 = vsel %vm8677_vm1, %v1201_v20, 0 }
 0x1da   : > { %v1199_v13 = vpop.permute.xlu1 %1198  ;;  %v983_v26 = vpop.permute.xlu0 %982 }
 0x1db   : > { %v1255_v14 = vsel %vm8677_vm1, %v1199_v13, 0  ;;  %v1045_v9 = vsel %vm8677_vm1, %v983_v26, 0  ;;  %v800_v26 = vadd.f32 %v5849_v6, %v5912_v43  ;;  %v4758_v43 = vld.sshfl [vmem:[%s8651_s5] sm:$0x11 pattern:$0x75316420] }
 0x1dc   : > { %4883 = vmatpush3.bf16.xpose.msra.mxu0 %v1255_v14 }
 0x1dd   : > { %5139 = vmatprep.subr.msk.bf16.mxu0 %vm8677_vm1, %v5831_v56 }
 0x1de   : > { %v997_v4 = vpop.permute.xlu1 %996  ;;  %v985_v56 = vpop.permute.xlu0 %984 }
 0x1df   : > { %5134 = vmatprep.subr.msk.bf16.mxu1 %vm8677_vm1, %v997_v4  ;;  %v1048_v44 = vsel %vm8677_vm1, %v985_v56, 0 }
 0x1e0   : > { %4859 = vmatpush3.bf16.xpose.msra.mxu1 %v1042_v24 }
 0x1e2   : > { %v999_v27 = vpop.permute.xlu1 %998  ;;  %v987_v39 = vpop.permute.xlu0 %986 }
 0x1e3   : > { %5135 = vmatprep.subr.msk.bf16.mxu1 %vm8677_vm1, %v999_v27  ;;  %v1051_v0 = vsel %vm8677_vm1, %v987_v39, 0  ;;  %v801_v27 = vadd.f32 %v5849_v6, %v5916_v46  ;;  %v1431_v46 = vrot.slane %v4758_v43, %v5718_v53 }
 0x1e4   : > { %4885 = vmatpush3.bf16.xpose.msra.mxu0 %v1258_v32 }
 0x1e5   : > { %5140 = vmatprep.subr.msk.bf16.mxu0 %vm8677_vm1, %v5829_v55  ;;  %v818_v32 = vpack.c.bf16 %v801_v27, %v800_v26 }
 0x1e6   : > { %v1001_v34 = vpop.permute.xlu1 %1000  ;;  %v1205_v55 = vpop.permute.xlu0 %1204 }
 0x1e7   : > { %v1264_v51 = vsel %vm8677_vm1, %v1205_v55, 0 }
 0x1e8   : > { %4861 = vmatpush3.bf16.xpose.msra.mxu1 %v1045_v9 }
 0x1e9   : > { %5136 = vmatprep.subr.msk.bf16.mxu1 %vm8677_vm1, %v1001_v34  ;;  %v6044_v34 = vrot.slane %v1431_v46, %v5730_v57 }
 0x1ea   : > { %v1203_v37 = vpop.permute.xlu1 %1202 }
 0x1eb   : > { %v1261_v38 = vsel %vm8677_vm1, %v1203_v37, 0 }
 0x1ec   : > { %4887 = vmatpush3.bf16.xpose.msra.mxu0 %v1261_v38 }
 0x1ed   : > { %5141 = vmatprep.subr.msk.bf16.mxu0 %vm8677_vm1, %v5835_v60  ;;  %v3192_v60 = vpop.permute.xlu0 %3191 }
 0x1ee   : > { %v1003_v40 = vpop.permute.xlu1 %1002 }
 0x1f0   : > { %4863 = vmatpush3.bf16.xpose.msra.mxu1 %v1048_v44 }
 0x1f1   : > { %5137 = vmatprep.subr.msk.bf16.mxu1 %vm8677_vm1, %v1003_v40  ;;  %v1209_v54 = vpop.permute.xlu0 %1208 }
 0x1f2   : > { %v3188_v50 = vpop.permute.xlu1 %3187 }
 0x1f4   : > { %4889 = vmatpush3.bf16.xpose.msra.mxu0 %v1264_v51 }
 0x1f5   : > { %5142 = vmatprep.subr.msk.bf16.mxu0 %vm8677_vm1, %v5833_v59  ;;  %v1270_v59 = vsel %vm8677_vm1, %v1209_v54, 0  ;;  %v3198_v14 = vpop.permute.xlu0 %3197 }
 0x1f6   : > { %v3190_v63 = vpop.permute.xlu1 %3189 }
 0x1f8   : > { %4865 = vmatpush3.bf16.xpose.msra.mxu1 %v1051_v0 }
 0x1fa   : > { %v1207_v2 = vpop.permute.xlu1 %1206 }
 0x1fb   : > { %v1267_v10 = vsel %vm8677_vm1, %v1207_v2, 0 }
 0x1fc   : > { %4891 = vmatpush3.bf16.xpose.msra.mxu0 %v1267_v10 }
 0x1fd   : > { %5143 = vmatprep.subr.msk.bf16.mxu0 %vm8677_vm1, %v5839_v58 }
 0x1fe   : > { %v3194_v12 = vpop.permute.xlu1 %3193 }
 0x1ff   : > { %4867 = vmatmul.mubr.msk.bf16.vlgmr.msra.gmra.mrb[0].mxu1 %vm8677_vm1, %v5752_v8  ;;  %v3196_v8 = vpop.permute.xlu0 %3195 }
 0x200   : > { %4868 = vmatprep.mubr.msk.bf16.mxu1 %vm8677_vm1, %v5749_v7 }
 0x202   : > { %v3067_v13 = vpop.permute.xlu1 %3066 }
 0x203   : > { %4998 = vmatprep.subr.bf16.mxu1 %v3067_v13  ;;  %v1213_v4 = vpop.permute.xlu0 %1212 }
 0x204   : > { %4893 = vmatpush3.bf16.xpose.msra.mxu0 %v1270_v59  ;;  %4999 = vmatpush3.bf16.msra.mxu1 %v3067_v13 }
 0x205   : > { %5144 = vmatprep.subr.msk.bf16.mxu0 %vm8677_vm1, %v5837_v62  ;;  %v1276_v62 = vsel %vm8677_vm1, %v1213_v4, 0 }
 0x206   : > { %v1211_v20 = vpop.permute.xlu1 %1210 }
 0x207   : > { %4869 = vmatmul.mubr.msk.bf16.gmra.mrb[4].mxu1 %vm8677_vm1, %v5749_v7  ;;  %v1273_v58 = vsel %vm8677_vm1, %v1211_v20, 0  ;;  %v791_v7 = vadd.f32 %v5849_v6, %v5846_v5  ;;  %v793_v5 = vadd.f32 %v5849_v6, %v5860_v17  ;;  %v795_v17 = vadd.f32 %v5849_v6, %v5873_v22  ;;  %v3202_v24 = vpop.permute.xlu0 %3201 }
 0x208   : > { %4870 = vmatprep.mubr.msk.bf16.mxu1 %vm8677_vm1, %v5775_v23 }
 0x20a   : > { %v3200_v22 = vpop.permute.xlu1 %3199 }
 0x20c   : > { %4895 = vmatpush3.bf16.xpose.msra.mxu0 %v1273_v58 }
 0x20d   : > { %5145 = vmatprep.subr.msk.bf16.mxu0 %vm8677_vm1, %v5877_v25  ;;  %v790_v25 = vadd.f32 %v5849_v6, %v5844_v3 }
 0x20f   : > { %4871 = vmatmul.mubr.msk.bf16.gmra.mrb[8].mxu1 %vm8677_vm1, %v5775_v23  ;;  %v813_v23 = vpack.c.bf16 %v791_v7, %v790_v25 }
 0x210   : > { %4872 = vmatprep.mubr.msk.bf16.mxu1 %vm8677_vm1, %v5768_v21 }
 0x214   : > { %4897 = vmatpush3.bf16.xpose.msra.mxu0 %v1276_v62 }
 0x215   : > { %5030 = vmatprep.subr.bf16.mxu0 %v3188_v50 }
 0x217   : > { %4873 = vmatmul.mubr.msk.bf16.gmra.mrb[12].mxu1 %vm8677_vm1, %v5768_v21  ;;  %v792_v21 = vadd.f32 %v5849_v6, %v5865_v19  ;;  %v797_v19 = vadd.f32 %v5849_v6, %v5891_v29  ;;  %v799_v29 = vadd.f32 %v5849_v6, %v5895_v31 }
 0x218   : > { %4874 = vmatprep.mubr.msk.bf16.mxu1 %vm8677_vm1, %v5793_v36 }
 0x219   : > { %v814_v3 = vpack.c.bf16 %v793_v5, %v792_v21 }
 0x21b   : > { %4899 = vmatmul.mubr.msk.bf16.vlgmr.msra.gmra.mrb[16].mxu0 %vm8677_vm1, %v5858_v16  ;;  %v794_v16 = vadd.f32 %v5849_v6, %v5853_v11  ;;  %v796_v11 = vadd.f32 %v5849_v6, %v5889_v28  ;;  %v798_v28 = vadd.f32 %v5849_v6, %v5884_v61  ;;  %v803_v61 = vadd.f32 %v5849_v6, %v5918_v49 }
 0x21c   : > { %4900 = vmatprep.mubr.msk.bf16.mxu0 %vm8677_vm1, %v813_v23  ;;  %5031 = vmatpush3.bf16.msra.mxu0 %v3188_v50 }
 0x21d   : > { %5032 = vmatprep.subr.bf16.mxu0 %v3190_v63 }
 0x21f   : > { %4875 = vmatmul.mubr.msk.bf16.gmra.mrb[16].mxu1 %vm8677_vm1, %v5793_v36  ;;  %v815_v36 = vpack.c.bf16 %v795_v17, %v794_v16 }
 0x220   : > { %4876 = vmatprep.mubr.msk.bf16.mxu1 %vm8677_vm1, %v5789_v35  ;;  %5033 = vmatpush3.bf16.msra.mxu0 %v3190_v63 }
 0x221   : > { %5034 = vmatprep.subr.bf16.mxu0 %v3192_v60 }
 0x223   : > { %4901 = vmatmul.mubr.msk.bf16.gmra.mrb[20].mxu0 %vm8677_vm1, %v813_v23 }
 0x224   : > { %4902 = vmatprep.mubr.msk.bf16.mxu0 %vm8677_vm1, %v814_v3  ;;  %5035 = vmatpush3.bf16.msra.mxu0 %v3192_v60 }
 0x225   : > { %5036 = vmatprep.subr.bf16.mxu0 %v3194_v12 }
 0x227   : > { %4877 = vmatmul.mubr.msk.bf16.gmra.mrb[20].mxu1 %vm8677_vm1, %v5789_v35  ;;  %v816_v35 = vpack.c.bf16 %v797_v19, %v796_v11 }
 0x228   : > { %4878 = vmatprep.mubr.msk.bf16.mxu1 %vm8677_vm1, %v5809_v48  ;;  %5037 = vmatpush3.bf16.msra.mxu0 %v3194_v12  ;;  %v1424_v12 = vcombine.high %v4758_v43, %v4758_v43 }
 0x229   : > { %5038 = vmatprep.subr.bf16.mxu0 %v3196_v8 }
 0x22a   : > { %v1438_v20 = vrot.slane %v1424_v12, %v5718_v53 }
 0x22b   : > { %4903 = vmatmul.mubr.msk.bf16.gmra.mrb[24].mxu0 %vm8677_vm1, %v814_v3 }
 0x22c   : > { %4904 = vmatprep.mubr.msk.bf16.mxu0 %vm8677_vm1, %v815_v36  ;;  %5039 = vmatpush3.bf16.msra.mxu0 %v3196_v8  ;;  %v6106_v7 = vrot.slane %v1438_v20, %v5730_v57 }
 0x22d   : > { %5040 = vmatprep.subr.bf16.mxu0 %v3198_v14 }
 0x22f   : > { %4879 = vmatmul.mubr.msk.bf16.gmra.mrb[24].mxu1 %vm8677_vm1, %v5809_v48  ;;  %v817_v48 = vpack.c.bf16 %v799_v29, %v798_v28 }
 0x230   : > { %4880 = vmatprep.mubr.msk.bf16.mxu1 %vm8677_vm1, %v5806_v47  ;;  %5041 = vmatpush3.bf16.msra.mxu0 %v3198_v14 }
 0x231   : > { %5042 = vmatprep.subr.bf16.mxu0 %v3200_v22 }
 0x233   : > { %4905 = vmatmul.mubr.msk.bf16.gmra.mrb[28].mxu0 %vm8677_vm1, %v815_v36 }
 0x234   : > { %4906 = vmatprep.mubr.msk.bf16.mxu0 %vm8677_vm1, %v816_v35  ;;  %5043 = vmatpush3.bf16.msra.mxu0 %v3200_v22 }
 0x235   : > { %5044 = vmatprep.subr.bf16.mxu0 %v3202_v24 }
 0x237   : > { %4881 = vmatmul.mubr.msk.bf16.gmra.mrb[28].mxu1 %vm8677_vm1, %v5806_v47  ;;  %v802_v47 = vadd.f32 %v5849_v6, %v5908_v41 }
 0x238   : > { %5045 = vmatpush3.bf16.msra.mxu0 %v3202_v24 }
 0x239   : > { %v819_v31 = vpack.c.bf16 %v803_v61, %v802_v47 }
 0x23b   : > { %4907 = vmatmul.mubr.msk.bf16.gmra.mrb[32].mxu0 %vm8677_vm1, %v816_v35 }
 0x23c   : > { %4908 = vmatprep.mubr.msk.bf16.mxu0 %vm8677_vm1, %v817_v48 }
 0x243   : > { %4909 = vmatmul.mubr.msk.bf16.gmra.mrb[36].mxu0 %vm8677_vm1, %v817_v48 }
 0x244   : > { %4910 = vmatprep.mubr.msk.bf16.mxu0 %vm8677_vm1, %v818_v32 }
 0x24b   : > { %4911 = vmatmul.mubr.msk.bf16.gmra.mrb[40].mxu0 %vm8677_vm1, %v818_v32 }
 0x24c   : > { %4912 = vmatprep.mubr.msk.bf16.mxu0 %vm8677_vm1, %v819_v31 }
 0x253   : > { %4913 = vmatmul.mubr.msk.bf16.gmra.mrb[44].mxu0 %vm8677_vm1, %v819_v31 }
 0x2d2   : > { %v6046_v41 = vpop.f32.mrb[0].mxu1 }
 0x2d3   : > { %8698 = vst [vmem:[#allocation9_spill] sm:$0xff] %v6046_v41  ;;  %v1113_v9 = vpop.f32.mrb[1].mxu1 }
 0x2d4   : > { %v6049_v6 = vadd.f32 %v6044_v34, %v1113_v9  ;;  %v6051_v49 = vpop.f32.mrb[2].mxu1 }
 0x2d5   : > { %8699 = vst [vmem:[#allocation10_spill] sm:$0xff] %v6051_v49  ;;  %v1117_v56 = vpop.f32.mrb[3].mxu1  ;;  %v1487_v49 = vadd.s32 40, %v5715_v52 }
 0x2d6   : > { %1514 = vrot.lane.b32.xlu1 %v6049_v6, %s5515_s24  ;;  %v6056_v37 = vadd.f32 %v6044_v34, %v1117_v56 }
 0x2da   : > { %1516 = vrot.lane.b32.xlu1 %v6056_v37, %s5515_s24  ;;  %v6060_v38 = vpop.f32.mrb[4].mxu1 }
 0x2db   : > { %8700 = vst [vmem:[#allocation11_spill] sm:$0xff] %v6060_v38  ;;  %v1123_v39 = vpop.f32.mrb[5].mxu1 }
 0x2dc   : > { %v6063_v40 = vadd.f32 %v6044_v34, %v1123_v39  ;;  %v6065_v44 = vpop.f32.mrb[6].mxu1 }
 0x2dd   : > { %8701 = vst [vmem:[#allocation12_spill] sm:$0xff] %v6065_v44  ;;  %v1127_v55 = vpop.f32.mrb[7].mxu1 }
 0x2de   : > { %v6068_v50 = vadd.f32 %v6044_v34, %v1127_v55  ;;  %1518 = vrot.lane.b32.xlu0 %v6063_v40, %s5515_s24 }
 0x2e0   : > { %1520 = vrot.lane.b32.xlu1 %v6068_v50, %s5515_s24 }
 0x2e2   : > { %v6074_v51 = vpop.f32.mrb[8].mxu1 }
 0x2e3   : > { %8702 = vst [vmem:[#allocation13_spill] sm:$0xff] %v6074_v51  ;;  %v1133_v63 = vpop.f32.mrb[9].mxu1 }
 0x2e4   : > { %v6077_v0 = vadd.f32 %v6044_v34, %v1133_v63  ;;  %v6079_v60 = vpop.f32.mrb[10].mxu1 }
 0x2e5   : > { %8703 = vst [vmem:[#allocation14_spill] sm:$0xff] %v6079_v60  ;;  %v1137_v2 = vpop.f32.mrb[11].mxu1 }
 0x2e6   : > { %v6082_v10 = vadd.f32 %v6044_v34, %v1137_v2  ;;  %1522 = vrot.lane.b32.xlu0 %v6077_v0, %s5515_s24 }
 0x2e8   : > { %1524 = vrot.lane.b32.xlu1 %v6082_v10, %s5515_s24 }
 0x2ea   : > { %v6088_v54 = vpop.f32.mrb[12].mxu1 }
 0x2eb   : > { %8704 = vst [vmem:[#allocation15_spill] sm:$0xff] %v6088_v54  ;;  %v1143_v59 = vpop.f32.mrb[13].mxu1 }
 0x2ec   : > { %v6091_v13 = vadd.f32 %v6044_v34, %v1143_v59  ;;  %v6093_v14 = vpop.f32.mrb[14].mxu1 }
 0x2ed   : > { %8705 = vst [vmem:[#allocation16_spill] sm:$0xff] %v6093_v14  ;;  %v1147_v8 = vpop.f32.mrb[15].mxu1 }
 0x2ee   : > { %v6097_v58 = vadd.f32 %v6044_v34, %v1147_v8  ;;  %1526 = vrot.lane.b32.xlu0 %v6091_v13, %s5515_s24  ;;  %v6101_v4 = vpop.f32.mrb[16].mxu0 }
 0x2ef   : > { %8706 = vst [vmem:[#allocation17_spill] sm:$0xff] %v6101_v4  ;;  %v6103_v62 = vpop.f32.mrb[17].mxu0 }
 0x2f0   : > { %1528 = vrot.lane.b32.xlu1 %v6097_v58, %s5515_s24  ;;  %v6110_v25 = vpop.f32.mrb[18].mxu0  ;;  %v6215_v30 = vadd.f32 %v6106_v7, %v6103_v62 }
 0x2f1   : > { %8707 = vst [vmem:[#allocation18_spill] sm:$0xff] %v6110_v25  ;;  %v1342_v53 = vpop.f32.mrb[19].mxu0 }
 0x2f2   : > { %v6113_v23 = vadd.f32 %v6106_v7, %v1342_v53  ;;  %v6115_v5 = vpop.f32.mrb[16].mxu1 }
 0x2f3   : > { %8708 = vst [vmem:[#allocation19_spill] sm:$0xff] %v6115_v5  ;;  %v1153_v21 = vpop.f32.mrb[17].mxu1  ;;  %v1484_v5 = vadd.s32 16, %v5715_v52 }
 0x2f4   : > { %v6118_v3 = vadd.f32 %v6044_v34, %v1153_v21  ;;  %v6120_v16 = vpop.f32.mrb[18].mxu1 }
 0x2f5   : > { %8709 = vst [vmem:[#allocation20_spill] sm:$0xff] %v6120_v16  ;;  %v1157_v17 = vpop.f32.mrb[19].mxu1  ;;  %v1489_v16 = vadd.s32 56, %v5715_v52 }
 0x2f6   : > { %1530 = vrot.lane.b32.xlu0 %v6118_v3, %s5515_s24  ;;  %v6124_v57 = vpop.f32.mrb[20].mxu0  ;;  %v6127_v11 = vadd.f32 %v6044_v34, %v1157_v17 }
 0x2f7   : > { %8710 = vst [vmem:[#allocation21_spill] sm:$0xff] %v6124_v57  ;;  %v1348_v36 = vpop.f32.mrb[21].mxu0 }
 0x2f8   : > { %v6129_v19 = vpop.f32.mrb[22].mxu0 }
 0x2f9   : > { %8711 = vst [vmem:[#allocation22_spill] sm:$0xff] %v6129_v19  ;;  %v1352_v22 = vpop.f32.mrb[23].mxu0 }
 0x2fa   : > { %v6132_v35 = vadd.f32 %v6106_v7, %v1352_v22  ;;  %1532 = vrot.lane.b32.xlu0 %v6127_v11, %s5515_s24  ;;  %v6136_v24 = vpop.f32.mrb[20].mxu1 }
 0x2fb   : > { %8712 = vst [vmem:[#allocation23_spill] sm:$0xff] %v6136_v24  ;;  %v1163_v28 = vpop.f32.mrb[21].mxu1 }
 0x2fc   : > { %v6139_v29 = vadd.f32 %v6044_v34, %v1163_v28  ;;  %v6141_v48 = vpop.f32.mrb[22].mxu1  ;;  %v6187_v28 = vadd.f32 %v6106_v7, %v1348_v36 }
 0x2fd   : > { %8713 = vst [vmem:[#allocation24_spill] sm:$0xff] %v6141_v48  ;;  %v1167_v26 = vpop.f32.mrb[23].mxu1 }
 0x2fe   : > { %1534 = vrot.lane.b32.xlu1 %v6139_v29, %s5515_s24  ;;  %v6145_v27 = vpop.f32.mrb[24].mxu0  ;;  %v6148_v47 = vadd.f32 %v6044_v34, %v1167_v26 }
 0x2ff   : > { %8714 = vst [vmem:[#allocation25_spill] sm:$0xff] %v6145_v27  ;;  %v1358_v32 = vpop.f32.mrb[25].mxu0 }
 0x300   : > { %v6151_v61 = vadd.f32 %v6106_v7, %v1358_v32  ;;  %v6153_v31 = vpop.f32.mrb[26].mxu0 }
 0x301   : > { %8715 = vst [vmem:[#allocation26_spill] sm:$0xff] %v6153_v31  ;;  %v1362_v43 = vpop.f32.mrb[27].mxu0 }
 0x302   : > { %v6156_v46 = vadd.f32 %v6106_v7, %v1362_v43  ;;  %1536 = vrot.lane.b32.xlu1 %v6148_v47, %s5515_s24  ;;  %v6160_v9 = vpop.f32.mrb[24].mxu1 }
 0x303   : > { %8716 = vst [vmem:[#allocation27_spill] sm:$0xff] %v6160_v9  ;;  %v1173_v56 = vpop.f32.mrb[25].mxu1 }
 0x304   : > { %v6163_v39 = vadd.f32 %v6044_v34, %v1173_v56  ;;  %v6165_v55 = vpop.f32.mrb[26].mxu1 }
 0x305   : > { %8717 = vst [vmem:[#allocation28_spill] sm:$0xff] %v6165_v55  ;;  %v1177_v63 = vpop.f32.mrb[27].mxu1 }
 0x306   : > { %1538 = vrot.lane.b32.xlu1 %v6163_v39, %s5515_s24  ;;  %v6169_v2 = vpop.f32.mrb[28].mxu0  ;;  %v6172_v59 = vadd.f32 %v6044_v34, %v1177_v63 }
 0x307   : > { %8718 = vst [vmem:[#allocation29_spill] sm:$0xff] %v6169_v2  ;;  %v1368_v12 = vpop.f32.mrb[29].mxu0 }
 0x308   : > { %v6175_v20 = vadd.f32 %v6106_v7, %v1368_v12  ;;  %v6177_v8 = vpop.f32.mrb[30].mxu0 }
 0x309   : > { %8719 = vst [vmem:[#allocation30_spill] sm:$0xff] %v6177_v8  ;;  %v1372_v53 = vpop.f32.mrb[31].mxu0 }
 0x30a   : > { %v6180_v21 = vadd.f32 %v6106_v7, %v1372_v53  ;;  %1540 = vrot.lane.b32.xlu1 %v6172_v59, %s5515_s24  ;;  %v6184_v17 = vpop.f32.mrb[28].mxu1 }
 0x30b   : > { %8720 = vst [vmem:[#allocation31_spill] sm:$0xff] %v6184_v17  ;;  %v1183_v22 = vpop.f32.mrb[29].mxu1  ;;  %v1495_v17 = vadd.s32 104, %v5715_v52 }
 0x30c   : > { %v6190_v26 = vadd.f32 %v6044_v34, %v1183_v22  ;;  %v6192_v32 = vpop.f32.mrb[30].mxu1 }
 0x30d   : > { %8721 = vst [vmem:[#allocation32_spill] sm:$0xff] %v6192_v32  ;;  %v1187_v43 = vpop.f32.mrb[31].mxu1 }
 0x30e   : > { %1542 = vrot.lane.b32.xlu0 %v6190_v26, %s5515_s24  ;;  %1550 = vrot.lane.b32.xlu1 %v6187_v28, %s5515_s24  ;;  %v6198_v56 = vpop.f32.mrb[32].mxu0  ;;  %v6201_v12 = vadd.f32 %v6044_v34, %v1187_v43 }
 0x30f   : > { %8722 = vst [vmem:[#allocation33_spill] sm:$0xff] %v6198_v56  ;;  %v1378_v63 = vpop.f32.mrb[33].mxu0 }
 0x310   : > { %v6204_v36 = vadd.f32 %v6106_v7, %v1378_v63  ;;  %v6206_v53 = vpop.f32.mrb[34].mxu0 }
 0x311   : > { %8723 = vst [vmem:[#allocation34_spill] sm:$0xff] %v6206_v53  ;;  %v1382_v22 = vpop.f32.mrb[35].mxu0 }
 0x312   : > { %v6209_v42 = vadd.f32 %v6106_v7, %v1382_v22  ;;  %1544 = vrot.lane.b32.xlu0 %v6201_v12, %s5515_s24 }
 0x316   : > { %1546 = vrot.lane.b32.xlu0 %v6215_v30, %s5515_s24  ;;  %v6219_v34 = vpop.f32.mrb[36].mxu0 }
 0x317   : > { %8724 = vst [vmem:[#allocation35_spill] sm:$0xff] %v6219_v34  ;;  %v1388_v43 = vpop.f32.mrb[37].mxu0 }
 0x318   : > { %v6222_v63 = vadd.f32 %v6106_v7, %v1388_v43  ;;  %v6224_v45 = vpop.f32.mrb[38].mxu0 }
 0x319   : > { %8726 = vst [vmem:[#allocation37_spill] sm:$0xff] %v6224_v45  ;;  %v1392_v22 = vpop.f32.mrb[39].mxu0 }
 0x31a   : > { %8725 = vst [vmem:[#allocation36_spill] sm:$0xff] %v6222_v63  ;;  %v6227_v33 = vadd.f32 %v6106_v7, %v1392_v22 }
 0x31c   : > { %8727 = vst [vmem:[#allocation38_spill] sm:$0xff] %v6227_v33 }
 0x31e   : > { %v6229_v15 = vpop.f32.mrb[40].mxu0 }
 0x31f   : > { %8728 = vst [vmem:[#allocation39_spill] sm:$0xff] %v6229_v15  ;;  %v1398_v1 = vpop.f32.mrb[41].mxu0  ;;  %v6261_v15 = vsub.s32 127, %v1484_v5 }
 0x320   : > { %v6232_v62 = vadd.f32 %v6106_v7, %v1398_v1  ;;  %v6234_v4 = vpop.f32.mrb[42].mxu0  ;;  %v6250_v1 = vsub.s32 127, %v5715_v52 }
 0x321   : > { %8729 = vst [vmem:[#allocation40_spill] sm:$0xff] %v6234_v4  ;;  %v1402_v18 = vpop.f32.mrb[43].mxu0  ;;  %8737 = vst [vmem:[#allocation46_spill] sm:$0xff] %v6261_v15  ;;  %v1580_v51 = vand.u32 1, %v6261_v15 }
 0x322   : > { %v6237_v56 = vadd.f32 %v6106_v7, %v1402_v18  ;;  %8733 = vst [vmem:[#allocation44_spill] sm:$0xff] %v6250_v1  ;;  %v1578_v53 = vand.u32 1, %v6250_v1  ;;  %v1483_v18 = vadd.s32 8, %v5715_v52 }
 0x323   : > { %vm6282_vm4 = vcmp.ne.s32.totalorder %v1580_v51, 0 }
 0x324   : > { %vm6255_vm2 = vcmp.ne.s32.totalorder %v1578_v53, 0 }
 0x326   : > { %v6239_v43 = vpop.f32.mrb[44].mxu0 }
 0x327   : > { %8730 = vst [vmem:[#allocation41_spill] sm:$0xff] %v6239_v43  ;;  %v1408_v27 = vpop.f32.mrb[45].mxu0 }
 0x328   : > { %v6242_v57 = vadd.f32 %v6106_v7, %v1408_v27  ;;  %v6244_v22 = vpop.f32.mrb[46].mxu0  ;;  %v6259_v27 = vsub.s32 127, %v1483_v18  ;;  %v1486_v18 = vadd.s32 32, %v5715_v52 }
 0x329   : > { %8731 = vst [vmem:[#allocation42_spill] sm:$0xff] %v6244_v22  ;;  %v1412_v25 = vpop.f32.mrb[47].mxu0  ;;  %v1492_v22 = vadd.s32 80, %v5715_v52 }
 0x32a   : > { %v6247_v41 = vadd.f32 %v6106_v7, %v1412_v25  ;;  %8736 = vst [vmem:[#allocation45_spill] sm:$0xff] %v6259_v27  ;;  %v1485_v25 = vadd.s32 24, %v5715_v52  ;;  %v1579_v53 = vand.u32 1, %v6259_v27  ;;  %v6286_v19 = vsub.s32 127, %v1486_v18 }
 0x32b   : > { %v6305_v18 = vsub.s32 127, %v1487_v49 }
 0x32c   : > { %8732 = vst [vmem:[#allocation43_spill] sm:$0xff] %v6247_v41  ;;  %v6274_v5 = vsub.s32 127, %v1485_v25  ;;  %vm6278_vm3 = vcmp.ne.s32.totalorder %v1579_v53, 0  ;;  %v1582_v51 = vand.u32 1, %v6286_v19 }
 0x32e   : > { %v1581_v25 = vand.u32 1, %v6274_v5  ;;  %vm6313_vm6 = vcmp.ne.s32.totalorder %v1582_v51, 0 }
 0x330   : > { %vm6307_vm5 = vcmp.ne.s32.totalorder %v1581_v25, 0 }
 0x348   : > { %v1515_v31 = vpop.permute.xlu1 %1514 }
 0x349   : > { %v6266_v7 = vsel %vm6255_vm2, %v1515_v31, %v6049_v6  ;;  %v1742_v31 = vand.u32 2, %v6286_v19 }
 0x34a   : > { %1674 = vrot.lane.b32.xlu0 %v6266_v7, %s5516_s25 }
 0x34c   : > { %v1517_v2 = vpop.permute.xlu1 %1516 }
 0x34d   : > { %v6293_v43 = vsel %vm6278_vm3, %v1517_v2, %v6056_v37  ;;  %v1488_v2 = vadd.s32 48, %v5715_v52 }
 0x34e   : > { %1548 = vrot.lane.b32.xlu0 %v6113_v23, %s5515_s24 }
 0x34f   : > { %v6338_v4 = vsub.s32 127, %v1488_v2  ;;  %v1490_v2 = vadd.s32 64, %v5715_v52 }
 0x350   : > { %v1519_v38 = vpop.permute.xlu0 %1518 }
 0x351   : > { %v6298_v53 = vsel %vm6282_vm4, %v1519_v38, %v6063_v40  ;;  %v1583_v40 = vand.u32 1, %v6305_v18  ;;  %v6367_v44 = vsub.s32 127, %v1490_v2 }
 0x352   : > { %1676 = vrot.lane.b32.xlu0 %v6293_v43, %s5516_s25  ;;  %1678 = vrot.lane.b32.xlu1 %v6298_v53, %s5516_s25  ;;  %v1521_v37 = vpop.permute.xlu1 %1520 }
 0x353   : > { %v6323_v25 = vsel %vm6307_vm5, %v1521_v37, %v6068_v50  ;;  %vm6334_vm7 = vcmp.ne.s32.totalorder %v1583_v40, 0  ;;  %v6340_v50 = vsub.s32 127, %v1489_v16  ;;  %v1584_v37 = vand.u32 1, %v6338_v4 }
 0x354   : > { %v1491_v16 = vadd.s32 72, %v5715_v52  ;;  %v1586_v2 = vand.u32 1, %v6367_v44 }
 0x355   : > { %v1585_v40 = vand.u32 1, %v6340_v50  ;;  %vm6355_vm8 = vcmp.ne.s32.totalorder %v1584_v37, 0 }
 0x356   : > { %1552 = vrot.lane.b32.xlu1 %v6132_v35, %s5515_s24  ;;  %v6369_v24 = vsub.s32 127, %v1491_v16  ;;  %vm6388_vm10 = vcmp.ne.s32.totalorder %v1586_v2, 0 }
 0x357   : > { %vm6359_vm9 = vcmp.ne.s32.totalorder %v1585_v40, 0 }
 0x358   : > { %v1523_v49 = vpop.permute.xlu0 %1522  ;;  %v1587_v16 = vand.u32 1, %v6369_v24 }
 0x359   : > { %v6328_v8 = vsel %vm6313_vm6, %v1523_v49, %v6077_v0 }
 0x35a   : > { %v1525_v51 = vpop.permute.xlu1 %1524  ;;  %1680 = vrot.lane.b32.xlu1 %v6323_v25, %s5516_s25  ;;  %1682 = vrot.lane.b32.xlu0 %v6328_v8, %s5516_s25  ;;  %vm6396_vm11 = vcmp.ne.s32.totalorder %v1587_v16, 0 }
 0x35b   : > { %v6345_v0 = vsel %vm6334_vm7, %v1525_v51, %v6082_v10 }
 0x35e   : > { %1554 = vrot.lane.b32.xlu1 %v6151_v61, %s5515_s24  ;;  %1684 = vrot.lane.b32.xlu0 %v6345_v0, %s5516_s25 }
 0x360   : > { %v1527_v10 = vpop.permute.xlu0 %1526 }
 0x361   : > { %v6374_v37 = vsel %vm6355_vm8, %v1527_v10, %v6091_v13  ;;  %v1493_v10 = vadd.s32 88, %v5715_v52 }
 0x362   : > { %v1529_v9 = vpop.permute.xlu1 %1528  ;;  %1556 = vrot.lane.b32.xlu1 %v6156_v46, %s5515_s24  ;;  %1558 = vrot.lane.b32.xlu0 %v6175_v20, %s5515_s24 }
 0x363   : > { %v6379_v40 = vsel %vm6359_vm9, %v1529_v9, %v6097_v58  ;;  %v6400_v9 = vsub.s32 127, %v1492_v22  ;;  %v6418_v16 = vsub.s32 127, %v1493_v10 }
 0x365   : > { %8756 = vst [vmem:[#allocation47_spill] sm:$0xff] %v6400_v9  ;;  %v1588_v22 = vand.u32 1, %v6400_v9  ;;  %8757 = vst [vmem:[#allocation48_spill] sm:$0xff] %v6418_v16 }
 0x366   : > { %1688 = vrot.lane.b32.xlu0 %v6379_v40, %s5516_s25  ;;  %1686 = vrot.lane.b32.xlu1 %v6374_v37, %s5516_s25 }
 0x367   : > { %vm6421_vm12 = vcmp.ne.s32.totalorder %v1588_v22, 0 }
 0x368   : > { %v1531_v55 = vpop.permute.xlu0 %1530 }
 0x369   : > { %v6406_v2 = vsel %vm6388_vm10, %v1531_v55, %v6118_v3  ;;  %v6431_v55 = vsub.s32 127, %v1495_v17 }
 0x36a   : > { %1562 = vrot.lane.b32.xlu0 %v6204_v36, %s5515_s24  ;;  %1560 = vrot.lane.b32.xlu1 %v6180_v21, %s5515_s24 }
 0x36b   : > { %8760 = vst [vmem:[#allocation49_spill] sm:$0xff] %v6431_v55  ;;  %v1591_v17 = vand.u32 1, %v6431_v55 }
 0x36c   : > { %v1533_v54 = vpop.permute.xlu0 %1532 }
 0x36d   : > { %v6411_v48 = vsel %vm6396_vm11, %v1533_v54, %v6127_v11  ;;  %v1589_v54 = vand.u32 1, %v6418_v16  ;;  %v1494_v11 = vadd.s32 96, %v5715_v52  ;;  %vm6457_vm14 = vcmp.ne.s32.totalorder %v1591_v17, 0 }
 0x36e   : > { %1690 = vrot.lane.b32.xlu1 %v6406_v2, %s5516_s25  ;;  %1692 = vrot.lane.b32.xlu0 %v6411_v48, %s5516_s25  ;;  %v1497_v17 = vadd.s32 120, %v5715_v52 }
 0x36f   : > { %vm6438_vm13 = vcmp.ne.s32.totalorder %v1589_v54, 0  ;;  %v8763_v54 = vmov 0 }
 0x370   : > { %v1535_v14 = vpop.permute.xlu1 %1534  ;;  %v8764_v54 = vsel %vm6457_vm14, 4294967295, %v8763_v54 }
 0x371   : > { %v6436_v22 = vsel %vm6421_vm12, %v1535_v14, %v6139_v29  ;;  %8765 = vst [vmem:[#allocation50_spill] sm:$0xff] %v8764_v54 }
 0x372   : > { %1564 = vrot.lane.b32.xlu1 %v6209_v42, %s5515_s24  ;;  %1566 = vrot.lane.b32.xlu0 %v6222_v63, %s5515_s24  ;;  %v6446_v63 = vsub.s32 127, %v1494_v11  ;;  %v1496_v11 = vadd.s32 112, %v5715_v52 }
 0x374   : > { %v1537_v10 = vpop.permute.xlu1 %1536  ;;  %v1590_v29 = vand.u32 1, %v6446_v63  ;;  %v1750_v32 = vand.u32 2, %v6446_v63 }
 0x375   : > { %v6452_v14 = vsel %vm6438_vm13, %v1537_v10, %v6148_v47  ;;  %v6475_v10 = vsub.s32 127, %v1496_v11  ;;  %v8768_v11 = vmov 0 }
 0x376   : > { %1694 = vrot.lane.b32.xlu1 %v6436_v22, %s5516_s25  ;;  %1568 = vrot.lane.b32.xlu0 %v6227_v33, %s5515_s24  ;;  %vm6467_vm15 = vcmp.ne.s32.totalorder %v1590_v29, 0  ;;  %v6488_v29 = vsub.s32 127, %v1497_v17 }
 0x378   : > { %v1539_v16 = vpop.permute.xlu1 %1538  ;;  %v1593_v52 = vand.u32 1, %v6488_v29 }
 0x379   : > { %v6481_v54 = vsel %vm6467_vm15, %v1539_v16, %v6163_v39 }
 0x37a   : > { %1696 = vrot.lane.b32.xlu0 %v6452_v14, %s5516_s25  ;;  %vm6504_vm1 = vcmp.ne.s32.totalorder %v1593_v52, 0  ;;  %v8772_v52 = vmov 0 }
 0x37c   : > { %v1541_v33 = vpop.permute.xlu1 %1540 }
 0x37d   : > { %v6465_v55 = vsel %vm6457_vm14, %v1541_v33, %v6172_v59  ;;  %v1592_v33 = vand.u32 1, %v6475_v10 }
 0x37e   : > { %1700 = vrot.lane.b32.xlu1 %v6465_v55, %s5516_s25  ;;  %1570 = vrot.lane.b32.xlu0 %v6232_v62, %s5515_s24 }
 0x37f   : > { %vm6490_vm0 = vcmp.ne.s32.totalorder %v1592_v33, 0 }
 0x380   : > { %v1543_v59 = vpop.permute.xlu0 %1542  ;;  %v8769_v11 = vsel %vm6490_vm0, 4294967295, %v8768_v11  ;;  %v1551_v34 = vpop.permute.xlu1 %1550 }
 0x381   : > { %v6502_v16 = vsel %vm6490_vm0, %v1543_v59, %v6190_v26  ;;  %v1738_v59 = vand.u32 2, %v6250_v1  ;;  %v6570_v6 = vsel %vm6282_vm4, %v1551_v34, %v6187_v28  ;;  %vm6597_vm4 = vcmp.ne.s32.totalorder %v1742_v31, 0 }
 0x382   : > { %1574 = vrot.lane.b32.xlu1 %v6242_v57, %s5515_s24  ;;  %1698 = vrot.lane.b32.xlu0 %v6481_v54, %s5516_s25 }
 0x383   : > { %vm6525_vm0 = vcmp.ne.s32.totalorder %v1738_v59, 0 }
 0x384   : > { %v1545_v39 = vpop.permute.xlu0 %1544  ;;  %v8773_v52 = vsel %vm6525_vm0, 4294967295, %v8772_v52 }
 0x385   : > { %v6513_v33 = vsel %vm6504_vm1, %v1545_v39, %v6201_v12 }
 0x386   : > { %1576 = vrot.lane.b32.xlu1 %v6247_v41, %s5515_s24  ;;  %1572 = vrot.lane.b32.xlu0 %v6237_v56, %s5515_s24 }
 0x388   : > { %v1547_v41 = vpop.permute.xlu0 %1546 }
 0x389   : > { %v6520_v26 = vsel %vm6255_vm2, %v1547_v41, %v6215_v30  ;;  %v1740_v30 = vand.u32 2, %v6261_v15  ;;  %v1739_v41 = vand.u32 2, %v6259_v27 }
 0x38a   : > { %1702 = vrot.lane.b32.xlu0 %v6502_v16, %s5516_s25 }
 0x38b   : > { %vm6545_vm2 = vcmp.ne.s32.totalorder %v1740_v30, 0 }
 0x38e   : > { %1704 = vrot.lane.b32.xlu0 %v6513_v33, %s5516_s25 }
 0x392   : > { %1706 = vrot.lane.b32.xlu0 %v6520_v26, %s5516_s25 }
 0x3bc   : > { %v1675_v12 = vpop.permute.xlu0 %1674 }
 0x3bd   : > { %v6532_v39 = vsel %vm6525_vm0, %v1675_v12, %v6266_v7  ;;  %vm6549_vm0 = vcmp.ne.s32.totalorder %v1739_v41, 0 }
 0x3be   : > { %8774 = vst [vmem:[#allocation51_spill] sm:$0xff] %v6532_v39  ;;  %1834 = vrot.lane.b32.xlu1 %v6532_v39, %s5517_s27 }
 0x3c0   : > { %v1549_v1 = vpop.permute.xlu0 %1548 }
 0x3c1   : > { %v6541_v59 = vsel %vm6278_vm3, %v1549_v1, %v6113_v23 }
 0x3c2   : > { %1708 = vrot.lane.b32.xlu1 %v6541_v59, %s5516_s25 }
 0x3c4   : > { %v1679_v15 = vpop.permute.xlu1 %1678  ;;  %v1677_v27 = vpop.permute.xlu0 %1676 }
 0x3c5   : > { %v6556_v39 = vsel %vm6545_vm2, %v1679_v15, %v6298_v53  ;;  %v6561_v23 = vsel %vm6549_vm0, %v1677_v27, %v6293_v43  ;;  %v1741_v15 = vand.u32 2, %v6274_v5 }
 0x3c6   : > { %1838 = vrot.lane.b32.xlu1 %v6556_v39, %s5517_s27  ;;  %1836 = vrot.lane.b32.xlu0 %v6561_v23, %s5517_s27 }
 0x3c7   : > { %vm6580_vm3 = vcmp.ne.s32.totalorder %v1741_v15, 0 }
 0x3c8   : > { %v1553_v1 = vpop.permute.xlu1 %1552 }
 0x3c9   : > { %v6578_v27 = vsel %vm6307_vm5, %v1553_v1, %v6132_v35  ;;  %v1744_v1 = vand.u32 2, %v6338_v4 }
 0x3ca   : > { %1710 = vrot.lane.b32.xlu0 %v6570_v6, %s5516_s25 }
 0x3cb   : > { %vm6621_vm5 = vcmp.ne.s32.totalorder %v1744_v1, 0  ;;  %v1745_v1 = vand.u32 2, %v6340_v50 }
 0x3cc   : > { %v1681_v53 = vpop.permute.xlu1 %1680  ;;  %v1683_v43 = vpop.permute.xlu0 %1682 }
 0x3cd   : > { %v6590_v34 = vsel %vm6580_vm3, %v1681_v53, %v6323_v25  ;;  %v6609_v38 = vsel %vm6597_vm4, %v1683_v43, %v6328_v8  ;;  %v1743_v53 = vand.u32 2, %v6305_v18  ;;  %v1905_v43 = vand.u32 4, %v6340_v50 }
 0x3ce   : > { %1712 = vrot.lane.b32.xlu0 %v6578_v27, %s5516_s25 }
 0x3d0   : > { %v1555_v28 = vpop.permute.xlu1 %1554  ;;  %v1685_v41 = vpop.permute.xlu0 %1684 }
 0x3d1   : > { %v6595_v45 = vsel %vm6313_vm6, %v1555_v28, %v6151_v61  ;;  %vm6635_vm6 = vcmp.ne.s32.totalorder %v1743_v53, 0  ;;  %v1746_v53 = vand.u32 2, %v6367_v44 }
 0x3d2   : > { %1714 = vrot.lane.b32.xlu1 %v6595_v45, %s5516_s25  ;;  %1840 = vrot.lane.b32.xlu0 %v6590_v34, %s5517_s27 }
 0x3d4   : > { %v1557_v15 = vpop.permute.xlu1 %1556  ;;  %v1559_v25 = vpop.permute.xlu0 %1558 }
 0x3d5   : > { %v6614_v61 = vsel %vm6355_vm8, %v1559_v25, %v6175_v20  ;;  %v6628_v49 = vsel %vm6334_vm7, %v1557_v15, %v6156_v46  ;;  %v6647_v15 = vsel %vm6635_vm6, %v1685_v41, %v6345_v0  ;;  %vm6654_vm7 = vcmp.ne.s32.totalorder %v1745_v1, 0 }
 0x3d6   : > { %1842 = vrot.lane.b32.xlu1 %v6609_v38, %s5517_s27  ;;  %1718 = vrot.lane.b32.xlu0 %v6614_v61, %s5516_s25  ;;  %vm6673_vm8 = vcmp.ne.s32.totalorder %v1746_v53, 0  ;;  %v1747_v1 = vand.u32 2, %v6369_v24  ;;  %v1907_v41 = vand.u32 4, %v6369_v24 }
 0x3d8   : > { %v1687_v28 = vpop.permute.xlu1 %1686  ;;  %v1689_v8 = vpop.permute.xlu0 %1688 }
 0x3d9   : > { %v6633_v20 = vsel %vm6621_vm5, %v1687_v28, %v6374_v37  ;;  %v6666_v51 = vsel %vm6654_vm7, %v1689_v8, %v6379_v40  ;;  %v1748_v40 = vand.u32 2, %v6400_v9  ;;  %v8797_v9 = vld [vmem:[#allocation36_spill] sm:$0xff] }
 0x3da   : > { %1716 = vrot.lane.b32.xlu1 %v6628_v49, %s5516_s25  ;;  %1846 = vrot.lane.b32.xlu0 %v6633_v20, %s5517_s27 }
 0x3dc   : > { %v1561_v60 = vpop.permute.xlu1 %1560  ;;  %v1563_v46 = vpop.permute.xlu0 %1562 }
 0x3dd   : > { %v6652_v37 = vsel %vm6359_vm9, %v1561_v60, %v6180_v21  ;;  %v6671_v21 = vsel %vm6388_vm10, %v1563_v46, %v6204_v36  ;;  %vm6693_vm9 = vcmp.ne.s32.totalorder %v1747_v1, 0  ;;  %v8791_v46 = vmov 0  ;;  %v8796_v1 = vld [vmem:[#allocation48_spill] sm:$0xff] }
 0x3de   : > { %1844 = vrot.lane.b32.xlu1 %v6647_v15, %s5517_s27  ;;  %1720 = vrot.lane.b32.xlu0 %v6652_v37, %s5516_s25  ;;  %v8792_v46 = vsel %vm6693_vm9, 4294967295, %v8791_v46  ;;  %vm6701_vm10 = vcmp.ne.s32.totalorder %v1748_v40, 0  ;;  %v1749_v40 = vand.u32 2, %v8796_v1 }
 0x3df   : > { %8793 = vst [vmem:[#allocation52_spill] sm:$0xff] %v8792_v46 }
 0x3e0   : > { %v1691_v28 = vpop.permute.xlu1 %1690  ;;  %v1693_v0 = vpop.permute.xlu0 %1692 }
 0x3e1   : > { %v6686_v36 = vsel %vm6673_vm8, %v1691_v28, %v6406_v2 }
 0x3e2   : > { %1848 = vrot.lane.b32.xlu0 %v6666_v51, %s5517_s27  ;;  %1722 = vrot.lane.b32.xlu1 %v6671_v21, %s5516_s25 }
 0x3e4   : > { %v1565_v8 = vpop.permute.xlu1 %1564  ;;  %v1567_v60 = vpop.permute.xlu0 %1566 }
 0x3e5   : > { %v6691_v13 = vsel %vm6396_vm11, %v1565_v8, %v6209_v42  ;;  %v6708_v42 = vsel %vm6693_vm9, %v1693_v0, %v6411_v48  ;;  %v6723_v46 = vsel %vm6421_vm12, %v1567_v60, %v8797_v9  ;;  %v8798_v48 = vld [vmem:[#allocation38_spill] sm:$0xff]  ;;  %vm6730_vm11 = vcmp.ne.s32.totalorder %v1749_v40, 0  ;;  %v8803_v40 = vld [vmem:[#allocation49_spill] sm:$0xff] }
 0x3e6   : > { %1724 = vrot.lane.b32.xlu0 %v6691_v13, %s5516_s25  ;;  %1850 = vrot.lane.b32.xlu1 %v6686_v36, %s5517_s27  ;;  %vm6752_vm12 = vcmp.ne.s32.totalorder %v1750_v32, 0  ;;  %v1752_v32 = vand.u32 2, %v6475_v10 }
 0x3e8   : > { %v1695_v2 = vpop.permute.xlu1 %1694  ;;  %v1569_v28 = vpop.permute.xlu0 %1568 }
 0x3e9   : > { %v6713_v58 = vsel %vm6701_vm10, %v1695_v2, %v6436_v22  ;;  %v6728_v0 = vsel %vm6438_vm13, %v1569_v28, %v8798_v48  ;;  %v1751_v48 = vand.u32 2, %v8803_v40 }
 0x3ea   : > { %1854 = vrot.lane.b32.xlu0 %v6713_v58, %s5517_s27  ;;  %1852 = vrot.lane.b32.xlu1 %v6708_v42, %s5517_s27  ;;  %8799 = vst [vmem:[#allocation48_spill] sm:$0xff] %v6728_v0 }
 0x3eb   : > { %vm6768_vm13 = vcmp.ne.s32.totalorder %v1751_v48, 0 }
 0x3ec   : > { %v1697_v8 = vpop.permute.xlu0 %1696 }
 0x3ed   : > { %v6741_v9 = vsel %vm6730_vm11, %v1697_v8, %v6452_v14 }
 0x3ee   : > { %1726 = vrot.lane.b32.xlu1 %v6723_v46, %s5516_s25  ;;  %1728 = vrot.lane.b32.xlu0 %v6728_v0, %s5516_s25  ;;  %8802 = vst [vmem:[#allocation36_spill] sm:$0xff] %v6741_v9 }
 0x3f0   : > { %v1571_v2 = vpop.permute.xlu0 %1570  ;;  %v1701_v3 = vpop.permute.xlu1 %1700 }
 0x3f1   : > { %v6749_v28 = vsel %vm6467_vm15, %v1571_v2, %v6232_v62  ;;  %v8807_v2 = vmov 0  ;;  %vm6787_vm15 = vcmp.ne.s32.totalorder %v1752_v32, 0 }
 0x3f2   : > { %1856 = vrot.lane.b32.xlu0 %v6741_v9, %s5517_s27  ;;  %v8808_v2 = vsel %vm6768_vm13, 4294967295, %v8807_v2 }
 0x3f4   : > { %v1699_v60 = vpop.permute.xlu0 %1698  ;;  %v1575_v14 = vpop.permute.xlu1 %1574 }
 0x3f5   : > { %v6761_v9 = vsel %vm6752_vm12, %v1699_v60, %v6481_v54  ;;  %v6780_v54 = vsel %vm6768_vm13, %v1701_v3, %v6465_v55  ;;  %v8812_v3 = vld [vmem:[#allocation43_spill] sm:$0xff] }
 0x3f6   : > { %1730 = vrot.lane.b32.xlu0 %v6749_v28, %s5516_s25 }
 0x3f8   : > { %v1573_v8 = vpop.permute.xlu0 %1572  ;;  %v1577_v60 = vpop.permute.xlu1 %1576 }
 0x3f9   : > { %v6766_v62 = vsel %vm6457_vm14, %v1573_v8, %v6237_v56  ;;  %vm8809_vm14 = vnez %v8769_v11  ;;  %v1753_v8 = vand.u32 2, %v6488_v29  ;;  %v6799_v11 = vsel %vm6504_vm1, %v1577_v60, %v8812_v3 }
 0x3fa   : > { %1858 = vrot.lane.b32.xlu0 %v6761_v9, %s5517_s27  ;;  %1732 = vrot.lane.b32.xlu1 %v6766_v62, %s5516_s25  ;;  %v6785_v56 = vsel %vm8809_vm14, %v1575_v14, %v6242_v57  ;;  %vm8815_vm1 = vnez %v8773_v52  ;;  %v8820_v52 = vld [vmem:[#allocation45_spill] sm:$0xff] }
 0x3fb   : > { %vm6806_vm14 = vcmp.ne.s32.totalorder %v1753_v8, 0  ;;  %v8819_v8 = vld [vmem:[#allocation51_spill] sm:$0xff]  ;;  %v7080_v14 = vld [vmem:[%s8647_s1 + $0x38] sm:$0xff]  }
 0x3fc   : > { %v1703_v40 = vpop.permute.xlu0 %1702 }
 0x3fd   : > { %v6804_v57 = vsel %vm6787_vm15, %v1703_v40, %v6502_v16  ;;  %v8816_v40 = vld [vmem:[#allocation44_spill] sm:$0xff] }
 0x3fe   : > { %1734 = vrot.lane.b32.xlu0 %v6785_v56, %s5516_s25  ;;  %1860 = vrot.lane.b32.xlu1 %v6780_v54, %s5517_s27  ;;  %v1898_v32 = vand.u32 4, %v8816_v40 }
 0x400   : > { %v1705_v55 = vpop.permute.xlu0 %1704  ;;  %vm6829_vm13 = vcmp.ne.s32.totalorder %v1898_v32, 0 }
 0x401   : > { %v6817_v17 = vsel %vm6806_vm14, %v1705_v55, %v6513_v33 }
 0x402   : > { %1736 = vrot.lane.b32.xlu1 %v6799_v11, %s5516_s25  ;;  %1862 = vrot.lane.b32.xlu0 %v6804_v57, %s5517_s27 }
 0x404   : > { %v1707_v47 = vpop.permute.xlu0 %1706 }
 0x405   : > { %v6824_v16 = vsel %vm8815_vm1, %v1707_v47, %v6520_v26  ;;  %v1899_v26 = vand.u32 4, %v8820_v52 }
 0x406   : > { %1864 = vrot.lane.b32.xlu1 %v6817_v17, %s5517_s27 }
 0x407   : > { %vm6845_vm1 = vcmp.ne.s32.totalorder %v1899_v26, 0 }
 0x40a   : > { %1866 = vrot.lane.b32.xlu1 %v6824_v16, %s5517_s27 }
 0x430   : > { %v1835_v33 = vpop.permute.xlu1 %1834 }
 0x431   : > { %v1962_v55 = vsel %vm6829_vm13, %v1835_v33, %v8819_v8  ;;  %v8823_v8 = vld [vmem:[#allocation46_spill] sm:$0xff] }
 0x432   : > { %1994 = vrot.lane.b32.xlu1 %v1962_v55, %s5518_s30  ;;  %v1900_v55 = vand.u32 4, %v8823_v8 }
 0x434   : > { %v1709_v3 = vpop.permute.xlu1 %1708 }
 0x435   : > { %v6841_v47 = vsel %vm6549_vm0, %v1709_v3, %v6541_v59  ;;  %vm6859_vm0 = vcmp.ne.s32.totalorder %v1900_v55, 0 }
 0x436   : > { %1868 = vrot.lane.b32.xlu0 %v6841_v47, %s5517_s27 }
 0x438   : > { %v1837_v32 = vpop.permute.xlu0 %1836  ;;  %v1839_v26 = vpop.permute.xlu1 %1838 }
 0x439   : > { %v1963_v33 = vsel %vm6845_vm1, %v1837_v32, %v6561_v23  ;;  %v1901_v23 = vand.u32 4, %v6274_v5  ;;  %v1964_v32 = vsel %vm6859_vm0, %v1839_v26, %v6556_v39  ;;  %v1902_v5 = vand.u32 4, %v6286_v19 }
 0x43a   : > { %2156 = vrot.lane.b32.xlu0 %v1963_v33, %s5513_s16  ;;  %v1903_v26 = vand.u32 4, %v6305_v18 }
 0x43c   : > { %v1711_v52 = vpop.permute.xlu0 %1710 }
 0x43d   : > { %v6857_v59 = vsel %vm6545_vm2, %v1711_v52, %v6570_v6  ;;  %vm6877_vm2 = vcmp.ne.s32.totalorder %v1901_v23, 0 }
 0x43e   : > { %1870 = vrot.lane.b32.xlu1 %v6857_v59, %s5517_s27 }
 0x440   : > { %v1713_v3 = vpop.permute.xlu0 %1712 }
 0x441   : > { %v6872_v7 = vsel %vm6580_vm3, %v1713_v3, %v6578_v27  ;;  %vm6886_vm3 = vcmp.ne.s32.totalorder %v1902_v5, 0  ;;  %v8828_v27 = vmov 0 }
 0x442   : > { %1998 = vrot.lane.b32.xlu1 %v1964_v32, %s5518_s30  ;;  %1872 = vrot.lane.b32.xlu0 %v6872_v7, %s5517_s27  ;;  %v8829_v27 = vsel %vm6886_vm3, 4294967295, %v8828_v27  ;;  %v1906_v32 = vand.u32 4, %v6367_v44 }
 0x444   : > { %v1715_v33 = vpop.permute.xlu1 %1714  ;;  %v1841_v8 = vpop.permute.xlu0 %1840 }
 0x445   : > { %v1965_v39 = vsel %vm6877_vm2, %v1841_v8, %v6590_v34  ;;  %v6893_v52 = vsel %vm6597_vm4, %v1715_v33, %v6595_v45  ;;  %v1904_v34 = vand.u32 4, %v6338_v4 }
 0x446   : > { %2320 = vrot.lane.b32.xlu1 %v1965_v39, %s5511_s26 }
 0x447   : > { %vm6913_vm4 = vcmp.ne.s32.totalorder %v1904_v34, 0 }
 0x448   : > { %v1843_v30 = vpop.permute.xlu1 %1842  ;;  %v1719_v55 = vpop.permute.xlu0 %1718 }
 0x449   : > { %v1966_v19 = vsel %vm6886_vm3, %v1843_v30, %v6609_v38  ;;  %v6906_v45 = vsel %vm6621_vm5, %v1719_v55, %v6614_v61  ;;  %vm6921_vm3 = vcmp.ne.s32.totalorder %v1903_v26, 0  ;;  %vm6945_vm5 = vcmp.ne.s32.totalorder %v1905_v43, 0 }
 0x44a   : > { %2002 = vrot.lane.b32.xlu0 %v1966_v19, %s5518_s30  ;;  %1874 = vrot.lane.b32.xlu1 %v6893_v52, %s5517_s27 }
 0x44c   : > { %v1717_v23 = vpop.permute.xlu1 %1716  ;;  %v1847_v3 = vpop.permute.xlu0 %1846 }
 0x44d   : > { %v6911_v35 = vsel %vm6635_vm6, %v1717_v23, %v6628_v49  ;;  %v1968_v31 = vsel %vm6913_vm4, %v1847_v3, %v6633_v20  ;;  %vm6953_vm6 = vcmp.ne.s32.totalorder %v1906_v32, 0  ;;  %v8849_v32 = vld [vmem:[#allocation36_spill] sm:$0xff] }
 0x44e   : > { %1876 = vrot.lane.b32.xlu0 %v6911_v35, %s5517_s27  ;;  %1878 = vrot.lane.b32.xlu1 %v6906_v45, %s5517_s27 }
 0x450   : > { %v1845_v18 = vpop.permute.xlu1 %1844  ;;  %v1721_v61 = vpop.permute.xlu0 %1720 }
 0x451   : > { %v1967_v49 = vsel %vm6921_vm3, %v1845_v18, %v6647_v15  ;;  %v6938_v8 = vsel %vm6654_vm7, %v1721_v61, %v6652_v37  ;;  %vm6971_vm7 = vcmp.ne.s32.totalorder %v1907_v41, 0  ;;  %v4831_v41 = vunpack.c.l.bf16 %v7080_v14 }
 0x452   : > { %2164 = vrot.lane.b32.xlu0 %v1967_v49, %s5513_s16  ;;  %2006 = vrot.lane.b32.xlu1 %v1968_v31, %s5518_s30  ;;  %v8844_v31 = vld [vmem:[#allocation48_spill] sm:$0xff] }
 0x454   : > { %v1723_v5 = vpop.permute.xlu1 %1722  ;;  %v1849_v33 = vpop.permute.xlu0 %1848 }
 0x455   : > { %v6943_v20 = vsel %vm6673_vm8, %v1723_v5, %v6671_v21  ;;  %v1969_v25 = vsel %vm6945_vm5, %v1849_v33, %v6666_v51  ;;  %v8841_v51 = vld [vmem:[#allocation47_spill] sm:$0xff] }
 0x456   : > { %1882 = vrot.lane.b32.xlu0 %v6943_v20, %s5517_s27  ;;  %1880 = vrot.lane.b32.xlu1 %v6938_v8, %s5517_s27  ;;  %v1908_v26 = vand.u32 4, %v8841_v51 }
 0x458   : > { %v1851_v50 = vpop.permute.xlu1 %1850  ;;  %v1725_v37 = vpop.permute.xlu0 %1724  ;;  %vm6986_vm8 = vcmp.ne.s32.totalorder %v1908_v26, 0  ;;  %v4832_v26 = vunpack.c.h.bf16 %v7080_v14 }
 0x459   : > { %v1970_v21 = vsel %vm6953_vm6, %v1851_v50, %v6686_v36  ;;  %v6969_v19 = vsel %vm6693_vm9, %v1725_v37, %v6691_v13 }
 0x45a   : > { %2010 = vrot.lane.b32.xlu0 %v1970_v21, %s5518_s30  ;;  %2488 = vrot.lane.b32.xlu1 %v1969_v25, %s5514_s29  ;;  %v8850_v25 = vld [vmem:[#allocation49_spill] sm:$0xff] }
 0x45b   : > { %v1911_v21 = vand.u32 4, %v8850_v25 }
 0x45c   : > { %v1853_v39 = vpop.permute.xlu1 %1852  ;;  %v1855_v30 = vpop.permute.xlu0 %1854 }
 0x45d   : > { %v1971_v24 = vsel %vm6971_vm7, %v1853_v39, %v6708_v42  ;;  %v1972_v61 = vsel %vm6986_vm8, %v1855_v30, %v6713_v58  ;;  %v1909_v42 = vand.u32 4, %v8796_v1 }
 0x45e   : > { %1884 = vrot.lane.b32.xlu0 %v6969_v19, %s5517_s27 }
 0x45f   : > { %vm7004_vm9 = vcmp.ne.s32.totalorder %v1909_v42, 0 }
 0x460   : > { %v1727_v36 = vpop.permute.xlu1 %1726  ;;  %v1729_v23 = vpop.permute.xlu0 %1728 }
 0x461   : > { %v6984_v13 = vsel %vm6701_vm10, %v1727_v36, %v6723_v46  ;;  %v1910_v46 = vand.u32 4, %v6446_v63  ;;  %v7002_v49 = vsel %vm6730_vm11, %v1729_v23, %v8844_v31  ;;  %vm8851_vm11 = vnez %v8808_v2 }
 0x462   : > { %1886 = vrot.lane.b32.xlu1 %v6984_v13, %s5517_s27  ;;  %2172 = vrot.lane.b32.xlu0 %v1971_v24, %s5513_s16 }
 0x463   : > { %vm7010_vm10 = vcmp.ne.s32.totalorder %v1910_v46, 0 }
 0x464   : > { %v1857_v18 = vpop.permute.xlu0 %1856 }
 0x465   : > { %v1973_v63 = vsel %vm7004_vm9, %v1857_v18, %v8849_v32 }
 0x466   : > { %2014 = vrot.lane.b32.xlu1 %v1972_v61, %s5518_s30 }
 0x468   : > { %v1731_v53 = vpop.permute.xlu0 %1730 }
 0x469   : > { %v7025_v50 = vsel %vm6752_vm12, %v1731_v53, %v6749_v28  ;;  %vm7042_vm12 = vcmp.ne.s32.totalorder %v1911_v21, 0  ;;  %v8860_v21 = vld [vmem:[#allocation16_spill] sm:$0xff] }
 0x46a   : > { %1888 = vrot.lane.b32.xlu1 %v7002_v49, %s5517_s27 }
 0x46c   : > { %v1859_v1 = vpop.permute.xlu0 %1858  ;;  %v1733_v5 = vpop.permute.xlu1 %1732 }
 0x46d   : > { %v1974_v22 = vsel %vm7010_vm10, %v1859_v1, %v6761_v9  ;;  %v7040_v9 = vsel %vm8851_vm11, %v1733_v5, %v6766_v62 }
 0x46e   : > { %2336 = vrot.lane.b32.xlu1 %v1973_v63, %s5511_s26  ;;  %2018 = vrot.lane.b32.xlu0 %v1974_v22, %s5518_s30 }
 0x470   : > { %v1735_v33 = vpop.permute.xlu0 %1734  ;;  %v1861_v0 = vpop.permute.xlu1 %1860 }
 0x471   : > { %v7030_v37 = vsel %vm6787_vm15, %v1735_v33, %v6785_v56  ;;  %v1912_v56 = vand.u32 4, %v6475_v10  ;;  %v1975_v48 = vsel %vm7042_vm12, %v1861_v0, %v6780_v54  ;;  %v1913_v10 = vand.u32 4, %v6488_v29  ;;  %v8858_v29 = vld [vmem:[#allocation32_spill] sm:$0xff] }
 0x472   : > { %1890 = vrot.lane.b32.xlu1 %v7025_v50, %s5517_s27  ;;  %1894 = vrot.lane.b32.xlu0 %v7030_v37, %s5517_s27 }
 0x473   : > { %vm7052_vm15 = vcmp.ne.s32.totalorder %v1912_v56, 0  ;;  %vm7067_vm11 = vcmp.ne.s32.totalorder %v1913_v10, 0 }
 0x474   : > { %v1863_v62 = vpop.permute.xlu0 %1862  ;;  %v1737_v2 = vpop.permute.xlu1 %1736 }
 0x475   : > { %v1976_v39 = vsel %vm7052_vm15, %v1863_v62, %v6804_v57  ;;  %v7065_v54 = vsel %vm6806_vm14, %v1737_v2, %v6799_v11  ;;  %vm8898_vm14 = vcmask 130048  }
 0x476   : > { %1892 = vrot.lane.b32.xlu1 %v7040_v9, %s5517_s27 }
 0x478   : > { %v1865_v55 = vpop.permute.xlu1 %1864 }
 0x479   : > { %v1977_v57 = vsel %vm7067_vm11, %v1865_v55, %v6817_v17 }
 0x47a   : > { %2180 = vrot.lane.b32.xlu1 %v1975_v48, %s5513_s16  ;;  %v2649_v51 = vadd.f32 %v1977_v57, %v8858_v29  ;;  %v8861_v29 = vld [vmem:[#allocation31_spill] sm:$0xff] }
 0x47c   : > { %v2681_v11 = vmul.f32 0.25, %v2649_v51  ;;  %v1867_v23 = vpop.permute.xlu1 %1866 }
 0x47d   : > { %v1978_v17 = vsel %vm6829_vm13, %v1867_v23, %v6824_v16  ;;  %vm8859_vm13 = vnez %v8829_v27  ;;  %v8862_v23 = vld [vmem:[#allocation24_spill] sm:$0xff] }
 0x47e   : > { %2022 = vrot.lane.b32.xlu1 %v1976_v39, %s5518_s30  ;;  %v7085_v36 = vadd.f32 %v4832_v26, %v2681_v11 }
 0x482   : > { %1896 = vrot.lane.b32.xlu1 %v7065_v54, %s5517_s27 }
 0x491   : > { %2792 = vmax.xlane.f32.xlu0 %v7085_v36 }
 0x4a4   : > { %v1995_v24 = vpop.permute.xlu1 %1994 }
 0x4a5   : > { %2154 = vrot.lane.b32.xlu1 %v1995_v24, %s5513_s16 }
 0x4a7   : > { %2026 = vrot.lane.b32.xlu0 %v1978_v17, %s5518_s30 }
 0x4a8   : > { %v1869_v18 = vpop.permute.xlu0 %1868 }
 0x4a9   : > { %v1979_v61 = vsel %vm6845_vm1, %v1869_v18, %v6841_v47  ;;  %v7178_v18 = vld [vmem:[%s8647_s1 + $0x28] sm:$0xff]   ;;  %vm8899_vm1 = vmmov %vm8898_vm14 }
 0x4aa   : > { %2188 = vrot.lane.b32.xlu1 %v1979_v61, %s5513_s16 }
 0x4ac   : > { %v2157_v42 = vpop.permute.xlu0 %2156 }
 0x4ae   : > { %2316 = vrot.lane.b32.xlu1 %v2157_v42, %s5511_s26 }
 0x4b0   : > { %v1871_v46 = vpop.permute.xlu1 %1870 }
 0x4b1   : > { %v1980_v53 = vsel %vm6859_vm0, %v1871_v46, %v6857_v59  ;;  %vm8900_vm0 = vcmask 261120  }
 0x4b2   : > { %2030 = vrot.lane.b32.xlu0 %v1980_v53, %s5518_s30  ;;  %v4824_v53 = vunpack.c.h.bf16 %v7178_v18 }
 0x4b4   : > { %v1999_v16 = vpop.permute.xlu1 %1998  ;;  %v1873_v60 = vpop.permute.xlu0 %1872 }
 0x4b5   : > { %v1981_v31 = vsel %vm6877_vm2, %v1873_v60, %v6872_v7  ;;  %vm8901_vm2 = vmmov %vm8899_vm1 }
 0x4b6   : > { %2318 = vrot.lane.b32.xlu0 %v1999_v16, %s5511_s26  ;;  %2352 = vrot.lane.b32.xlu1 %v1981_v31, %s5511_s26 }
 0x4b8   : > { %v2321_v47 = vpop.permute.xlu1 %2320 }
 0x4ba   : > { %2480 = vrot.lane.b32.xlu1 %v2321_v47, %s5514_s29 }
 0x4bc   : > { %v1875_v40 = vpop.permute.xlu1 %1874  ;;  %v2003_v1 = vpop.permute.xlu0 %2002 }
 0x4bd   : > { %v1982_v59 = vsel %vm8859_vm13, %v1875_v40, %v6893_v52  ;;  %vm8913_vm13 = vmmov %vm8899_vm1 }
 0x4be   : > { %2034 = vrot.lane.b32.xlu0 %v1982_v59, %s5518_s30  ;;  %2162 = vrot.lane.b32.xlu1 %v2003_v1, %s5513_s16 }
 0x4c0   : > { %v1879_v12 = vpop.permute.xlu1 %1878  ;;  %v1877_v6 = vpop.permute.xlu0 %1876 }
 0x4c1   : > { %v1984_v7 = vsel %vm6913_vm4, %v1879_v12, %v6906_v45  ;;  %v1983_v32 = vsel %vm6921_vm3, %v1877_v6, %v6911_v35  ;;  %vm8902_vm3 = vmmov %vm8899_vm1 }
 0x4c2   : > { %2038 = vrot.lane.b32.xlu1 %v1984_v7, %s5518_s30  ;;  %2196 = vrot.lane.b32.xlu0 %v1983_v32, %s5513_s16  ;;  %vm8903_vm4 = vmmov %vm8900_vm0 }
 0x4c4   : > { %v2007_v27 = vpop.permute.xlu1 %2006  ;;  %v2165_v52 = vpop.permute.xlu0 %2164 }
 0x4c6   : > { %2486 = vrot.lane.b32.xlu1 %v2007_v27, %s5514_s29  ;;  %2484 = vrot.lane.b32.xlu0 %v2165_v52, %s5514_s29  ;;  %v8863_v27 = vld [vmem:[#allocation15_spill] sm:$0xff] }
 0x4c8   : > { %v1881_v63 = vpop.permute.xlu1 %1880  ;;  %v1883_v22 = vpop.permute.xlu0 %1882 }
 0x4c9   : > { %v1985_v45 = vsel %vm6945_vm5, %v1881_v63, %v6938_v8  ;;  %v1986_v35 = vsel %vm6953_vm6, %v1883_v22, %v6943_v20  ;;  %v8864_v63 = vld [vmem:[#allocation28_spill] sm:$0xff]  ;;  %vm8904_vm5 = vmmov %vm8899_vm1 }
 0x4ca   : > { %2520 = vrot.lane.b32.xlu1 %v1985_v45, %s5514_s29  ;;  %2042 = vrot.lane.b32.xlu0 %v1986_v35, %s5518_s30  ;;  %v7204_v35 = vld [vmem:[%s8647_s1 + $0x30] sm:$0xff]   ;;  %vm8905_vm6 = vmmov %vm8899_vm1 }
 0x4cc   : > { %v2011_v38 = vpop.permute.xlu0 %2010  ;;  %v2489_v4 = vpop.permute.xlu1 %2488 }
 0x4cd   : > { %v2641_v0 = vadd.f32 %v2489_v4, %v8860_v21  ;;  %v8865_v4 = vld [vmem:[#allocation42_spill] sm:$0xff] }
 0x4ce   : > { %2170 = vrot.lane.b32.xlu1 %v2011_v38, %s5513_s16 }
 0x4cf   : > { %v2673_v3 = vmul.f32 0.25, %v2641_v0 }
 0x4d0   : > { %v1885_v25 = vpop.permute.xlu0 %1884 }
 0x4d1   : > { %v1987_v58 = vsel %vm6971_vm7, %v1885_v25, %v6969_v19  ;;  %vm8906_vm7 = vmmov %vm8899_vm1 }
 0x4d4   : > { %v1887_v5 = vpop.permute.xlu1 %1886  ;;  %v2173_v20 = vpop.permute.xlu0 %2172 }
 0x4d5   : > { %v1988_v33 = vsel %vm6986_vm8, %v1887_v5, %v6984_v13  ;;  %v7145_v13 = vld [vmem:[%s8647_s1 + $0x18] sm:$0xff]   ;;  %vm8907_vm8 = vmmov %vm8899_vm1 }
 0x4d6   : > { %2046 = vrot.lane.b32.xlu1 %v1988_v33, %s5518_s30  ;;  %v4816_v62 = vunpack.c.h.bf16 %v7145_v13  ;;  %v4828_v33 = vunpack.c.h.bf16 %v7204_v35 }
 0x4d8   : > { %v2015_v8 = vpop.permute.xlu1 %2014  ;;  %v7154_v39 = vadd.f32 %v4816_v62, %v2673_v3 }
 0x4da   : > { %2334 = vrot.lane.b32.xlu1 %v2015_v8, %s5511_s26 }
 0x4dc   : > { %v1889_v15 = vpop.permute.xlu1 %1888 }
 0x4dd   : > { %v1989_v44 = vsel %vm7004_vm9, %v1889_v15, %v7002_v49  ;;  %vm8908_vm9 = vmmov %vm8900_vm0 }
 0x4de   : > { %2368 = vrot.lane.b32.xlu1 %v1989_v44, %s5511_s26 }
 0x4e0   : > { %v2337_v56 = vpop.permute.xlu1 %2336  ;;  %v2019_v48 = vpop.permute.xlu0 %2018 }
 0x4e1   : > { %v2645_v24 = vadd.f32 %v2337_v56, %v8862_v23 }
 0x4e3   : > { %v2677_v42 = vmul.f32 0.25, %v2645_v24 }
 0x4e4   : > { %v1891_v2 = vpop.permute.xlu1 %1890  ;;  %v1895_v49 = vpop.permute.xlu0 %1894 }
 0x4e5   : > { %v1990_v43 = vsel %vm7010_vm10, %v1891_v2, %v7025_v50  ;;  %v1992_v10 = vsel %vm7052_vm15, %v1895_v49, %v7030_v37  ;;  %v7186_v60 = vadd.f32 %v4824_v53, %v2677_v42  ;;  %v8868_v42 = vld [vmem:[#allocation27_spill] sm:$0xff]  ;;  %vm8909_vm10 = vmmov %vm8899_vm1 }
 0x4e6   : > { %2050 = vrot.lane.b32.xlu1 %v1990_v43, %s5518_s30  ;;  %v4823_v43 = vunpack.c.l.bf16 %v7178_v18  ;;  %vm8911_vm15 = vmmov %vm8900_vm0 }
 0x4e8   : > { %v1893_v55 = vpop.permute.xlu1 %1892 }
 0x4e9   : > { %2776 = vmax.xlane.f32.xlu0 %v7154_v39  ;;  %v1991_v6 = vsel %vm7042_vm12, %v1893_v55, %v7040_v9  ;;  %v4815_v9 = vunpack.c.l.bf16 %v7145_v13  ;;  %vm8910_vm12 = vmmov %vm8899_vm1 }
 0x4ea   : > { %2054 = vrot.lane.b32.xlu1 %v1992_v10, %s5518_s30  ;;  %v8867_v10 = vld [vmem:[#allocation12_spill] sm:$0xff] }
 0x4ec   : > { %v2181_v57 = vpop.permute.xlu1 %2180 }
 0x4ed   : > { %v2647_v22 = vadd.f32 %v2181_v57, %v8864_v63  ;;  %v7237_v57 = vld [vmem:[%s8647_s1 + $0x8] sm:$0xff]   ;;  %v8871_v63 = vld [vmem:[#allocation30_spill] sm:$0xff] }
 0x4ef   : > { %v2679_v28 = vmul.f32 0.25, %v2647_v22 }
 0x4f0   : > { %v2023_v50 = vpop.permute.xlu1 %2022 }
 0x4f1   : > { %v2648_v51 = vadd.f32 %v2023_v50, %v8861_v29  ;;  %v4808_v29 = vunpack.c.h.bf16 %v7237_v57 }
 0x4f3   : > { %v2680_v37 = vmul.f32 0.25, %v2648_v51 }
 0x4f4   : > { %v1897_v34 = vpop.permute.xlu1 %1896 }
 0x4f5   : > { %v7171_v11 = vadd.f32 %v4831_v41, %v2680_v37  ;;  %v1993_v45 = vsel %vm7067_vm11, %v1897_v34, %v7065_v54  ;;  %v7214_v54 = vadd.f32 %v4828_v33, %v2679_v28  ;;  %vm8912_vm11 = vmmov %vm8899_vm1 }
 0x4f6   : > { %v2665_v5 = vadd.f32 %v1993_v45, %v8865_v4 }
 0x4f8   : > { %v2697_v8 = vmul.f32 0.25, %v2665_v5 }
 0x4ff   : > { %2204 = vrot.lane.b32.xlu0 %v1987_v58, %s5513_s16 }
 0x503   : > { %2332 = vrot.lane.b32.xlu0 %v2173_v20, %s5511_s26  ;;  %v2761_v20 = vadd.f32 %v4832_v26, %v2697_v8  ;;  %v8866_v26 = vld [vmem:[#allocation23_spill] sm:$0xff] }
 0x507   : > { %2178 = vrot.lane.b32.xlu0 %v2019_v48, %s5513_s16 }
 0x50e   : > { %2790 = vmax.xlane.f32.xlu1 %v7171_v11 }
 0x517   : > { %v2155_v19 = vpop.permute.xlu1 %2154 }
 0x51c   : > { %v2189_v17 = vpop.permute.xlu1 %2188 }
 0x51e   : > { %v7180_v61 = vpop.xlane.xlu0 %2792 }
 0x520   : > { %v2317_v46 = vpop.permute.xlu1 %2316 }
 0x521   : > { %2476 = vrot.lane.b32.xlu1 %v2317_v46, %s5514_s29 }
 0x522   : > { %v2027_v16 = vpop.permute.xlu0 %2026 }
 0x526   : > { %2784 = vmax.xlane.f32.xlu0 %v7186_v60  ;;  %v2031_v31 = vpop.permute.xlu0 %2030 }
 0x528   : > { %v2353_v47 = vpop.permute.xlu1 %2352 }
 0x529   : > { %2512 = vrot.lane.b32.xlu1 %v2353_v47, %s5514_s29  ;;  %v8869_v47 = vld [vmem:[#allocation40_spill] sm:$0xff] }
 0x52a   : > { %v2319_v40 = vpop.permute.xlu0 %2318 }
 0x52c   : > { %v2481_v1 = vpop.permute.xlu1 %2480 }
 0x52d   : > { %v2637_v55 = vadd.f32 %v2481_v1, %v8867_v10  ;;  %v4827_v1 = vunpack.c.l.bf16 %v7204_v35 }
 0x52f   : > { %v2669_v58 = vmul.f32 0.25, %v2637_v55 }
 0x530   : > { %v2035_v59 = vpop.permute.xlu0 %2034  ;;  %v2163_v12 = vpop.permute.xlu1 %2162 }
 0x531   : > { %2194 = vrot.lane.b32.xlu1 %v2035_v59, %s5513_s16  ;;  %v7244_v34 = vadd.f32 %v4808_v29, %v2669_v58  ;;  %v8874_v58 = vld [vmem:[#allocation41_spill] sm:$0xff] }
 0x534   : > { %v2039_v7 = vpop.permute.xlu1 %2038  ;;  %v2197_v30 = vpop.permute.xlu0 %2196 }
 0x535   : > { %2482 = vrot.lane.b32.xlu1 %v2163_v12, %s5514_s29 }
 0x538   : > { %v2487_v32 = vpop.permute.xlu1 %2486  ;;  %v2485_v15 = vpop.permute.xlu0 %2484 }
 0x539   : > { %v2640_v52 = vadd.f32 %v2487_v32, %v8863_v27  ;;  %v8870_v32 = vld [vmem:[#allocation14_spill] sm:$0xff] }
 0x53a   : > { %v2639_v27 = vadd.f32 %v2485_v15, %v8870_v32 }
 0x53b   : > { %v2672_v38 = vmul.f32 0.25, %v2640_v52 }
 0x53c   : > { %2212 = vrot.lane.b32.xlu0 %v1991_v6, %s5513_s16  ;;  %v2521_v44 = vpop.permute.xlu1 %2520  ;;  %v2043_v21 = vpop.permute.xlu0 %2042  ;;  %v2671_v52 = vmul.f32 0.25, %v2639_v27 }
 0x53d   : > { %v7211_v25 = vadd.f32 %v4815_v9, %v2672_v38  ;;  %v2657_v22 = vadd.f32 %v2521_v44, %v8871_v63 }
 0x53f   : > { %v2689_v38 = vmul.f32 0.25, %v2657_v22 }
 0x540   : > { %v2171_v0 = vpop.permute.xlu1 %2170 }
 0x541   : > { %v7278_v4 = vadd.f32 %v4816_v62, %v2689_v38  ;;  %v8872_v62 = vld [vmem:[#allocation20_spill] sm:$0xff]  ;;  %v8876_v38 = vld [vmem:[#allocation10_spill] sm:$0xff] }
 0x548   : > { %v2047_v56 = vpop.permute.xlu1 %2046 }
 0x54c   : > { %v2335_v48 = vpop.permute.xlu1 %2334 }
 0x54d   : > { %v2644_v3 = vadd.f32 %v2335_v48, %v8866_v26  ;;  %v8873_v26 = vld [vmem:[#allocation37_spill] sm:$0xff] }
 0x54f   : > { %v2676_v2 = vmul.f32 0.25, %v2644_v3 }
 0x550   : > { %v2369_v50 = vpop.permute.xlu1 %2368 }
 0x551   : > { %v7230_v49 = vadd.f32 %v4823_v43, %v2676_v2  ;;  %v2661_v3 = vadd.f32 %v2369_v50, %v8873_v26 }
 0x553   : > { %v2693_v55 = vmul.f32 0.25, %v2661_v3  ;;  %v8878_v3 = vld [vmem:[#allocation29_spill] sm:$0xff] }
 0x558   : > { %v2051_v51 = vpop.permute.xlu1 %2050 }
 0x559   : > { %2774 = vmax.xlane.f32.xlu1 %v7211_v25 }
 0x55b   : > { %2788 = vmax.xlane.f32.xlu0 %v7214_v54 }
 0x55c   : > { %v2055_v10 = vpop.permute.xlu1 %2054 }
 0x55f   : > { %2824 = vmax.xlane.f32.xlu0 %v2761_v20 }
 0x56a   : > { %2202 = vrot.lane.b32.xlu1 %v2043_v21, %s5513_s16 }
 0x56e   : > { %2330 = vrot.lane.b32.xlu1 %v2171_v0, %s5511_s26 }
 0x575   : > { %2186 = vrot.lane.b32.xlu0 %v2027_v16, %s5513_s16 }
 0x576   : > { %v7240_v37 = vpop.xlane.xlu0 %2776 }
 0x579   : > { %2314 = vrot.lane.b32.xlu0 %v2155_v19, %s5511_s26 }
 0x57a   : > { %v2205_v19 = vpop.permute.xlu0 %2204 }
 0x57d   : > { %2348 = vrot.lane.b32.xlu0 %v2189_v17, %s5511_s26 }
 0x57e   : > { %v2333_v23 = vpop.permute.xlu0 %2332 }
 0x57f   : > { %v2643_v0 = vadd.f32 %v2333_v23, %v8872_v62 }
 0x581   : > { %2350 = vrot.lane.b32.xlu0 %v2031_v31, %s5511_s26  ;;  %v2675_v2 = vmul.f32 0.25, %v2643_v0 }
 0x582   : > { %v2179_v24 = vpop.permute.xlu0 %2178 }
 0x583   : > { %v2646_v46 = vadd.f32 %v2179_v24, %v8868_v42  ;;  %v7306_v24 = vadd.f32 %v4824_v53, %v2693_v55 }
 0x585   : > { %2478 = vrot.lane.b32.xlu0 %v2319_v40, %s5514_s29  ;;  %v2678_v31 = vmul.f32 0.25, %v2646_v46 }
 0x587   : > { %v7257_v12 = vadd.f32 %v4827_v1, %v2678_v31 }
 0x592   : > { %2782 = vmax.xlane.f32.xlu1 %v7230_v49 }
 0x5a3   : > { %2210 = vrot.lane.b32.xlu1 %v2051_v51, %s5513_s16  ;;  %v2664_v51 = vadd.f32 %v2055_v10, %v8874_v58 }
 0x5a4   : > { %2768 = vmax.xlane.f32.xlu0 %v7244_v34 }
 0x5a5   : > { %v2696_v23 = vmul.f32 0.25, %v2664_v51 }
 0x5a7   : > { %v7311_v50 = vadd.f32 %v4831_v41, %v2696_v23 }
 0x5b3   : > { %v7248_v17 = vpop.xlane.xlu0 %2784 }
 0x5b7   : > { %v2213_v16 = vpop.permute.xlu0 %2212 }
 0x5b8   : > { %v2663_v40 = vadd.f32 %v2213_v16, %v8869_v47  ;;  %v8875_v16 = vld [vmem:[#allocation11_spill] sm:$0xff] }
 0x5ba   : > { %2516 = vrot.lane.b32.xlu0 %v2197_v30, %s5514_s29  ;;  %v2695_v59 = vmul.f32 0.25, %v2663_v40  ;;  %v4807_v40 = vunpack.c.l.bf16 %v7237_v57 }
 0x5bc   : > { %v7260_v6 = vadd.f32 %v4828_v33, %v2695_v59  ;;  %v7316_v59 = vpop.xlane.xlu1 %2790 }
 0x5be   : > { %2518 = vrot.lane.b32.xlu0 %v2039_v7, %s5514_s29  ;;  %v7267_v7 = vld [vmem:[%s8647_s1 + $0x10] sm:$0xff]  }
 0x5bf   : > { %v4812_v45 = vunpack.c.h.bf16 %v7267_v7 }
 0x5c0   : > { %v2477_v14 = vpop.permute.xlu1 %2476 }
 0x5c1   : > { %v7273_v28 = vadd.f32 %v4812_v45, %v2671_v52 }
 0x5c4   : > { %v2513_v41 = vpop.permute.xlu1 %2512 }
 0x5c7   : > { %2786 = vmax.xlane.f32.xlu1 %v7257_v12 }
 0x5c8   : > { %v2195_v32 = vpop.permute.xlu1 %2194 }
 0x5cb   : > { %2820 = vmax.xlane.f32.xlu1 %v7260_v6 }
 0x5cc   : > { %v2483_v52 = vpop.permute.xlu1 %2482 }
 0x5dd   : > { %2772 = vmax.xlane.f32.xlu0 %v7273_v28 }
 0x5e1   : > { %2808 = vmax.xlane.f32.xlu0 %v7278_v4 }
 0x5e6   : > { %v7326_v63 = vpop.xlane.xlu1 %2774 }
 0x5e8   : > { %v7281_v5 = vpop.xlane.xlu0 %2788 }
 0x5ea   : > { %v2203_v62 = vpop.permute.xlu1 %2202 }
 0x5ec   : > { %v2825_v33 = vpop.xlane.xlu0 %2824 }
 0x5ed   : > { %v2857_v8 = vsub.f32 %v2761_v20, %v2825_v33  ;;  %v7294_v20 = vld [vmem:[%s8647_s1 + $0x20] sm:$0xff]   ;;  %v2635_v33 = vadd.f32 %v2477_v14, %v8876_v38 }
 0x5ee   : > { %v2331_v55 = vpop.permute.xlu1 %2330  ;;  %v4819_v35 = vunpack.c.l.bf16 %v7294_v20 }
 0x5ef   : > { %v2920_v30 = vmul.f32 1.442695, %v2857_v8  ;;  %v7332_v8 = vld [vmem:[%s8647_s1] sm:$0xff]  }
 0x5f0   : > { %v2187_v44 = vpop.permute.xlu0 %2186  ;;  %v4804_v0 = vunpack.c.h.bf16 %v7332_v8 }
 0x5f1   : > { %5230 = vpow2.f32 %v2920_v30  ;;  %v2667_v30 = vmul.f32 0.25, %v2635_v33 }
 0x5f3   : > { %v7339_v10 = vadd.f32 %v4804_v0, %v2667_v30 }
 0x5f4   : > { %v2315_v21 = vpop.permute.xlu0 %2314 }
 0x5f7   : > { %2364 = vrot.lane.b32.xlu0 %v2205_v19, %s5511_s26 }
 0x5f8   : > { %v2349_v48 = vpop.permute.xlu0 %2348 }
 0x5fb   : > { %v7284_v15 = vpop.eup %5230  ;;  %2366 = vrot.lane.b32.xlu0 %v2047_v56, %s5511_s26  ;;  %v4820_v56 = vunpack.c.h.bf16 %v7294_v20 }
 0x5fc   : > { %2984 = vadd.xlane.f32.xlu1 %v7284_v15  ;;  %v2351_v42 = vpop.permute.xlu0 %2350 }
 0x5fd   : > { %v7301_v19 = vadd.f32 %v4820_v56, %v2675_v2 }
 0x600   : > { %v2479_v46 = vpop.permute.xlu0 %2478 }
 0x601   : > { %v2636_v31 = vadd.f32 %v2479_v46, %v8875_v16 }
 0x603   : > { %v2668_v47 = vmul.f32 0.25, %v2636_v31 }
 0x605   : > { %v7320_v53 = vadd.f32 %v4807_v40, %v2668_v47  ;;  %v8880_v47 = vld [vmem:[#allocation26_spill] sm:$0xff] }
 0x60d   : > { %2346 = vrot.lane.b32.xlu1 %v2187_v44, %s5511_s26  ;;  %v8877_v44 = vld [vmem:[#allocation22_spill] sm:$0xff] }
 0x611   : > { %2508 = vrot.lane.b32.xlu1 %v2349_v48, %s5514_s29 }
 0x61a   : > { %2780 = vmax.xlane.f32.xlu0 %v7301_v19 }
 0x61e   : > { %2816 = vmax.xlane.f32.xlu0 %v7306_v24 }
 0x61f   : > { %v7346_v23 = vpop.xlane.xlu1 %2782 }
 0x622   : > { %2822 = vmax.xlane.f32.xlu0 %v7311_v50 }
 0x631   : > { %v2769_v27 = vpop.xlane.xlu0 %2768 }
 0x635   : > { %2766 = vmax.xlane.f32.xlu1 %v7320_v53  ;;  %v2517_v22 = vpop.permute.xlu0 %2516 }
 0x636   : > { %v2655_v14 = vadd.f32 %v2517_v22, %v8880_v47  ;;  %v2829_v47 = vsub.f32 %v7244_v34, %v2769_v27 }
 0x638   : > { %2474 = vrot.lane.b32.xlu0 %v2315_v21, %s5514_s29  ;;  %v2653_v21 = vadd.f32 %v2513_v41, %v8877_v44  ;;  %v4811_v41 = vunpack.c.l.bf16 %v7267_v7 }
 0x639   : > { %v2519_v48 = vpop.permute.xlu0 %2518 }
 0x63a   : > { %v2685_v26 = vmul.f32 0.25, %v2653_v21  ;;  %v2656_v2 = vadd.f32 %v2519_v48, %v8878_v3 }
 0x63c   : > { %2510 = vrot.lane.b32.xlu0 %v2351_v42, %s5514_s29  ;;  %v2688_v58 = vmul.f32 0.25, %v2656_v2  ;;  %v7344_v51 = vadd.f32 %v4808_v29, %v2685_v26  ;;  %v8879_v42 = vld [vmem:[#allocation13_spill] sm:$0xff]  ;;  %v2687_v29 = vmul.f32 0.25, %v2655_v14  ;;  %v8881_v26 = vld [vmem:[#allocation39_spill] sm:$0xff] }
 0x63d   : > { %v2638_v46 = vadd.f32 %v2483_v52, %v8879_v42  ;;  %v8882_v2 = vld [vmem:[#allocation35_spill] sm:$0xff] }
 0x63e   : > { %v7352_v16 = vadd.f32 %v4815_v9, %v2688_v58  ;;  %v7368_v9 = vadd.f32 %v4812_v45, %v2687_v29  ;;  %v8883_v14 = vld [vmem:[#allocation19_spill] sm:$0xff] }
 0x63f   : > { %v2670_v31 = vmul.f32 0.25, %v2638_v46  ;;  %v2642_v18 = vadd.f32 %v2331_v55, %v8883_v14 }
 0x641   : > { %v7359_v38 = vadd.f32 %v4811_v41, %v2670_v31  ;;  %v2674_v29 = vmul.f32 0.25, %v2642_v18  ;;  %v8886_v18 = vld [vmem:[#allocation18_spill] sm:$0xff] }
 0x646   : > { %2514 = vrot.lane.b32.xlu1 %v2195_v32, %s5514_s29  ;;  %v2211_v32 = vpop.permute.xlu1 %2210 }
 0x647   : > { %v2662_v3 = vadd.f32 %v2211_v32, %v8881_v26 }
 0x649   : > { %v2694_v46 = vmul.f32 0.25, %v2662_v3 }
 0x654   : > { %v7361_v33 = vpop.xlane.xlu1 %2786 }
 0x658   : > { %v2821_v22 = vpop.xlane.xlu1 %2820 }
 0x659   : > { %v2855_v30 = vsub.f32 %v7260_v6, %v2821_v22  ;;  %v7382_v6 = vadd.f32 %v4827_v1, %v2694_v46  ;;  %v8884_v22 = vld [vmem:[#allocation34_spill] sm:$0xff]  ;;  %v8885_v46 = vld [vmem:[#allocation9_spill] sm:$0xff] }
 0x65b   : > { %2764 = vmax.xlane.f32.xlu0 %v7339_v10  ;;  %v2916_v21 = vmul.f32 1.442695, %v2855_v30 }
 0x65d   : > { %5232 = vpow2.f32 %v2916_v21  ;;  %v7395_v21 = vadd.f32 %v4819_v35, %v2674_v29 }
 0x65f   : > { %2800 = vmax.xlane.f32.xlu0 %v7344_v51 }
 0x663   : > { %2806 = vmax.xlane.f32.xlu0 %v7352_v16 }
 0x667   : > { %v7385_v31 = vpop.eup %5232 }
 0x66a   : > { %2770 = vmax.xlane.f32.xlu1 %v7359_v38  ;;  %v7364_v13 = vpop.xlane.xlu0 %2772 }
 0x66e   : > { %2804 = vmax.xlane.f32.xlu1 %v7368_v9  ;;  %v2809_v52 = vpop.xlane.xlu0 %2808 }
 0x66f   : > { %v2849_v32 = vsub.f32 %v7278_v4, %v2809_v52 }
 0x671   : > { %v2904_v1 = vmul.f32 1.442695, %v2849_v32 }
 0x672   : > { %v2365_v44 = vpop.permute.xlu0 %2364 }
 0x676   : > { %v2367_v48 = vpop.permute.xlu0 %2366 }
 0x677   : > { %v2660_v58 = vadd.f32 %v2367_v48, %v8882_v2 }
 0x679   : > { %v2692_v42 = vmul.f32 0.25, %v2660_v58 }
 0x67b   : > { %v7376_v45 = vadd.f32 %v4823_v43, %v2692_v42  ;;  %v2864_v43 = vmul.f32 1.442695, %v2829_v47 }
 0x67d   : > { %2814 = vmax.xlane.f32.xlu0 %v7376_v45  ;;  %5234 = vpow2.f32 %v2864_v43 }
 0x67e   : > { %5236 = vpow2.f32 %v2904_v1 }
 0x67f   : > { %2362 = vrot.lane.b32.xlu1 %v2203_v62, %s5511_s26  ;;  %v2659_v62 = vadd.f32 %v2365_v44, %v8884_v22 }
 0x681   : > { %2818 = vmax.xlane.f32.xlu0 %v7382_v6  ;;  %v2691_v30 = vmul.f32 0.25, %v2659_v62 }
 0x683   : > { %v7400_v34 = vadd.f32 %v4820_v56, %v2691_v30 }
 0x685   : > { %2980 = vadd.xlane.f32.xlu0 %v7385_v31 }
 0x687   : > { %v7405_v27 = vpop.eup %5234 }
 0x688   : > { %v7411_v48 = vpop.eup %5236 }
 0x689   : > { %v7407_v55 = vpop.xlane.xlu1 %2984 }
 0x68d   : > { %v2347_v3 = vpop.permute.xlu1 %2346 }
 0x691   : > { %v2509_v14 = vpop.permute.xlu1 %2508 }
 0x692   : > { %v2651_v43 = vadd.f32 %v2509_v14, %v8886_v18 }
 0x694   : > { %v2683_v22 = vmul.f32 0.25, %v2651_v43 }
 0x696   : > { %v7431_v1 = vadd.f32 %v4804_v0, %v2683_v22 }
 0x6a3   : > { %2778 = vmax.xlane.f32.xlu1 %v7395_v21 }
 0x6a7   : > { %2812 = vmax.xlane.f32.xlu1 %v7400_v34  ;;  %v7403_v4 = vpop.xlane.xlu0 %2780 }
 0x6ab   : > { %2928 = vadd.xlane.f32.xlu1 %v7405_v27  ;;  %v2817_v52 = vpop.xlane.xlu0 %2816 }
 0x6ac   : > { %v2853_v44 = vsub.f32 %v7306_v24, %v2817_v52  ;;  %v4803_v24 = vunpack.c.l.bf16 %v7332_v8  ;;  %v2832_v8 = vsub.f32 %v7211_v25, %v7326_v63 }
 0x6ae   : > { %v2912_v26 = vmul.f32 1.442695, %v2853_v44 }
 0x6af   : > { %2968 = vadd.xlane.f32.xlu1 %v7411_v48  ;;  %v2823_v56 = vpop.xlane.xlu0 %2822 }
 0x6b0   : > { %5238 = vpow2.f32 %v2912_v26  ;;  %v2856_v2 = vsub.f32 %v7311_v50, %v2823_v56  ;;  %v8887_v26 = vld [vmem:[#allocation21_spill] sm:$0xff] }
 0x6b2   : > { %v2918_v58 = vmul.f32 1.442695, %v2856_v2 }
 0x6b3   : > { %v2475_v42 = vpop.permute.xlu0 %2474 }
 0x6b4   : > { %5240 = vpow2.f32 %v2918_v58  ;;  %v2634_v47 = vadd.f32 %v2475_v42, %v8885_v46  ;;  %v8888_v46 = vld [vmem:[#allocation25_spill] sm:$0xff] }
 0x6b6   : > { %v2666_v32 = vmul.f32 0.25, %v2634_v47 }
 0x6b7   : > { %v2511_v30 = vpop.permute.xlu0 %2510 }
 0x6b8   : > { %v7423_v62 = vadd.f32 %v4803_v24, %v2666_v32  ;;  %v2652_v56 = vadd.f32 %v2511_v30, %v8887_v26 }
 0x6ba   : > { %v7418_v29 = vpop.eup %5238  ;;  %v2684_v42 = vmul.f32 0.25, %v2652_v56 }
 0x6bb   : > { %2976 = vadd.xlane.f32.xlu1 %v7418_v29 }
 0x6bc   : > { %v7440_v0 = vadd.f32 %v4807_v40, %v2684_v42 }
 0x6be   : > { %v7425_v50 = vpop.eup %5240 }
 0x6bf   : > { %2982 = vadd.xlane.f32.xlu0 %v7425_v50  ;;  %2762 = vmax.xlane.f32.xlu1 %v7423_v62 }
 0x6c2   : > { %v2767_v52 = vpop.xlane.xlu1 %2766 }
 0x6c3   : > { %2796 = vmax.xlane.f32.xlu1 %v7431_v1 }
 0x6c6   : > { %v2515_v2 = vpop.permute.xlu1 %2514 }
 0x6c7   : > { %v2654_v47 = vadd.f32 %v2515_v2, %v8888_v46  ;;  %v8889_v46 = vld [vmem:[#allocation33_spill] sm:$0xff] }
 0x6c9   : > { %v2686_v43 = vmul.f32 0.25, %v2654_v47 }
 0x6d5   : > { %2506 = vrot.lane.b32.xlu0 %v2347_v3, %s5514_s29  ;;  %v7445_v3 = vadd.f32 %v4811_v41, %v2686_v43 }
 0x6e8   : > { %v2765_v44 = vpop.xlane.xlu0 %2764 }
 0x6e9   : > { %v2827_v22 = vsub.f32 %v7339_v10, %v2765_v44 }
 0x6eb   : > { %v2860_v26 = vmul.f32 1.442695, %v2827_v22 }
 0x6ec   : > { %v2801_v58 = vpop.xlane.xlu0 %2800 }
 0x6ed   : > { %v2845_v2 = vsub.f32 %v7344_v51, %v2801_v58 }
 0x6ef   : > { %v2896_v10 = vmul.f32 1.442695, %v2845_v2 }
 0x6f0   : > { %v2807_v14 = vpop.xlane.xlu0 %2806 }
 0x6f1   : > { %v2848_v18 = vsub.f32 %v7352_v16, %v2807_v14  ;;  %v2828_v16 = vsub.f32 %v7320_v53, %v2767_v52 }
 0x6f3   : > { %v2902_v32 = vmul.f32 1.442695, %v2848_v18  ;;  %v2862_v40 = vmul.f32 1.442695, %v2828_v16 }
 0x6f4   : > { %2798 = vmax.xlane.f32.xlu0 %v7440_v0 }
 0x6f5   : > { %5242 = vpow2.f32 %v2902_v32 }
 0x6f6   : > { %5244 = vpow2.f32 %v2860_v26 }
 0x6f7   : > { %v2771_v30 = vpop.xlane.xlu1 %2770  ;;  %5246 = vpow2.f32 %v2862_v40 }
 0x6f8   : > { %2802 = vmax.xlane.f32.xlu0 %v7445_v3  ;;  %5248 = vpow2.f32 %v2896_v10 }
 0x6fb   : > { %v2805_v56 = vpop.xlane.xlu1 %2804 }
 0x6fc   : > { %v2847_v44 = vsub.f32 %v7368_v9, %v2805_v56 }
 0x6fe   : > { %v2900_v52 = vmul.f32 1.442695, %v2847_v44 }
 0x6ff   : > { %v7450_v57 = vpop.eup %5242  ;;  %v2363_v42 = vpop.permute.xlu1 %2362 }
 0x700   : > { %v2658_v7 = vadd.f32 %v2363_v42, %v8889_v46  ;;  %2966 = vadd.xlane.f32.xlu1 %v7450_v57  ;;  %v7461_v47 = vpop.eup %5244  ;;  %5250 = vpow2.f32 %v2900_v52  ;;  %v2830_v42 = vsub.f32 %v7359_v38, %v2771_v30 }
 0x701   : > { %v7465_v14 = vpop.eup %5246 }
 0x702   : > { %v2690_v41 = vmul.f32 0.25, %v2658_v7  ;;  %v2833_v7 = vsub.f32 %v7154_v39, %v7240_v37  ;;  %v8891_v39 = vld [vmem:[#allocation17_spill] sm:$0xff] }
 0x704   : > { %v7458_v53 = vadd.f32 %v4819_v35, %v2690_v41  ;;  %v7469_v35 = vpop.eup %5248  ;;  %v2866_v41 = vmul.f32 1.442695, %v2830_v42  ;;  %v2872_v44 = vmul.f32 1.442695, %v2833_v7 }
 0x706   : > { %2810 = vmax.xlane.f32.xlu0 %v7458_v53 }
 0x70a   : > { %2924 = vadd.xlane.f32.xlu0 %v7461_v47  ;;  %v2815_v51 = vpop.xlane.xlu0 %2814  ;;  %v7472_v32 = vpop.eup %5250 }
 0x70b   : > { %v2852_v58 = vsub.f32 %v7376_v45, %v2815_v51 }
 0x70d   : > { %v2910_v18 = vmul.f32 1.442695, %v2852_v58 }
 0x70e   : > { %2926 = vadd.xlane.f32.xlu0 %v7465_v14  ;;  %v2819_v20 = vpop.xlane.xlu0 %2818 }
 0x70f   : > { %5252 = vpow2.f32 %v2910_v18  ;;  %v2854_v9 = vsub.f32 %v7382_v6, %v2819_v20  ;;  %v8890_v6 = vld [vmem:[#allocation4_spill] sm:$0xff] }
 0x711   : > { %v2914_v43 = vmul.f32 1.442695, %v2854_v9 }
 0x712   : > { %2960 = vadd.xlane.f32.xlu0 %v7469_v35  ;;  %v7496_v52 = vpop.xlane.xlu0 %2980 }
 0x713   : > { %5254 = vpow2.f32 %v2914_v43 }
 0x716   : > { %2964 = vadd.xlane.f32.xlu0 %v7472_v32 }
 0x719   : > { %v7475_v45 = vpop.eup %5252 }
 0x71a   : > { %2974 = vadd.xlane.f32.xlu1 %v7475_v45 }
 0x71d   : > { %v7478_v22 = vpop.eup %5254 }
 0x71e   : > { %2978 = vadd.xlane.f32.xlu1 %v7478_v22 }
 0x72f   : > { %3070 = vrot.lane.b32.xlu1 %v8890_v6, %s5514_s29 }
 0x730   : > { %v7483_v16 = vpop.xlane.xlu1 %2778 }
 0x734   : > { %v2813_v26 = vpop.xlane.xlu1 %2812 }
 0x735   : > { %v2851_v56 = vsub.f32 %v7400_v34, %v2813_v26  ;;  %v8892_v26 = vld [vmem:[#allocation2_spill] sm:$0xff] }
 0x737   : > { %v2908_v40 = vmul.f32 1.442695, %v2851_v56  ;;  %v2831_v56 = vsub.f32 %v7273_v28, %v7364_v13 }
 0x738   : > { %v7486_v2 = vpop.xlane.xlu1 %2928 }
 0x739   : > { %5256 = vpow2.f32 %v2908_v40  ;;  %v2870_v40 = vmul.f32 1.442695, %v2832_v8  ;;  %v2836_v8 = vsub.f32 %v7230_v49, %v7346_v23 }
 0x73a   : > { %5258 = vpow2.f32 %v2866_v41 }
 0x73b   : > { %5260 = vpow2.f32 %v2872_v44 }
 0x73c   : > { %v7493_v10 = vpop.xlane.xlu1 %2968 }
 0x743   : > { %v7489_v46 = vpop.eup %5256 }
 0x744   : > { %2972 = vadd.xlane.f32.xlu0 %v7489_v46  ;;  %v7504_v20 = vpop.eup %5258 }
 0x745   : > { %v7511_v6 = vpop.eup %5260 }
 0x748   : > { %v7498_v34 = vpop.xlane.xlu1 %2976 }
 0x74c   : > { %v2763_v51 = vpop.xlane.xlu1 %2762  ;;  %v7500_v58 = vpop.xlane.xlu0 %2982 }
 0x74d   : > { %v2826_v38 = vsub.f32 %v7423_v62, %v2763_v51 }
 0x74f   : > { %v2858_v30 = vmul.f32 1.442695, %v2826_v38 }
 0x750   : > { %v2507_v18 = vpop.permute.xlu0 %2506 }
 0x751   : > { %5262 = vpow2.f32 %v2858_v30  ;;  %v2650_v37 = vadd.f32 %v2507_v18, %v8891_v39  ;;  %v8893_v30 = vld [vmem:[#allocation3_spill] sm:$0xff]  ;;  %v2797_v18 = vpop.xlane.xlu1 %2796 }
 0x752   : > { %v2843_v39 = vsub.f32 %v7431_v1, %v2797_v18  ;;  %v2834_v1 = vsub.f32 %v7395_v21, %v7483_v16 }
 0x753   : > { %v2682_v9 = vmul.f32 0.25, %v2650_v37  ;;  %2930 = vadd.xlane.f32.xlu1 %v7504_v20  ;;  %v8894_v37 = vld [vmem:[#allocation6_spill] sm:$0xff] }
 0x755   : > { %v7509_v43 = vadd.f32 %v4803_v24, %v2682_v9  ;;  %v2868_v24 = vmul.f32 1.442695, %v2831_v56  ;;  %v2892_v9 = vmul.f32 1.442695, %v2843_v39 }
 0x757   : > { %2936 = vadd.xlane.f32.xlu1 %v7511_v6  ;;  %2794 = vmax.xlane.f32.xlu0 %v7509_v43  ;;  %5264 = vpow2.f32 %v2868_v24 }
 0x758   : > { %5266 = vpow2.f32 %v2870_v40  ;;  %v2878_v40 = vmul.f32 1.442695, %v2836_v8 }
 0x75b   : > { %v7515_v62 = vpop.eup %5262 }
 0x75c   : > { %2922 = vadd.xlane.f32.xlu1 %v7515_v62 }
 0x761   : > { %v7525_v51 = vpop.eup %5264 }
 0x762   : > { %v7528_v38 = vpop.eup %5266 }
 0x76d   : > { %3068 = vrot.lane.b32.xlu0 %v8892_v26, %s5514_s29  ;;  %v2835_v26 = vsub.f32 %v7301_v19, %v7403_v4  ;;  %v2837_v19 = vsub.f32 %v7186_v60, %v7248_v17  ;;  %v2874_v4 = vmul.f32 1.442695, %v2834_v1 }
 0x76f   : > { %v2876_v24 = vmul.f32 1.442695, %v2835_v26 }
 0x781   : > { %v2799_v42 = vpop.xlane.xlu0 %2798 }
 0x785   : > { %v2803_v7 = vpop.xlane.xlu0 %2802 }
 0x786   : > { %v2846_v41 = vsub.f32 %v7445_v3, %v2803_v7 }
 0x788   : > { %v2898_v44 = vmul.f32 1.442695, %v2846_v41  ;;  %v2880_v41 = vmul.f32 1.442695, %v2837_v19 }
 0x78a   : > { %5268 = vpow2.f32 %v2898_v44 }
 0x78c   : > { %2932 = vadd.xlane.f32.xlu0 %v7525_v51 }
 0x790   : > { %2934 = vadd.xlane.f32.xlu0 %v7528_v38 }
 0x793   : > { %v2811_v28 = vpop.xlane.xlu0 %2810 }
 0x794   : > { %v7531_v25 = vpop.eup %5268  ;;  %v2850_v63 = vsub.f32 %v7458_v53, %v2811_v28  ;;  %v2844_v53 = vsub.f32 %v7440_v0, %v2799_v42  ;;  %v7560_v42 = vpop.xlane.xlu1 %2966 }
 0x795   : > { %2962 = vadd.xlane.f32.xlu1 %v7531_v25 }
 0x796   : > { %v2906_v13 = vmul.f32 1.442695, %v2850_v63  ;;  %v2894_v56 = vmul.f32 1.442695, %v2844_v53 }
 0x797   : > { %v2925_v49 = vpop.xlane.xlu0 %2924 }
 0x798   : > { %5270 = vpow2.f32 %v2906_v13 }
 0x799   : > { %5272 = vpow2.f32 %v2892_v9 }
 0x79a   : > { %5274 = vpow2.f32 %v2894_v56 }
 0x79b   : > { %5276 = vpow2.f32 %v2876_v24  ;;  %v7565_v16 = vpop.xlane.xlu0 %2926  ;;  %v8895_v24 = vld [vmem:[#allocation8_spill] sm:$0xff] }
 0x79c   : > { %5278 = vpow2.f32 %v2878_v40 }
 0x79d   : > { %5280 = vpow2.f32 %v2874_v4 }
 0x79e   : > { %5282 = vpow2.f32 %v2880_v41  ;;  %v2838_v41 = vsub.f32 %v7257_v12, %v7361_v33  ;;  %v2840_v12 = vsub.f32 %v7171_v11, %v7316_v59 }
 0x79f   : > { %v7570_v60 = vpop.xlane.xlu0 %2960  ;;  %5284 = vrcp.f32 %v2925_v49 }
 0x7a2   : > { %v7535_v3 = vpop.eup %5270 }
 0x7a3   : > { %2970 = vadd.xlane.f32.xlu1 %v7535_v3  ;;  %v7548_v7 = vpop.eup %5272  ;;  %v7579_v13 = vpop.xlane.xlu0 %2964 }
 0x7a4   : > { %v7553_v0 = vpop.eup %5274 }
 0x7a5   : > { %v7558_v23 = vpop.eup %5276 }
 0x7a6   : > { %3072 = vrot.lane.b32.xlu0 %v8893_v30, %s5514_s29  ;;  %v7563_v21 = vpop.eup %5278 }
 0x7a7   : > { %v7567_v44 = vpop.xlane.xlu1 %2974  ;;  %v7574_v28 = vpop.eup %5280 }
 0x7a8   : > { %v7577_v63 = vpop.eup %5282 }
 0x7a9   : > { %v5285_v40 = vpop.eup %5284 }
 0x7aa   : > { %v3019_v4 = vmul.f32 %v5285_v40, %v7461_v47 }
 0x7ab   : > { %v7572_v17 = vpop.xlane.xlu1 %2978 }
 0x7af   : > { %v3071_v30 = vpop.permute.xlu1 %3070 }
 0x7b4   : > { %3074 = vrot.lane.b32.xlu1 %v8894_v37, %s5514_s29 }
 0x7c5   : > { %2956 = vadd.xlane.f32.xlu0 %v7548_v7 }
 0x7c9   : > { %2958 = vadd.xlane.f32.xlu0 %v7553_v0 }
 0x7cd   : > { %2940 = vadd.xlane.f32.xlu0 %v7558_v23 }
 0x7d1   : > { %2942 = vadd.xlane.f32.xlu0 %v7563_v21  ;;  %v7582_v18 = vpop.xlane.xlu0 %2972 }
 0x7d8   : > { %2938 = vadd.xlane.f32.xlu1 %v7574_v28 }
 0x7dc   : > { %2944 = vadd.xlane.f32.xlu1 %v7577_v63 }
 0x7e0   : > { %v2931_v39 = vpop.xlane.xlu1 %2930 }
 0x7e4   : > { %v2937_v37 = vpop.xlane.xlu1 %2936  ;;  %v2795_v9 = vpop.xlane.xlu0 %2794 }
 0x7e5   : > { %v2842_v53 = vsub.f32 %v7509_v43, %v2795_v9  ;;  %v2841_v9 = vsub.f32 %v7085_v36, %v7180_v61 }
 0x7e7   : > { %v2890_v26 = vmul.f32 1.442695, %v2842_v53  ;;  %v2882_v53 = vmul.f32 1.442695, %v2838_v41 }
 0x7e8   : > { %v3069_v56 = vpop.permute.xlu0 %3068 }
 0x7e9   : > { %5286 = vpow2.f32 %v2890_v26  ;;  %v2923_v8 = vpop.xlane.xlu1 %2922  ;;  %5000 = vmatprep.subr.bf16.mxu1 %v3069_v56  ;;  %v8896_v26 = vld [vmem:[#allocation5_spill] sm:$0xff] }
 0x7ea   : > { %5288 = vrcp.f32 %v2923_v8  ;;  %5001 = vmatpush3.bf16.msra.mxu1 %v3069_v56  ;;  %v2886_v8 = vmul.f32 1.442695, %v2840_v12 }
 0x7eb   : > { %5002 = vmatprep.subr.bf16.mxu1 %v3071_v30  ;;  %5290 = vpow2.f32 %v2882_v53  ;;  %v8897_v53 = vld [vmem:[#allocation7_spill] sm:$0xff] }
 0x7ed   : > { %3078 = vrot.lane.b32.xlu1 %v8895_v24, %s5514_s29 }
 0x7ee   : > { %5003 = vmatpush3.bf16.msra.mxu1 %v3071_v30  ;;  %v2888_v30 = vmul.f32 1.442695, %v2841_v9 }
 0x7f0   : > { %5292 = vpow2.f32 %v2888_v30 }
 0x7f1   : > { %5294 = vrcp.f32 %v2931_v39 }
 0x7f3   : > { %v7587_v1 = vpop.eup %5286 }
 0x7f4   : > { %v5289_v19 = vpop.eup %5288  ;;  %2954 = vadd.xlane.f32.xlu0 %v7587_v1 }
 0x7f5   : > { %v3018_v43 = vmul.f32 %v5289_v19, %v7515_v62  ;;  %v7598_v56 = vpop.eup %5290  ;;  %v2839_v62 = vsub.f32 %v7214_v54, %v7281_v5 }
 0x7f7   : > { %v3050_v49 = vpack.c.bf16 %v3019_v4, %v3018_v43  ;;  %v2884_v36 = vmul.f32 1.442695, %v2839_v62 }
 0x7f9   : > { %5014 = vmatprep.mubr.bf16.mxu1 %v3050_v49 }
 0x7fa   : > { %v7601_v47 = vpop.eup %5292 }
 0x7fb   : > { %v5295_v40 = vpop.eup %5294 }
 0x7fc   : > { %v7609_v5 = vmul.f32 %v5295_v40, %v7504_v20 }
 0x80a   : > { %3076 = vrot.lane.b32.xlu0 %v8896_v26, %s5514_s29 }
 0x811   : > { %2946 = vadd.xlane.f32.xlu1 %v7598_v56 }
 0x815   : > { %2952 = vadd.xlane.f32.xlu1 %v7601_v47 }
 0x819   : > { %v2933_v61 = vpop.xlane.xlu0 %2932 }
 0x81a   : > { %5296 = vrcp.f32 %v2933_v61 }
 0x81b   : > { %5298 = vrcp.f32 %v2937_v37 }
 0x81c   : > { %5300 = vpow2.f32 %v2884_v36 }
 0x81d   : > { %v2935_v33 = vpop.xlane.xlu0 %2934 }
 0x81e   : > { %5302 = vrcp.f32 %v2935_v33 }
 0x81f   : > { %5304 = vpow2.f32 %v2886_v8 }
 0x821   : > { %v3073_v24 = vpop.permute.xlu0 %3072 }
 0x822   : > { %5004 = vmatprep.subr.bf16.mxu1 %v3073_v24  ;;  %v2963_v49 = vpop.xlane.xlu1 %2962 }
 0x823   : > { %5005 = vmatpush3.bf16.msra.mxu1 %v3073_v24 }
 0x824   : > { %v5297_v54 = vpop.eup %5296 }
 0x825   : > { %v7612_v39 = vmul.f32 %v5297_v54, %v7525_v51  ;;  %v5299_v19 = vpop.eup %5298 }
 0x826   : > { %v7614_v11 = vpop.eup %5300  ;;  %v7623_v4 = vmul.f32 %v5299_v19, %v7511_v6 }
 0x827   : > { %v3052_v59 = vpack.c.bf16 %v7612_v39, %v7609_v5 }
 0x828   : > { %v5303_v37 = vpop.eup %5302 }
 0x829   : > { %2948 = vadd.xlane.f32.xlu0 %v7614_v11  ;;  %v7620_v43 = vmul.f32 %v5303_v37, %v7528_v38  ;;  %v7627_v51 = vpop.eup %5304 }
 0x82b   : > { %v3053_v20 = vpack.c.bf16 %v7623_v4, %v7620_v43 }
 0x82d   : > { %2950 = vadd.xlane.f32.xlu0 %v7627_v51 }
 0x830   : > { %v2971_v41 = vpop.xlane.xlu1 %2970 }
 0x834   : > { %v3075_v9 = vpop.permute.xlu1 %3074 }
 0x835   : > { %5006 = vmatprep.subr.bf16.mxu1 %v3075_v9 }
 0x836   : > { %5007 = vmatpush3.bf16.msra.mxu1 %v3075_v9 }
 0x843   : > { %3080 = vrot.lane.b32.xlu0 %v8897_v53, %s5514_s29 }
 0x852   : > { %v2957_v38 = vpop.xlane.xlu0 %2956 }
 0x856   : > { %v2959_v30 = vpop.xlane.xlu0 %2958 }
 0x85a   : > { %v7632_v26 = vpop.xlane.xlu0 %2940 }
 0x85e   : > { %v2943_v6 = vpop.xlane.xlu0 %2942 }
 0x85f   : > { %5306 = vrcp.f32 %v2943_v6 }
 0x865   : > { %v7634_v62 = vpop.xlane.xlu1 %2938 }
 0x869   : > { %v2945_v36 = vpop.xlane.xlu1 %2944  ;;  %v5307_v61 = vpop.eup %5306 }
 0x86a   : > { %5308 = vrcp.f32 %v2945_v36  ;;  %v7637_v33 = vmul.f32 %v5307_v61, %v7563_v21 }
 0x86b   : > { %5310 = vrcp.f32 %v7570_v60 }
 0x86c   : > { %5312 = vrcp.f32 %v2963_v49 }
 0x86d   : > { %5314 = vrcp.f32 %v2959_v30  ;;  %v3079_v21 = vpop.permute.xlu1 %3078 }
 0x86e   : > { %5316 = vrcp.f32 %v2957_v38 }
 0x86f   : > { %5318 = vrcp.f32 %v7579_v13 }
 0x874   : > { %v5309_v12 = vpop.eup %5308 }
 0x875   : > { %v7640_v8 = vmul.f32 %v5309_v12, %v7577_v63  ;;  %v5311_v19 = vpop.eup %5310 }
 0x876   : > { %v5313_v63 = vpop.eup %5312 }
 0x877   : > { %v3055_v24 = vpack.c.bf16 %v7640_v8, %v7637_v33  ;;  %v5315_v37 = vpop.eup %5314  ;;  %v3038_v38 = vmul.f32 %v5313_v63, %v7531_v25 }
 0x878   : > { %v5317_v60 = vpop.eup %5316  ;;  %v3036_v9 = vmul.f32 %v5315_v37, %v7553_v0 }
 0x879   : > { %v5319_v49 = vpop.eup %5318 }
 0x881   : > { %v2955_v40 = vpop.xlane.xlu0 %2954 }
 0x882   : > { %5320 = vrcp.f32 %v2955_v40 }
 0x883   : > { %5322 = vrcp.f32 %v7560_v42  ;;  %v3035_v42 = vmul.f32 %v5317_v60, %v7548_v7 }
 0x884   : > { %5324 = vrcp.f32 %v2971_v41  ;;  %v3037_v41 = vmul.f32 %v5311_v19, %v7469_v35 }
 0x885   : > { %v3077_v54 = vpop.permute.xlu0 %3076  ;;  %5326 = vrcp.f32 %v7493_v10  ;;  %v3039_v10 = vmul.f32 %v5319_v49, %v7472_v32 }
 0x886   : > { %5008 = vmatprep.subr.bf16.mxu1 %v3077_v54  ;;  %5328 = vrcp.f32 %v7582_v18  ;;  %v3059_v18 = vpack.c.bf16 %v3037_v41, %v3036_v9 }
 0x887   : > { %5009 = vmatpush3.bf16.msra.mxu1 %v3077_v54  ;;  %5330 = vrcp.f32 %v7567_v44  ;;  %v3060_v0 = vpack.c.bf16 %v3039_v10, %v3038_v38 }
 0x888   : > { %5010 = vmatprep.subr.bf16.mxu1 %v3079_v21  ;;  %5332 = vrcp.f32 %v7572_v17 }
 0x889   : > { %5334 = vrcp.f32 %v7498_v34 }
 0x88a   : > { %5336 = vrcp.f32 %v7496_v52 }
 0x88b   : > { %5011 = vmatpush3.bf16.msra.mxu1 %v3079_v21  ;;  %5338 = vrcp.f32 %v7500_v58 }
 0x88c   : > { %v5321_v13 = vpop.eup %5320  ;;  %5340 = vrcp.f32 %v7407_v55 }
 0x88d   : > { %v3034_v53 = vmul.f32 %v5321_v13, %v7587_v1  ;;  %v5323_v6 = vpop.eup %5322  ;;  %5342 = vrcp.f32 %v7565_v16 }
 0x88e   : > { %v5325_v1 = vpop.eup %5324  ;;  %v3040_v7 = vmul.f32 %v5323_v6, %v7450_v57  ;;  %5344 = vrcp.f32 %v7486_v2 }
 0x88f   : > { %v3058_v30 = vpack.c.bf16 %v3035_v42, %v3034_v53  ;;  %v5327_v25 = vpop.eup %5326  ;;  %v3042_v44 = vmul.f32 %v5325_v1, %v7535_v3  ;;  %5346 = vrcp.f32 %v7634_v62 }
 0x890   : > { %v5329_v35 = vpop.eup %5328  ;;  %v3041_v32 = vmul.f32 %v5327_v25, %v7411_v48  ;;  %5348 = vrcp.f32 %v7632_v26 }
 0x891   : > { %5046 = vmatprep.mubr.bf16.mxu0 %v3058_v30  ;;  %v3043_v17 = vmul.f32 %v5329_v35, %v7489_v46  ;;  %v5331_v36 = vpop.eup %5330 }
 0x892   : > { %5047 = vmatmul.mubr.bf16.vlgmr.msra.gmra.mrb[48].mxu0 %v3059_v18  ;;  %v3061_v34 = vpack.c.bf16 %v3041_v32, %v3040_v7  ;;  %v5333_v52 = vpop.eup %5332  ;;  %v3044_v57 = vmul.f32 %v5331_v36, %v7475_v45 }
 0x893   : > { %5050 = vmatprep.mubr.bf16.mxu0 %v3060_v0  ;;  %v3062_v61 = vpack.c.bf16 %v3043_v17, %v3042_v44  ;;  %v5335_v12 = vpop.eup %5334  ;;  %v3046_v3 = vmul.f32 %v5333_v52, %v7478_v22 }
 0x894   : > { %v5337_v40 = vpop.eup %5336  ;;  %v3045_v48 = vmul.f32 %v5335_v12, %v7418_v29 }
 0x895   : > { %v3047_v58 = vmul.f32 %v5337_v40, %v7385_v31  ;;  %v5339_v46 = vpop.eup %5338 }
 0x896   : > { %v3063_v54 = vpack.c.bf16 %v3045_v48, %v3044_v57  ;;  %v5341_v21 = vpop.eup %5340  ;;  %v3048_v55 = vmul.f32 %v5339_v46, %v7425_v50 }
 0x897   : > { %v3064_v19 = vpack.c.bf16 %v3047_v58, %v3046_v3  ;;  %v3049_v63 = vmul.f32 %v5341_v21, %v7284_v15  ;;  %v5343_v31 = vpop.eup %5342 }
 0x898   : > { %v5345_v22 = vpop.eup %5344  ;;  %v3020_v60 = vmul.f32 %v5343_v31, %v7465_v14 }
 0x899   : > { %v3065_v37 = vpack.c.bf16 %v3049_v63, %v3048_v55  ;;  %v3021_v50 = vmul.f32 %v5345_v22, %v7405_v27  ;;  %v5347_v13 = vpop.eup %5346 }
 0x89a   : > { %5051 = vmatmul.mubr.bf16.gmra.mrb[52].mxu0 %v3061_v34  ;;  %v5349_v2 = vpop.eup %5348  ;;  %v3026_v26 = vmul.f32 %v5347_v13, %v7574_v28 }
 0x89b   : > { %5054 = vmatprep.mubr.bf16.mxu0 %v3062_v61  ;;  %v3051_v16 = vpack.c.bf16 %v3021_v50, %v3020_v60  ;;  %v3027_v14 = vmul.f32 %v5349_v2, %v7558_v23 }
 0x89d   : > { %v3054_v27 = vpack.c.bf16 %v3027_v14, %v3026_v26 }
 0x89e   : > { %v2947_v15 = vpop.xlane.xlu1 %2946 }
 0x8a2   : > { %5055 = vmatmul.mubr.bf16.gmra.mrb[56].mxu0 %v3063_v54  ;;  %v2953_v62 = vpop.xlane.xlu1 %2952 }
 0x8a3   : > { %5058 = vmatprep.mubr.bf16.mxu0 %v3064_v19 }
 0x8aa   : > { %5059 = vmatmul.mubr.bf16.gmra.mrb[60].mxu0 %v3065_v37 }
 0x8b6   : > { %v2949_v45 = vpop.xlane.xlu0 %2948 }
 0x8b7   : > { %5350 = vrcp.f32 %v2949_v45 }
 0x8b8   : > { %5352 = vrcp.f32 %v2947_v15 }
 0x8ba   : > { %v2951_v29 = vpop.xlane.xlu0 %2950 }
 0x8bb   : > { %5354 = vrcp.f32 %v2951_v29 }
 0x8bc   : > { %5356 = vrcp.f32 %v2953_v62 }
 0x8be   : > { %v3081_v49 = vpop.permute.xlu0 %3080 }
 0x8bf   : > { %5012 = vmatprep.subr.bf16.mxu1 %v3081_v49 }
 0x8c0   : > { %5013 = vmatpush3.bf16.msra.mxu1 %v3081_v49 }
 0x8c1   : > { %v5351_v9 = vpop.eup %5350 }
 0x8c2   : > { %v5353_v53 = vpop.eup %5352  ;;  %v3031_v42 = vmul.f32 %v5351_v9, %v7614_v11  ;;  %v5222_v11 = vld [vmem:[%s8652_s6] sm:$0xff]  }
 0x8c3   : > { %5015 = vmatmul.mubr.bf16.vlgmr.msra.gmra.mrb[32].mxu1 %v3051_v16  ;;  %v3030_v5 = vmul.f32 %v5353_v53, %v7598_v56  ;;  %v5223_v56 = vld [vmem:[%s8652_s6 + $0x8] sm:$0xff]   ;;  %5062 = vmatprep.subr.bf16.mxu0 %v5222_v11 }
 0x8c4   : > { %5018 = vmatprep.mubr.bf16.mxu1 %v3052_v59  ;;  %5126 = vmatprep.subr.bf16.mxu1 %v5222_v11 }
 0x8c5   : > { %v5355_v39 = vpop.eup %5354  ;;  %v3056_v59 = vpack.c.bf16 %v3031_v42, %v3030_v5  ;;  %5063 = vmatpush3.bf16.msra.mxu0 %v5222_v11  ;;  %5128 = vmatpush3.bf16.msra.mxu1 %v5222_v11 }
 0x8c6   : > { %v5357_v23 = vpop.eup %5356  ;;  %v3032_v28 = vmul.f32 %v5355_v39, %v7627_v51  ;;  %5064 = vmatprep.subr.bf16.mxu0 %v5223_v56  ;;  %5127 = vmatprep.subr.bf16.mxu1 %v5223_v56 }
 0x8c7   : > { %v3033_v38 = vmul.f32 %v5357_v23, %v7601_v47 }
 0x8c9   : > { %v3057_v43 = vpack.c.bf16 %v3033_v38, %v3032_v28  ;;  %5065 = vmatpush3.bf16.msra.mxu0 %v5223_v56  ;;  %5129 = vmatpush3.bf16.msra.mxu1 %v5223_v56 }
 0x8cb   : > { %5019 = vmatmul.mubr.bf16.gmra.mrb[36].mxu1 %v3053_v20 }
 0x8cc   : > { %5022 = vmatprep.mubr.bf16.mxu1 %v3054_v27 }
 0x8d3   : > { %5023 = vmatmul.mubr.bf16.gmra.mrb[40].mxu1 %v3055_v24 }
 0x8d4   : > { %5026 = vmatprep.mubr.bf16.mxu1 %v3056_v59 }
 0x8db   : > { %5027 = vmatmul.mubr.bf16.gmra.mrb[44].mxu1 %v3057_v43 }
 0x965   : > { %v5048_v4 = vpop.f32.mrb[48].mxu0 }
 0x966   : > { %v3245_v47 = vpop.f32.mrb[49].mxu0 }
 0x967   : > { %v5049_v20 = vpop.f32.mrb[50].mxu0 }
 0x968   : > { %v5169_v51 = vpack.i.bf16 %v5049_v20, %v5048_v4  ;;  %v3248_v33 = vpop.f32.mrb[51].mxu0 }
 0x969   : > { %v5164_v8 = vpack.i.bf16 %v3248_v33, %v3245_v47 }
 0x96b   : > { %5165 = vrot.lane.b32.xlu1 %v5164_v8, %s5519_s20 }
 0x96d   : > { %v5052_v24 = vpop.f32.mrb[52].mxu0 }
 0x96e   : > { %v3261_v41 = vpop.f32.mrb[53].mxu0 }
 0x96f   : > { %5170 = vrot.lane.b32.xlu1 %v5169_v51, %s5519_s20  ;;  %v5053_v30 = vpop.f32.mrb[54].mxu0 }
 0x970   : > { %v5179_v10 = vpack.i.bf16 %v5053_v30, %v5052_v24  ;;  %v3264_v18 = vpop.f32.mrb[55].mxu0 }
 0x971   : > { %v5174_v6 = vpack.i.bf16 %v3264_v18, %v3261_v41 }
 0x973   : > { %5180 = vrot.lane.b32.xlu1 %v5179_v10, %s5519_s20  ;;  %5175 = vrot.lane.b32.xlu0 %v5174_v6, %s5519_s20 }
 0x975   : > { %v5056_v0 = vpop.f32.mrb[56].mxu0 }
 0x976   : > { %v3277_v1 = vpop.f32.mrb[57].mxu0 }
 0x977   : > { %v5057_v25 = vpop.f32.mrb[58].mxu0 }
 0x978   : > { %v5189_v35 = vpack.i.bf16 %v5057_v25, %v5056_v0  ;;  %v3280_v7 = vpop.f32.mrb[59].mxu0 }
 0x979   : > { %v5184_v44 = vpack.i.bf16 %v3280_v7, %v3277_v1 }
 0x97a   : > { %5190 = vrot.lane.b32.xlu1 %v5189_v35, %s5519_s20 }
 0x97b   : > { %5185 = vrot.lane.b32.xlu0 %v5184_v44, %s5519_s20 }
 0x97d   : > { %v5060_v32 = vpop.f32.mrb[60].mxu0 }
 0x97e   : > { %v3293_v17 = vpop.f32.mrb[61].mxu0 }
 0x97f   : > { %v5061_v34 = vpop.f32.mrb[62].mxu0 }
 0x980   : > { %v5199_v36 = vpack.i.bf16 %v5061_v34, %v5060_v32  ;;  %v3296_v61 = vpop.f32.mrb[63].mxu0 }
 0x981   : > { %v5194_v52 = vpack.i.bf16 %v3296_v61, %v3293_v17 }
 0x982   : > { %5200 = vrot.lane.b32.xlu1 %v5199_v36, %s5519_s20 }
 0x983   : > { %5195 = vrot.lane.b32.xlu0 %v5194_v52, %s5519_s20 }
 0x996   : > { %v5016_v12 = vpop.f32.mrb[32].mxu1 }
 0x997   : > { %v3124_v40 = vpop.f32.mrb[33].mxu1 }
 0x998   : > { %v5017_v57 = vpop.f32.mrb[34].mxu1 }
 0x999   : > { %v3127_v3 = vpop.f32.mrb[35].mxu1 }
 0x99e   : > { %v5020_v48 = vpop.f32.mrb[36].mxu1 }
 0x99f   : > { %v3140_v58 = vpop.f32.mrb[37].mxu1 }
 0x9a0   : > { %v5021_v54 = vpop.f32.mrb[38].mxu1 }
 0x9a1   : > { %v3143_v46 = vpop.f32.mrb[39].mxu1 }
 0x9a6   : > { %v5024_v19 = vpop.f32.mrb[40].mxu1 }
 0x9a7   : > { %v3156_v21 = vpop.f32.mrb[41].mxu1 }
 0x9a8   : > { %v5025_v55 = vpop.f32.mrb[42].mxu1 }
 0x9a9   : > { %v3159_v63 = vpop.f32.mrb[43].mxu1 }
 0x9ae   : > { %v5028_v37 = vpop.f32.mrb[44].mxu1 }
 0x9af   : > { %v3172_v45 = vpop.f32.mrb[45].mxu1 }
 0x9b0   : > { %v5029_v31 = vpop.f32.mrb[46].mxu1 }
 0x9b1   : > { %v3175_v29 = vpop.f32.mrb[47].mxu1 }
 0x9dd   : > { %v5166_v22 = vpop.permute.xlu1 %5165 }
 0x9de   : > { %v5168_v60 = vunpack.i.h.bf16 %v5166_v22  ;;  %v5167_v49 = vunpack.i.l.bf16 %v5166_v22 }
 0x9e0   : > { %v3372_v50 = vsel %vm8898_vm14, %v3124_v40, %v5167_v49  ;;  %v3373_v15 = vsel %vm8899_vm1, %v3127_v3, %v5168_v60  ;;  %vm8914_vm14 = vmmov %vm8900_vm0  ;;  %v5490_v60 = vld [vmem:[%s5632_s21 + $0x20] sm:$0xff] }
 0x9e1   : > { %v3388_v16 = vpack.c.bf16 %v3373_v15, %v3372_v50  ;;  %v5171_v13 = vpop.permute.xlu1 %5170  ;;  %vm8915_vm1 = vmmov %vm8900_vm0 }
 0x9e2   : > { %v5173_v2 = vunpack.i.h.bf16 %v5171_v13  ;;  %v5172_v26 = vunpack.i.l.bf16 %v5171_v13 }
 0x9e3   : > { %5066 = vmatprep.mubr.msk.bf16.mxu0 %vm8900_vm0, %v3388_v16  ;;  %vm8916_vm0 = vmmov %vm8901_vm2  ;;  %v5491_v16 = vld [vmem:[%s5632_s21 + $0x30] sm:$0xff] }
 0x9e4   : > { %v3374_v62 = vsel %vm8901_vm2, %v5016_v12, %v5172_v26  ;;  %v3375_v14 = vsel %vm8902_vm3, %v5017_v57, %v5173_v2  ;;  %vm8917_vm2 = vmmov %vm8916_vm0  ;;  %v5486_v57 = vld [vmem:[%s5632_s21] sm:$0xff]  ;;  %v5492_v2 = vld [vmem:[%s5632_s21 + $0x28] sm:$0xff] }
 0x9e5   : > { %v3389_v27 = vpack.c.bf16 %v3375_v14, %v3374_v62  ;;  %v5181_v9 = vpop.permute.xlu1 %5180  ;;  %v5176_v53 = vpop.permute.xlu0 %5175  ;;  %vm8918_vm3 = vmmov %vm8916_vm0 }
 0x9e6   : > { %v5183_v42 = vunpack.i.h.bf16 %v5181_v9  ;;  %v5182_v5 = vunpack.i.l.bf16 %v5181_v9  ;;  %v5178_v39 = vunpack.i.h.bf16 %v5176_v53  ;;  %v5177_v59 = vunpack.i.l.bf16 %v5176_v53 }
 0x9e7   : > { %5067 = vmatmul.mubr.msk.bf16.vlgmr.msra.gmra.mrb[64].mxu0 %vm8903_vm4, %v3389_v27  ;;  %vm8919_vm4 = vmmov %vm8916_vm0 }
 0x9e8   : > { %v3378_v23 = vsel %vm8904_vm5, %v5020_v48, %v5182_v5  ;;  %v3379_v28 = vsel %vm8905_vm6, %v5021_v54, %v5183_v42  ;;  %v3377_v38 = vsel %vm8906_vm7, %v3143_v46, %v5178_v39  ;;  %v3376_v43 = vsel %vm8907_vm8, %v3140_v58, %v5177_v59  ;;  %vm8920_vm5 = vmmov %vm8915_vm1  ;;  %v5487_v54 = vld [vmem:[%s5632_s21 + $0x10] sm:$0xff]  ;;  %v5493_v42 = vld [vmem:[%s5632_s21 + $0x38] sm:$0xff] }
 0x9e9   : > { %v3391_v11 = vpack.c.bf16 %v3379_v28, %v3378_v23  ;;  %v3390_v56 = vpack.c.bf16 %v3377_v38, %v3376_v43  ;;  %vm8921_vm6 = vmmov %vm8915_vm1  ;;  %v5494_v39 = vld [vmem:[%s5632_s21 + $0x40] sm:$0xff]  ;;  %v5495_v43 = vld [vmem:[%s5632_s21 + $0x50] sm:$0xff] }
 0x9ea   : > { %vm8922_vm7 = vmmov %vm8915_vm1 }
 0x9eb   : > { %5070 = vmatprep.mubr.msk.bf16.mxu0 %vm8908_vm9, %v3390_v56  ;;  %vm8923_vm8 = vmmov %vm8915_vm1  ;;  %v5496_v56 = vld [vmem:[%s5632_s21 + $0x48] sm:$0xff] }
 0x9ec   : > { %v5191_v4 = vpop.permute.xlu1 %5190  ;;  %vm8924_vm9 = vmmov %vm8915_vm1 }
 0x9ed   : > { %v5193_v47 = vunpack.i.h.bf16 %v5191_v4  ;;  %v5192_v20 = vunpack.i.l.bf16 %v5191_v4  ;;  %v5186_v51 = vpop.permute.xlu0 %5185 }
 0x9ee   : > { %v5188_v33 = vunpack.i.h.bf16 %v5186_v51  ;;  %v5187_v8 = vunpack.i.l.bf16 %v5186_v51 }
 0x9ef   : > { %v3382_v24 = vsel %vm8909_vm10, %v5024_v19, %v5192_v20  ;;  %v3383_v41 = vsel %vm8910_vm12, %v5025_v55, %v5193_v47  ;;  %5071 = vmatmul.mubr.msk.bf16.gmra.mrb[68].mxu0 %vm8911_vm15, %v3391_v11  ;;  %v5488_v19 = vld [vmem:[%s5632_s21 + $0x8] sm:$0xff]  ;;  %vm8925_vm10 = vmmov %vm8915_vm1 }
 0x9f0   : > { %v3393_v30 = vpack.c.bf16 %v3383_v41, %v3382_v24  ;;  %v3381_v10 = vsel %vm8912_vm11, %v3159_v63, %v5188_v33  ;;  %v3380_v18 = vsel %vm8913_vm13, %v3156_v21, %v5187_v8  ;;  %vm8926_vm12 = vmmov %vm8915_vm1  ;;  %v5497_v24 = vld [vmem:[%s5632_s21 + $0x58] sm:$0xff] }
 0x9f1   : > { %v3392_v6 = vpack.c.bf16 %v3381_v10, %v3380_v18  ;;  %vm8927_vm15 = vmmov %vm8915_vm1 }
 0x9f2   : > { %vm8928_vm11 = vmmov %vm8915_vm1 }
 0x9f3   : > { %5074 = vmatprep.mubr.msk.bf16.mxu1 %vm8914_vm14, %v3392_v6  ;;  %vm8929_vm13 = vmmov %vm8915_vm1 }
 0x9f4   : > { %v5201_v0 = vpop.permute.xlu1 %5200  ;;  %5075 = vmatmul.mubr.msk.bf16.vlgmr.msra.gmra.mrb[48].mxu1 %vm8915_vm1, %v3393_v30  ;;  %vm8930_vm14 = vmmov %vm8915_vm1  ;;  %v5498_v30 = vld [vmem:[%s5632_s21 + $0x60] sm:$0xff] }
 0x9f5   : > { %v5203_v1 = vunpack.i.h.bf16 %v5201_v0  ;;  %v5202_v25 = vunpack.i.l.bf16 %v5201_v0  ;;  %v5196_v35 = vpop.permute.xlu0 %5195 }
 0x9f6   : > { %v5198_v7 = vunpack.i.h.bf16 %v5196_v35  ;;  %v5197_v44 = vunpack.i.l.bf16 %v5196_v35  ;;  %v5500_v35 = vld [vmem:[%s5632_s21 + $0x68] sm:$0xff] }
 0x9f7   : > { %v3386_v32 = vsel %vm8916_vm0, %v5028_v37, %v5202_v25  ;;  %v3387_v17 = vsel %vm8917_vm2, %v5029_v31, %v5203_v1  ;;  %v5489_v37 = vld [vmem:[%s5632_s21 + $0x18] sm:$0xff]  ;;  %vm8931_vm0 = vmmov %vm8915_vm1  ;;  %v5499_v1 = vld [vmem:[%s5632_s21 + $0x70] sm:$0xff] }
 0x9f8   : > { %v3395_v34 = vpack.c.bf16 %v3387_v17, %v3386_v32  ;;  %v3385_v36 = vsel %vm8918_vm3, %v3175_v29, %v5198_v7  ;;  %v3384_v61 = vsel %vm8919_vm4, %v3172_v45, %v5197_v44  ;;  %vm8932_vm2 = vmmov %vm8931_vm0  ;;  %v5501_v17 = vld [vmem:[%s5632_s21 + $0x78] sm:$0xff] }
 0x9f9   : > { %v3394_v52 = vpack.c.bf16 %v3385_v36, %v3384_v61  ;;  %vm8933_vm3 = vmmov %vm8931_vm0 }
 0x9fa   : > { %vm8934_vm4 = vmmov %vm8931_vm0 }
 0x9fb   : > { %5078 = vmatprep.mubr.msk.bf16.mxu1 %vm8920_vm5, %v3394_v52  ;;  %vm8935_vm5 = vmmov %vm8931_vm0 }
 0x9fc   : > { %5079 = vmatmul.mubr.msk.bf16.gmra.mrb[52].mxu1 %vm8921_vm6, %v3395_v34  ;;  %vm8936_vm6 = vmmov %vm8931_vm0 }
 0xaba   : > { %v5068_v12 = vpop.f32.mrb[64].mxu0 }
 0xabb   : > { %v3470_v40 = vpop.f32.mrb[65].mxu0  ;;  %v7726_v46 = vadd.f32 %v5487_v54, %v5068_v12 }
 0xabc   : > { %v7723_v3 = vadd.f32 %v5486_v57, %v3470_v40  ;;  %v5069_v48 = vpop.f32.mrb[66].mxu0 }
 0xabd   : > { %v3473_v58 = vpop.f32.mrb[67].mxu0  ;;  %v7736_v45 = vadd.f32 %v5489_v37, %v5069_v48  ;;  %v3557_v29 = vsel %vm8924_vm9, %v7726_v46, 0.0  ;;  %vm8939_vm9 = vmmov %vm8931_vm0 }
 0xabe   : > { %v7729_v21 = vadd.f32 %v5488_v19, %v3473_v58  ;;  %v3551_v55 = vsel %vm8922_vm7, %v7723_v3, 0.0  ;;  %vm8937_vm7 = vmmov %vm8931_vm0 }
 0xabf   : > { %3552 = vadd.xlane.f32.xlu0 %v3551_v55  ;;  %v3560_v62 = vsel %vm8925_vm10, %v7736_v45, 0.0  ;;  %vm8940_vm10 = vmmov %vm8931_vm0 }
 0xac0   : > { %v3554_v63 = vsel %vm8923_vm8, %v7729_v21, 0.0  ;;  %vm8938_vm8 = vmmov %vm8931_vm0 }
 0xac1   : > { %3555 = vadd.xlane.f32.xlu1 %v3554_v63 }
 0xac2   : > { %v5072_v31 = vpop.f32.mrb[68].mxu0 }
 0xac3   : > { %3558 = vadd.xlane.f32.xlu0 %v3557_v29  ;;  %v3486_v22 = vpop.f32.mrb[69].mxu0  ;;  %v7744_v13 = vadd.f32 %v5491_v16, %v5072_v31 }
 0xac4   : > { %v7741_v49 = vadd.f32 %v5490_v60, %v3486_v22  ;;  %v5073_v50 = vpop.f32.mrb[70].mxu0 }
 0xac5   : > { %v3489_v15 = vpop.f32.mrb[71].mxu0  ;;  %v7754_v5 = vadd.f32 %v5493_v42, %v5073_v50  ;;  %v3569_v28 = vsel %vm8927_vm15, %v7744_v13, 0.0  ;;  %vm8942_vm15 = vmmov %vm8931_vm0 }
 0xac6   : > { %v7747_v26 = vadd.f32 %v5492_v2, %v3489_v15  ;;  %v3563_v14 = vsel %vm8926_vm12, %v7741_v49, 0.0  ;;  %vm8941_vm12 = vmmov %vm8931_vm0 }
 0xac7   : > { %3561 = vadd.xlane.f32.xlu0 %v3560_v62  ;;  %v5076_v27 = vpop.f32.mrb[48].mxu1  ;;  %3564 = vadd.xlane.f32.xlu1 %v3563_v14  ;;  %v3572_v20 = vsel %vm8930_vm14, %v7754_v5, 0.0  ;;  %vm8945_vm14 = vmmov %vm8931_vm0 }
 0xac8   : > { %v3502_v9 = vpop.f32.mrb[49].mxu1  ;;  %v3566_v38 = vsel %vm8928_vm11, %v7747_v26, 0.0  ;;  %v7764_v11 = vadd.f32 %v5495_v43, %v5076_v27  ;;  %vm8943_vm11 = vmmov %vm8931_vm0 }
 0xac9   : > { %v5077_v53 = vpop.f32.mrb[50].mxu1  ;;  %v7757_v59 = vadd.f32 %v5494_v39, %v3502_v9 }
 0xaca   : > { %v3505_v23 = vpop.f32.mrb[51].mxu1  ;;  %v7774_v41 = vadd.f32 %v5497_v24, %v5077_v53  ;;  %v3581_v6 = vsel %vm8915_vm1, %v7764_v11, 0.0  ;;  %vm8946_vm1 = vmmov %vm8931_vm0 }
 0xacb   : > { %3570 = vadd.xlane.f32.xlu1 %v3569_v28  ;;  %3567 = vadd.xlane.f32.xlu0 %v3566_v38  ;;  %v7767_v4 = vadd.f32 %v5496_v56, %v3505_v23  ;;  %v3575_v47 = vsel %vm8929_vm13, %v7757_v59, 0.0  ;;  %vm8944_vm13 = vmmov %vm8931_vm0 }
 0xacc   : > { %v3584_v32 = vsel %vm8933_vm3, %v7774_v41, 0.0  ;;  %vm8948_vm3 = vmmov %vm8931_vm0 }
 0xacd   : > { %v3578_v0 = vsel %vm8931_vm0, %v7767_v4, 0.0 }
 0xacf   : > { %v5080_v51 = vpop.f32.mrb[52].mxu1  ;;  %3576 = vadd.xlane.f32.xlu1 %v3575_v47  ;;  %3573 = vadd.xlane.f32.xlu0 %v3572_v20 }
 0xad0   : > { %v3518_v33 = vpop.f32.mrb[53].mxu1  ;;  %v7784_v25 = vadd.f32 %v5499_v1, %v5080_v51 }
 0xad1   : > { %v5081_v8 = vpop.f32.mrb[54].mxu1  ;;  %v7777_v10 = vadd.f32 %v5498_v30, %v3518_v33 }
 0xad2   : > { %v3521_v18 = vpop.f32.mrb[55].mxu1  ;;  %v7794_v34 = vadd.f32 %v5501_v17, %v5081_v8  ;;  %v3593_v36 = vsel %vm8934_vm4, %v7784_v25, 0.0  ;;  %vm8949_vm4 = vmmov %vm8931_vm0 }
 0xad3   : > { %3582 = vadd.xlane.f32.xlu1 %v3581_v6  ;;  %3579 = vadd.xlane.f32.xlu0 %v3578_v0  ;;  %v7787_v7 = vadd.f32 %v5500_v35, %v3521_v18  ;;  %v3587_v44 = vsel %vm8932_vm2, %v7777_v10, 0.0  ;;  %vm8947_vm2 = vmmov %vm8931_vm0 }
 0xad4   : > { %v3596_v52 = vsel %vm8936_vm6, %v7794_v34, 0.0  ;;  %vm8951_vm6 = vmmov %vm8931_vm0 }
 0xad5   : > { %v3590_v61 = vsel %vm8935_vm5, %v7787_v7, 0.0  ;;  %vm8950_vm5 = vmmov %vm8931_vm0 }
 0xad7   : > { %3588 = vadd.xlane.f32.xlu1 %v3587_v44  ;;  %3585 = vadd.xlane.f32.xlu0 %v3584_v32 }
 0xadb   : > { %3594 = vadd.xlane.f32.xlu1 %v3593_v36  ;;  %3591 = vadd.xlane.f32.xlu0 %v3590_v61 }
 0xadf   : > { %3597 = vadd.xlane.f32.xlu0 %v3596_v52 }
 0xb4c   : > { %v3553_v12 = vpop.xlane.xlu0 %3552 }
 0xb4d   : > { %v3600_v40 = vmul.f32 0.03125, %v3553_v12 }
 0xb4e   : > { %v3556_v57 = vpop.xlane.xlu1 %3555 }
 0xb4f   : > { %v7803_v48 = vsub.f32 %v7723_v3, %v3600_v40  ;;  %v3601_v58 = vmul.f32 0.03125, %v3556_v57 }
 0xb50   : > { %v3559_v54 = vpop.xlane.xlu0 %3558 }
 0xb51   : > { %v7806_v19 = vsub.f32 %v7729_v21, %v3601_v58  ;;  %v3602_v55 = vmul.f32 0.03125, %v3559_v54  ;;  %v3632_v63 = vmul.f32 %v7803_v48, %v7803_v48 }
 0xb53   : > { %v7811_v37 = vsub.f32 %v7726_v46, %v3602_v55  ;;  %v3648_v31 = vsel %vm8937_vm7, %v3632_v63, 0.0  ;;  %v3633_v29 = vmul.f32 %v7806_v19, %v7806_v19 }
 0xb54   : > { %v3562_v22 = vpop.xlane.xlu0 %3561  ;;  %3649 = vadd.xlane.f32.xlu1 %v3648_v31  ;;  %v3565_v3 = vpop.xlane.xlu1 %3564 }
 0xb55   : > { %v3603_v60 = vmul.f32 0.03125, %v3562_v22  ;;  %v3604_v50 = vmul.f32 0.03125, %v3565_v3  ;;  %v3651_v21 = vsel %vm8938_vm8, %v3633_v29, 0.0  ;;  %v3634_v15 = vmul.f32 %v7811_v37, %v7811_v37 }
 0xb56   : > { %3652 = vadd.xlane.f32.xlu0 %v3651_v21 }
 0xb57   : > { %v7820_v16 = vsub.f32 %v7736_v45, %v3603_v60  ;;  %v7823_v46 = vsub.f32 %v7741_v49, %v3604_v50  ;;  %v3654_v2 = vsel %vm8939_vm9, %v3634_v15, 0.0 }
 0xb58   : > { %3655 = vadd.xlane.f32.xlu1 %v3654_v2  ;;  %v3571_v62 = vpop.xlane.xlu1 %3570  ;;  %v3568_v14 = vpop.xlane.xlu0 %3567 }
 0xb59   : > { %v3606_v27 = vmul.f32 0.03125, %v3571_v62  ;;  %v3605_v9 = vmul.f32 0.03125, %v3568_v14  ;;  %v3636_v53 = vmul.f32 %v7823_v46, %v7823_v46  ;;  %v3635_v42 = vmul.f32 %v7820_v16, %v7820_v16  ;;  %v5224_v14 = vld [vmem:[%s8655_s9] sm:$0xff]  }
 0xb5a   : > { %5082 = vmatprep.subr.bf16.mxu0 %v5224_v14 }
 0xb5b   : > { %v7831_v39 = vsub.f32 %v7744_v13, %v3606_v27  ;;  %v7834_v45 = vsub.f32 %v7747_v26, %v3605_v9  ;;  %v3660_v49 = vsel %vm8940_vm10, %v3636_v53, 0.0  ;;  %v3657_v23 = vsel %vm8941_vm12, %v3635_v42, 0.0  ;;  %5083 = vmatpush3.bf16.msra.mxu0 %v5224_v14  ;;  %v5226_v27 = vld [vmem:[%s8657_s11] sm:$0xff]   ;;  %v5227_v9 = vld [vmem:[%s8657_s11 + $0x8] sm:$0xff]  }
 0xb5c   : > { %3661 = vadd.xlane.f32.xlu1 %v3660_v49  ;;  %v3577_v28 = vpop.xlane.xlu1 %3576  ;;  %3658 = vadd.xlane.f32.xlu0 %v3657_v23  ;;  %v3574_v38 = vpop.xlane.xlu0 %3573 }
 0xb5d   : > { %v3608_v43 = vmul.f32 0.03125, %v3577_v28  ;;  %v3607_v56 = vmul.f32 0.03125, %v3574_v38  ;;  %v3638_v47 = vmul.f32 %v7831_v39, %v7831_v39  ;;  %v3637_v13 = vmul.f32 %v7834_v45, %v7834_v45  ;;  %5102 = vmatprep.subr.bf16.mxu1 %v5226_v27 }
 0xb5e   : > { %5103 = vmatpush3.bf16.msra.mxu1 %v5226_v27 }
 0xb5f   : > { %v7843_v20 = vsub.f32 %v7757_v59, %v3608_v43  ;;  %v7846_v26 = vsub.f32 %v7754_v5, %v3607_v56  ;;  %v3666_v51 = vsel %vm8942_vm15, %v3638_v47, 0.0  ;;  %v3663_v33 = vsel %vm8943_vm11, %v3637_v13, 0.0  ;;  %5104 = vmatprep.subr.bf16.mxu1 %v5227_v9 }
 0xb60   : > { %3667 = vadd.xlane.f32.xlu1 %v3666_v51  ;;  %v3583_v8 = vpop.xlane.xlu1 %3582  ;;  %3664 = vadd.xlane.f32.xlu0 %v3663_v33  ;;  %v3580_v24 = vpop.xlane.xlu0 %3579 }
 0xb61   : > { %v3610_v30 = vmul.f32 0.03125, %v3583_v8  ;;  %v3609_v18 = vmul.f32 0.03125, %v3580_v24  ;;  %v3640_v6 = vmul.f32 %v7843_v20, %v7843_v20  ;;  %v3639_v59 = vmul.f32 %v7846_v26, %v7846_v26 }
 0xb62   : > { %5105 = vmatpush3.bf16.msra.mxu1 %v5227_v9 }
 0xb63   : > { %v7855_v0 = vsub.f32 %v7764_v11, %v3610_v30  ;;  %v7858_v5 = vsub.f32 %v7767_v4, %v3609_v18  ;;  %v3672_v1 = vsel %vm8944_vm13, %v3640_v6, 0.0  ;;  %v3669_v35 = vsel %vm8945_vm14, %v3639_v59, 0.0 }
 0xb64   : > { %3673 = vadd.xlane.f32.xlu1 %v3672_v1  ;;  %v3589_v44 = vpop.xlane.xlu1 %3588  ;;  %3670 = vadd.xlane.f32.xlu0 %v3669_v35  ;;  %v3586_v32 = vpop.xlane.xlu0 %3585 }
 0xb65   : > { %v3612_v17 = vmul.f32 0.03125, %v3589_v44  ;;  %v3611_v36 = vmul.f32 0.03125, %v3586_v32  ;;  %v3642_v61 = vmul.f32 %v7855_v0, %v7855_v0  ;;  %v3641_v11 = vmul.f32 %v7858_v5, %v7858_v5 }
 0xb67   : > { %v7867_v52 = vsub.f32 %v7777_v10, %v3612_v17  ;;  %v7870_v4 = vsub.f32 %v7774_v41, %v3611_v36  ;;  %v3678_v12 = vsel %vm8946_vm1, %v3642_v61, 0.0  ;;  %v3675_v40 = vsel %vm8931_vm0, %v3641_v11, 0.0 }
 0xb68   : > { %3679 = vadd.xlane.f32.xlu1 %v3678_v12  ;;  %v3595_v57 = vpop.xlane.xlu1 %3594  ;;  %3676 = vadd.xlane.f32.xlu0 %v3675_v40  ;;  %v3592_v58 = vpop.xlane.xlu0 %3591 }
 0xb69   : > { %v3614_v54 = vmul.f32 0.03125, %v3595_v57  ;;  %v3613_v55 = vmul.f32 0.03125, %v3592_v58  ;;  %v3644_v63 = vmul.f32 %v7867_v52, %v7867_v52  ;;  %v3643_v10 = vmul.f32 %v7870_v4, %v7870_v4 }
 0xb6b   : > { %v7879_v31 = vsub.f32 %v7784_v25, %v3614_v54  ;;  %v7882_v41 = vsub.f32 %v7787_v7, %v3613_v55  ;;  %v3684_v29 = vsel %vm8947_vm2, %v3644_v63, 0.0  ;;  %v3681_v22 = vsel %vm8948_vm3, %v3643_v10, 0.0 }
 0xb6c   : > { %3685 = vadd.xlane.f32.xlu1 %v3684_v29  ;;  %3682 = vadd.xlane.f32.xlu0 %v3681_v22  ;;  %v3598_v3 = vpop.xlane.xlu0 %3597 }
 0xb6d   : > { %v3615_v60 = vmul.f32 0.03125, %v3598_v3  ;;  %v3646_v50 = vmul.f32 %v7879_v31, %v7879_v31  ;;  %v3645_v21 = vmul.f32 %v7882_v41, %v7882_v41 }
 0xb6f   : > { %v7891_v25 = vsub.f32 %v7794_v34, %v3615_v60  ;;  %v3690_v7 = vsel %vm8949_vm4, %v3646_v50, 0.0  ;;  %v3687_v15 = vsel %vm8950_vm5, %v3645_v21, 0.0  ;;  %v5225_v34 = vld [vmem:[%s8655_s9 + $0x8] sm:$0xff]  }
 0xb70   : > { %3691 = vadd.xlane.f32.xlu1 %v3690_v7  ;;  %3688 = vadd.xlane.f32.xlu0 %v3687_v15 }
 0xb71   : > { %v3647_v2 = vmul.f32 %v7891_v25, %v7891_v25  ;;  %5084 = vmatprep.subr.bf16.mxu0 %v5225_v34 }
 0xb72   : > { %5085 = vmatpush3.bf16.msra.mxu0 %v5225_v34 }
 0xb73   : > { %v3693_v62 = vsel %vm8951_vm6, %v3647_v2, 0.0 }
 0xb74   : > { %3694 = vadd.xlane.f32.xlu0 %v3693_v62 }
 0xbe1   : > { %v3650_v53 = vpop.xlane.xlu1 %3649 }
 0xbe2   : > { %v3696_v42 = vmul.f32 0.03125, %v3650_v53 }
 0xbe3   : > { %v3653_v49 = vpop.xlane.xlu0 %3652 }
 0xbe4   : > { %v3712_v23 = vadd.f32 1e-05, %v3696_v42  ;;  %v3697_v28 = vmul.f32 0.03125, %v3653_v49 }
 0xbe5   : > { %v3656_v38 = vpop.xlane.xlu1 %3655 }
 0xbe6   : > { %5358 = vrsqrt.f32 %v3712_v23  ;;  %v3713_v43 = vadd.f32 1e-05, %v3697_v28  ;;  %v3698_v56 = vmul.f32 0.03125, %v3656_v38  ;;  %vm3730_vm7 = vcmp.eq.f32.partialorder %v3712_v23, inf }
 0xbe7   : > { %vm3732_vm8 = vcmp.eq.f32.partialorder %v3712_v23, 0.0  ;;  %v3733_v44 = vand.u32 2147483648, %v3712_v23 }
 0xbe8   : > { %5360 = vrsqrt.f32 %v3713_v43  ;;  %v7910_v51 = vadd.f32 1e-05, %v3698_v56  ;;  %vm3737_vm9 = vcmp.eq.f32.partialorder %v3713_v43, inf  ;;  %vm3739_vm10 = vcmp.eq.f32.partialorder %v3713_v43, 0.0 }
 0xbe9   : > { %v3662_v47 = vpop.xlane.xlu1 %3661  ;;  %v3659_v13 = vpop.xlane.xlu0 %3658  ;;  %v3740_v12 = vand.u32 2147483648, %v3713_v43 }
 0xbea   : > { %v3700_v33 = vmul.f32 0.03125, %v3662_v47  ;;  %v3699_v8 = vmul.f32 0.03125, %v3659_v13  ;;  %5362 = vrsqrt.f32 %v7910_v51  ;;  %vm3744_vm12 = vcmp.eq.f32.partialorder %v7910_v51, inf }
 0xbeb   : > { %vm3746_vm15 = vcmp.eq.f32.partialorder %v7910_v51, 0.0  ;;  %v3747_v63 = vand.u32 2147483648, %v7910_v51 }
 0xbec   : > { %v7913_v24 = vadd.f32 1e-05, %v3700_v33  ;;  %v7915_v30 = vadd.f32 1e-05, %v3699_v8 }
 0xbed   : > { %v3668_v18 = vpop.xlane.xlu1 %3667  ;;  %v3665_v6 = vpop.xlane.xlu0 %3664 }
 0xbee   : > { %v3702_v59 = vmul.f32 0.03125, %v3668_v18  ;;  %v3701_v1 = vmul.f32 0.03125, %v3665_v6  ;;  %5364 = vrsqrt.f32 %v7913_v24  ;;  %vm3758_vm11 = vcmp.eq.f32.partialorder %v7913_v24, inf }
 0xbef   : > { %5366 = vrsqrt.f32 %v7915_v30  ;;  %vm3760_vm13 = vcmp.eq.f32.partialorder %v7913_v24, 0.0  ;;  %v3761_v29 = vand.u32 2147483648, %v7913_v24  ;;  %vm3751_vm14 = vcmp.eq.f32.partialorder %v7915_v30, inf }
 0xbf0   : > { %v5359_v35 = vpop.eup %5358  ;;  %v7919_v17 = vadd.f32 1e-05, %v3702_v59  ;;  %v7921_v36 = vadd.f32 1e-05, %v3701_v1  ;;  %vm3753_vm1 = vcmp.eq.f32.partialorder %v7915_v30, 0.0  ;;  %v3754_v2 = vand.u32 2147483648, %v7915_v30 }
 0xbf1   : > { %v3729_v32 = vmul.f32 %v5359_v35, %v3712_v23  ;;  %v3674_v61 = vpop.xlane.xlu1 %3673  ;;  %v3671_v11 = vpop.xlane.xlu0 %3670 }
 0xbf2   : > { %v3704_v40 = vmul.f32 0.03125, %v3674_v61  ;;  %v3703_v57 = vmul.f32 0.03125, %v3671_v11  ;;  %v5361_v58 = vpop.eup %5360  ;;  %5368 = vrsqrt.f32 %v7919_v17  ;;  %vm3772_vm0 = vcmp.eq.f32.partialorder %v7919_v17, inf }
 0xbf3   : > { %v3731_v54 = vsel %vm3730_vm7, %v3712_v23, %v3729_v32  ;;  %v3736_v55 = vmul.f32 %v5361_v58, %v3713_v43  ;;  %5370 = vrsqrt.f32 %v7921_v36  ;;  %vm3774_vm2 = vcmp.eq.f32.partialorder %v7919_v17, 0.0 }
 0xbf4   : > { %v3734_v10 = vsel %vm3732_vm8, %v3733_v44, %v3731_v54  ;;  %v5363_v60 = vpop.eup %5362  ;;  %v7935_v21 = vadd.f32 1e-05, %v3704_v40  ;;  %v7937_v7 = vadd.f32 1e-05, %v3703_v57  ;;  %v3775_v53 = vand.u32 2147483648, %v7919_v17 }
 0xbf5   : > { %v3680_v22 = vpop.xlane.xlu1 %3679  ;;  %v3677_v3 = vpop.xlane.xlu0 %3676  ;;  %v3738_v50 = vsel %vm3737_vm9, %v3713_v43, %v3736_v55  ;;  %v3743_v15 = vmul.f32 %v5363_v60, %v7910_v51  ;;  %5372 = vrcp.f32 %v3734_v10  ;;  %vm3765_vm3 = vcmp.eq.f32.partialorder %v7921_v36, inf }
 0xbf6   : > { %v3706_v62 = vmul.f32 0.03125, %v3680_v22  ;;  %v3741_v14 = vsel %vm3739_vm10, %v3740_v12, %v3738_v50  ;;  %v3705_v34 = vmul.f32 0.03125, %v3677_v3  ;;  %5374 = vrsqrt.f32 %v7935_v21 }
 0xbf7   : > { %v3745_v9 = vsel %vm3744_vm12, %v7910_v51, %v3743_v15  ;;  %vm3767_vm4 = vcmp.eq.f32.partialorder %v7921_v36, 0.0  ;;  %5376 = vrsqrt.f32 %v7937_v7  ;;  %v3768_v56 = vand.u32 2147483648, %v7921_v36 }
 0xbf8   : > { %v5365_v27 = vpop.eup %5364  ;;  %v3748_v28 = vsel %vm3746_vm15, %v3747_v63, %v3745_v9  ;;  %5378 = vrcp.f32 %v3741_v14  ;;  %v7957_v47 = vadd.f32 1e-05, %v3706_v62  ;;  %v7962_v51 = vadd.f32 1e-05, %v3705_v34 }
 0xbf9   : > { %v3686_v42 = vpop.xlane.xlu1 %3685  ;;  %v3683_v49 = vpop.xlane.xlu0 %3682  ;;  %v3757_v38 = vmul.f32 %v5365_v27, %v7913_v24  ;;  %5380 = vrcp.f32 %v3748_v28  ;;  %vm3786_vm5 = vcmp.eq.f32.partialorder %v7935_v21, inf  ;;  %vm3788_vm6 = vcmp.eq.f32.partialorder %v7935_v21, 0.0 }
 0xbfa   : > { %v5367_v23 = vpop.eup %5366  ;;  %v3708_v33 = vmul.f32 0.03125, %v3686_v42  ;;  %5382 = vrsqrt.f32 %v7957_v47  ;;  %v3707_v59 = vmul.f32 0.03125, %v3683_v49  ;;  %v3789_v61 = vand.u32 2147483648, %v7935_v21 }
 0xbfb   : > { %v3750_v43 = vmul.f32 %v5367_v23, %v7915_v30  ;;  %v3759_v13 = vsel %vm3758_vm11, %v7913_v24, %v3757_v38  ;;  %vm3779_vm7 = vcmp.eq.f32.partialorder %v7937_v7, inf  ;;  %vm3781_vm8 = vcmp.eq.f32.partialorder %v7937_v7, 0.0 }
 0xbfc   : > { %v5369_v8 = vpop.eup %5368  ;;  %v3762_v18 = vsel %vm3760_vm13, %v3761_v29, %v3759_v13  ;;  %v7988_v57 = vadd.f32 1e-05, %v3708_v33  ;;  %v7990_v58 = vadd.f32 1e-05, %v3707_v59  ;;  %vm3800_vm9 = vcmp.eq.f32.partialorder %v7957_v47, inf }
 0xbfd   : > { %v3752_v6 = vsel %vm3751_vm14, %v7915_v30, %v3750_v43  ;;  %v3689_v1 = vpop.xlane.xlu0 %3688  ;;  %v5371_v35 = vpop.eup %5370  ;;  %5384 = vrcp.f32 %v3762_v18  ;;  %v3771_v32 = vmul.f32 %v5369_v8, %v7919_v17  ;;  %vm3802_vm10 = vcmp.eq.f32.partialorder %v7957_v47, 0.0  ;;  %v8042_v18 = vld [vmem:[%s8654_s8] ss:$0 sm:$0xff] }
 0xbfe   : > { %v3755_v44 = vsel %vm3753_vm1, %v3754_v2, %v3752_v6  ;;  %v3764_v24 = vmul.f32 %v5371_v35, %v7921_v36  ;;  %v3692_v11 = vpop.xlane.xlu1 %3691  ;;  %v3709_v10 = vmul.f32 0.03125, %v3689_v1  ;;  %v3803_v50 = vand.u32 2147483648, %v7957_v47 }
 0xbff   : > { %5386 = vrcp.f32 %v3755_v44  ;;  %v3773_v12 = vsel %vm3772_vm0, %v7919_v17, %v3771_v32  ;;  %v5373_v54 = vpop.eup %5372  ;;  %v3710_v63 = vmul.f32 0.03125, %v3692_v11  ;;  %v3782_v17 = vand.u32 2147483648, %v7937_v7 }
 0xc00   : > { %5388 = vrsqrt.f32 %v7962_v51  ;;  %v3776_v30 = vsel %vm3774_vm2, %v3775_v53, %v3773_v12  ;;  %v3766_v40 = vsel %vm3765_vm3, %v7921_v36, %v3764_v24  ;;  %v5375_v29 = vpop.eup %5374  ;;  %vm3793_vm12 = vcmp.eq.f32.partialorder %v7962_v51, inf }
 0xc01   : > { %5390 = vrcp.f32 %v3776_v30  ;;  %v3769_v55 = vsel %vm3767_vm4, %v3768_v56, %v3766_v40  ;;  %v3695_v22 = vpop.xlane.xlu0 %3694  ;;  %v5377_v3 = vpop.eup %5376  ;;  %v3785_v60 = vmul.f32 %v5375_v29, %v7935_v21  ;;  %vm3795_vm15 = vcmp.eq.f32.partialorder %v7962_v51, 0.0 }
 0xc02   : > { %5392 = vrcp.f32 %v3769_v55  ;;  %v5379_v36 = vpop.eup %5378  ;;  %v3778_v15 = vmul.f32 %v5377_v3, %v7937_v7  ;;  %v8004_v2 = vadd.f32 1e-05, %v3710_v63  ;;  %v3796_v34 = vand.u32 2147483648, %v7962_v51 }
 0xc03   : > { %5394 = vrsqrt.f32 %v7988_v57  ;;  %v5381_v62 = vpop.eup %5380  ;;  %v3787_v14 = vsel %vm3786_vm5, %v7935_v21, %v3785_v60  ;;  %v8010_v27 = vadd.f32 1e-05, %v3709_v10  ;;  %v3711_v9 = vmul.f32 0.03125, %v3695_v22  ;;  %v8026_v21 = vld [vmem:[%s8653_s7] ss:$0 sm:$0xff] }
 0xc04   : > { %5396 = vrsqrt.f32 %v7990_v58  ;;  %v5383_v53 = vpop.eup %5382  ;;  %v3790_v42 = vsel %vm3788_vm6, %v3789_v61, %v3787_v14  ;;  %v3780_v49 = vsel %vm3779_vm7, %v7937_v7, %v3778_v15  ;;  %v3841_v23 = vmul.f32 %v5373_v54, %v7803_v48 }
 0xc05   : > { %5398 = vrsqrt.f32 %v8004_v2  ;;  %v3783_v38 = vsel %vm3781_vm8, %v3782_v17, %v3780_v49  ;;  %v3799_v43 = vmul.f32 %v5383_v53, %v7957_v47  ;;  %vm3814_vm11 = vcmp.eq.f32.partialorder %v7988_v57, inf }
 0xc06   : > { %5400 = vrcp.f32 %v3790_v42  ;;  %vm3816_vm13 = vcmp.eq.f32.partialorder %v7988_v57, 0.0  ;;  %v3817_v48 = vand.u32 2147483648, %v7988_v57  ;;  %vm3807_vm14 = vcmp.eq.f32.partialorder %v7990_v58, inf }
 0xc07   : > { %v5385_v28 = vpop.eup %5384  ;;  %5402 = vrcp.f32 %v3783_v38  ;;  %v3801_v7 = vsel %vm3800_vm9, %v7957_v47, %v3799_v43  ;;  %vm3809_vm1 = vcmp.eq.f32.partialorder %v7990_v58, 0.0  ;;  %v3810_v33 = vand.u32 2147483648, %v7990_v58 }
 0xc08   : > { %5404 = vrsqrt.f32 %v8010_v27  ;;  %v8037_v8 = vadd.f32 1e-05, %v3711_v9  ;;  %v3804_v6 = vsel %vm3802_vm10, %v3803_v50, %v3801_v7  ;;  %vm3828_vm0 = vcmp.eq.f32.partialorder %v8004_v2, inf }
 0xc09   : > { %v5387_v56 = vpop.eup %5386  ;;  %v3843_v1 = vmul.f32 %v5379_v36, %v7806_v19  ;;  %v3878_v35 = vmul.f32 %v8026_v21, %v3841_v23  ;;  %5406 = vrcp.f32 %v3804_v6  ;;  %vm3830_vm2 = vcmp.eq.f32.partialorder %v8004_v2, 0.0 }
 0xc0a   : > { %v5389_v13 = vpop.eup %5388  ;;  %v3831_v32 = vand.u32 2147483648, %v8004_v2  ;;  %v3824_v24 = vand.u32 2147483648, %v8010_v27  ;;  %5408 = vrsqrt.f32 %v8037_v8  ;;  %vm3821_vm3 = vcmp.eq.f32.partialorder %v8010_v27, inf }
 0xc0b   : > { %v3792_v59 = vmul.f32 %v5389_v13, %v7962_v51  ;;  %v5391_v44 = vpop.eup %5390  ;;  %v3879_v11 = vmul.f32 %v8026_v21, %v3843_v1  ;;  %v8059_v19 = vadd.f32 %v8042_v18, %v3878_v35  ;;  %v3845_v40 = vmul.f32 %v5381_v62, %v7811_v37 }
 0xc0c   : > { %v5393_v61 = vpop.eup %5392  ;;  %v3847_v54 = vmul.f32 %v5387_v56, %v7820_v16  ;;  %v3849_v55 = vmul.f32 %v5385_v28, %v7823_v46  ;;  %vm8952_vm4 = vcmask 261120   ;;  %vm3823_vm5 = vcmp.eq.f32.partialorder %v8010_v27, 0.0 }
 0xc0d   : > { %v3794_v47 = vsel %vm3793_vm12, %v7962_v51, %v3792_v59  ;;  %v5395_v12 = vpop.eup %5394  ;;  %v8069_v29 = vadd.f32 %v8042_v18, %v3879_v11  ;;  %v3851_v17 = vmul.f32 %v5393_v61, %v7834_v45  ;;  %v3880_v22 = vmul.f32 %v8026_v21, %v3845_v40  ;;  %vm8953_vm6 = vmmov %vm8952_vm4 }
 0xc0e   : > { %v3797_v30 = vsel %vm3795_vm15, %v3796_v34, %v3794_v47  ;;  %v5397_v63 = vpop.eup %5396  ;;  %v3813_v10 = vmul.f32 %v5395_v12, %v7988_v57  ;;  %v3881_v3 = vmul.f32 %v8026_v21, %v3847_v54  ;;  %v3882_v37 = vmul.f32 %v8026_v21, %v3849_v55  ;;  %vm8954_vm7 = vmmov %vm8952_vm4 }
 0xc0f   : > { %5410 = vrcp.f32 %v3797_v30  ;;  %v3806_v51 = vmul.f32 %v5397_v63, %v7990_v58  ;;  %v5399_v16 = vpop.eup %5398  ;;  %v3916_v60 = vpack.c.bf16 %v8069_v29, %v8059_v19  ;;  %v3883_v50 = vmul.f32 %v8026_v21, %v3851_v17  ;;  %vm8955_vm10 = vmmov %vm8952_vm4 }
 0xc10   : > { %v3815_v46 = vsel %vm3814_vm11, %v7988_v57, %v3813_v10  ;;  %v3853_v45 = vmul.f32 %v5391_v44, %v7831_v39  ;;  %v5401_v36 = vpop.eup %5400  ;;  %v3827_v14 = vmul.f32 %v5399_v16, %v8004_v2  ;;  %v8090_v34 = vadd.f32 %v8042_v18, %v3880_v22  ;;  %vm8956_vm12 = vmmov %vm8952_vm4 }
 0xc11   : > { %v3818_v15 = vsel %vm3816_vm13, %v3817_v48, %v3815_v46  ;;  %v3808_v62 = vsel %vm3807_vm14, %v7990_v58, %v3806_v51  ;;  %v5403_v9 = vpop.eup %5402  ;;  %5086 = vmatprep.mubr.msk.bf16.mxu0 %vm8952_vm4, %v3916_v60  ;;  %v8096_v39 = vadd.f32 %v8042_v18, %v3881_v3  ;;  %v8099_v57 = vadd.f32 %v8042_v18, %v3882_v37  ;;  %vm8957_vm15 = vmmov %vm8952_vm4 }
 0xc12   : > { %5412 = vrcp.f32 %v3818_v15  ;;  %v3811_v53 = vsel %vm3809_vm1, %v3810_v33, %v3808_v62  ;;  %v5405_v42 = vpop.eup %5404  ;;  %v3829_v49 = vsel %vm3828_vm0, %v8004_v2, %v3827_v14  ;;  %v8105_v23 = vadd.f32 %v8042_v18, %v3883_v50  ;;  %vm8958_vm11 = vmmov %vm8952_vm4 }
 0xc13   : > { %5414 = vrcp.f32 %v3811_v53  ;;  %v3855_v58 = vmul.f32 %v5403_v9, %v7846_v26  ;;  %v3832_v28 = vsel %vm3830_vm2, %v3831_v32, %v3829_v49  ;;  %v3820_v38 = vmul.f32 %v5405_v42, %v8010_v27  ;;  %v5407_v48 = vpop.eup %5406  ;;  %vm8959_vm13 = vmmov %vm8952_vm4  ;;  %v5229_v9 = vld [vmem:[%s8657_s11 + $0x18] sm:$0xff]  }
 0xc14   : > { %v3917_v43 = vpack.c.bf16 %v8096_v39, %v8090_v34  ;;  %v3884_v56 = vmul.f32 %v8026_v21, %v3853_v45  ;;  %5416 = vrcp.f32 %v3832_v28  ;;  %v3918_v13 = vpack.c.bf16 %v8105_v23, %v8099_v57  ;;  %v5409_v26 = vpop.eup %5408  ;;  %vm8960_vm1 = vmmov %vm8952_vm4 }
 0xc15   : > { %v3885_v7 = vmul.f32 %v8026_v21, %v3855_v58  ;;  %v3857_v33 = vmul.f32 %v5401_v36, %v7843_v20  ;;  %v3822_v2 = vsel %vm3821_vm3, %v8010_v27, %v3820_v38  ;;  %v3834_v59 = vmul.f32 %v5409_v26, %v8037_v8  ;;  %vm8961_vm0 = vmmov %vm8960_vm1 }
 0xc16   : > { %5087 = vmatmul.mubr.msk.bf16.vlgmr.msra.gmra.mrb[72].mxu0 %vm8953_vm6, %v3917_v43  ;;  %v3825_v6 = vsel %vm3823_vm5, %v3824_v24, %v3822_v2  ;;  %vm3835_vm8 = vcmp.eq.f32.partialorder %v8037_v8, inf  ;;  %v3838_v20 = vand.u32 2147483648, %v8037_v8  ;;  %v8131_v44 = vadd.f32 %v8042_v18, %v3884_v56  ;;  %vm8962_vm2 = vmmov %vm8961_vm0 }
 0xc17   : > { %5090 = vmatprep.mubr.msk.bf16.mxu0 %vm8954_vm7, %v3918_v13  ;;  %v8126_v1 = vadd.f32 %v8042_v18, %v3885_v7  ;;  %5418 = vrcp.f32 %v3825_v6  ;;  %v3836_v27 = vsel %vm3835_vm8, %v8037_v8, %v3834_v59  ;;  %vm3837_vm9 = vcmp.eq.f32.partialorder %v8037_v8, 0.0  ;;  %vm8963_vm3 = vmmov %vm8961_vm0 }
 0xc18   : > { %v3886_v24 = vmul.f32 %v8026_v21, %v3857_v33  ;;  %v3839_v61 = vsel %vm3837_vm9, %v3838_v20, %v3836_v27  ;;  %v3861_v11 = vmul.f32 %v5407_v48, %v7855_v0  ;;  %vm4131_vm14 = vcmask 523264   ;;  %vm8964_vm4 = vmmov %vm8961_vm0 }
 0xc19   : > { %v5411_v35 = vpop.eup %5410  ;;  %v3919_v47 = vpack.c.bf16 %v8126_v1, %v8131_v44  ;;  %5420 = vrcp.f32 %v3839_v61  ;;  %vm8965_vm5 = vmmov %vm8961_vm0 }
 0xc1a   : > { %v3859_v32 = vmul.f32 %v5411_v35, %v7858_v5  ;;  %v8142_v54 = vadd.f32 %v8042_v18, %v3886_v24  ;;  %v3888_v55 = vmul.f32 %v8026_v21, %v3861_v11  ;;  %vm8966_vm6 = vmmov %vm8961_vm0 }
 0xc1b   : > { %vm8967_vm7 = vmmov %vm8961_vm0 }
 0xc1c   : > { %v3887_v12 = vmul.f32 %v8026_v21, %v3859_v32  ;;  %v5413_v30 = vpop.eup %5412  ;;  %v8156_v22 = vadd.f32 %v8042_v18, %v3888_v55  ;;  %vm8968_vm8 = vmmov %vm8961_vm0 }
 0xc1d   : > { %v5415_v40 = vpop.eup %5414  ;;  %v3865_v10 = vmul.f32 %v5413_v30, %v7867_v52  ;;  %vm8969_vm9 = vmmov %vm8961_vm0 }
 0xc1e   : > { %v8145_v8 = vadd.f32 %v8042_v18, %v3887_v12  ;;  %5091 = vmatmul.mubr.msk.bf16.gmra.mrb[76].mxu0 %vm8955_vm10, %v3919_v47  ;;  %v3863_v5 = vmul.f32 %v5415_v40, %v7870_v4  ;;  %v5417_v63 = vpop.eup %5416  ;;  %vm8970_vm10 = vmmov %vm8961_vm0 }
 0xc1f   : > { %v3869_v4 = vmul.f32 %v5417_v63, %v7879_v31  ;;  %v3890_v16 = vmul.f32 %v8026_v21, %v3865_v10 }
 0xc20   : > { %v3920_v0 = vpack.c.bf16 %v8145_v8, %v8142_v54  ;;  %v3889_v17 = vmul.f32 %v8026_v21, %v3863_v5 }
 0xc21   : > { %v5419_v51 = vpop.eup %5418  ;;  %v3892_v45 = vmul.f32 %v8026_v21, %v3869_v4  ;;  %v8171_v36 = vadd.f32 %v8042_v18, %v3890_v16 }
 0xc22   : > { %5094 = vmatprep.mubr.msk.bf16.mxu0 %vm8956_vm12, %v3920_v0  ;;  %v8159_v3 = vadd.f32 %v8042_v18, %v3889_v17  ;;  %v3867_v37 = vmul.f32 %v5419_v51, %v7882_v41  ;;  %vm8971_vm12 = vmmov %vm8961_vm0 }
 0xc23   : > { %v5421_v46 = vpop.eup %5420  ;;  %v8180_v62 = vadd.f32 %v8042_v18, %v3892_v45 }
 0xc24   : > { %v3921_v52 = vpack.c.bf16 %v8159_v3, %v8156_v22  ;;  %v3891_v60 = vmul.f32 %v8026_v21, %v3867_v37  ;;  %v3871_v50 = vmul.f32 %v5421_v46, %v7891_v25 }
 0xc26   : > { %5095 = vmatmul.mubr.msk.bf16.gmra.mrb[80].mxu0 %vm8957_vm15, %v3921_v52  ;;  %v8174_v31 = vadd.f32 %v8042_v18, %v3891_v60  ;;  %v3893_v41 = vmul.f32 %v8026_v21, %v3871_v50  ;;  %v5228_v21 = vld [vmem:[%s8657_s11 + $0x10] sm:$0xff]   ;;  %vm8972_vm15 = vmmov %vm8961_vm0 }
 0xc27   : > { %5106 = vmatprep.subr.bf16.mxu1 %v5228_v21 }
 0xc28   : > { %v3922_v15 = vpack.c.bf16 %v8174_v31, %v8171_v36  ;;  %v8183_v14 = vadd.f32 %v8042_v18, %v3893_v41  ;;  %5107 = vmatpush3.bf16.msra.mxu1 %v5228_v21  ;;  %v4771_v18 = vld [vmem:[%s8656_s10] ss:$0 sm:$0xff] }
 0xc29   : > { %5108 = vmatprep.subr.bf16.mxu1 %v5229_v9 }
 0xc2a   : > { %5098 = vmatprep.mubr.msk.bf16.mxu0 %vm8958_vm11, %v3922_v15  ;;  %v3923_v25 = vpack.c.bf16 %v8183_v14, %v8180_v62  ;;  %vm8973_vm11 = vmmov %vm8961_vm0 }
 0xc2c   : > { %5109 = vmatpush3.bf16.msra.mxu1 %v5229_v9 }
 0xc2e   : > { %5099 = vmatmul.mubr.msk.bf16.gmra.mrb[84].mxu0 %vm8959_vm13, %v3923_v25  ;;  %vm8974_vm13 = vmmov %vm8961_vm0 }
 0xce9   : > { %v5088_v53 = vpop.f32.mrb[72].mxu0 }
 0xcea   : > { %v4014_v42 = vadd.f32 %v5088_v53, %v4771_v18  ;;  %v4005_v49 = vpop.f32.mrb[73].mxu0 }
 0xceb   : > { %v4006_v58 = vadd.f32 %v4771_v18, %v4005_v49  ;;  %v5089_v28 = vpop.f32.mrb[74].mxu0 }
 0xcec   : > { %v4017_v38 = vadd.f32 %v5089_v28, %v4771_v18  ;;  %v4008_v43 = vpop.f32.mrb[75].mxu0  ;;  %v4070_v48 = vmax.f32 %v4014_v42, 0.0 }
 0xced   : > { %v4009_v56 = vadd.f32 %v4771_v18, %v4008_v43  ;;  %v4068_v7 = vmax.f32 %v4006_v58, 0.0 }
 0xcee   : > { %v4071_v13 = vmax.f32 %v4017_v38, 0.0 }
 0xcef   : > { %v4069_v33 = vmax.f32 %v4009_v56, 0.0 }
 0xcf0   : > { %v4085_v26 = vpack.c.bf16 %v4071_v13, %v4070_v48  ;;  %v8209_v13 = vld [vmem:[%s8658_s12] ss:$0 sm:$0xff] }
 0xcf1   : > { %v4084_v2 = vpack.c.bf16 %v4069_v33, %v4068_v7  ;;  %v5092_v6 = vpop.f32.mrb[76].mxu0 }
 0xcf2   : > { %v4030_v59 = vadd.f32 %v5092_v6, %v4771_v18  ;;  %v4021_v35 = vpop.f32.mrb[77].mxu0 }
 0xcf3   : > { %v4022_v20 = vadd.f32 %v4771_v18, %v4021_v35  ;;  %v5093_v27 = vpop.f32.mrb[78].mxu0  ;;  %5110 = vmatprep.mubr.msk.bf16.mxu1 %vm4131_vm14, %v4084_v2 }
 0xcf4   : > { %v4033_v32 = vadd.f32 %v5093_v27, %v4771_v18  ;;  %v4024_v24 = vpop.f32.mrb[79].mxu0  ;;  %5111 = vmatmul.mubr.msk.bf16.vlgmr.msra.gmra.mrb[56].mxu1 %vm4131_vm14, %v4085_v26  ;;  %v4074_v47 = vmax.f32 %v4030_v59, 0.0 }
 0xcf5   : > { %v4025_v61 = vadd.f32 %v4771_v18, %v4024_v24  ;;  %v4072_v12 = vmax.f32 %v4022_v20, 0.0 }
 0xcf6   : > { %v4075_v11 = vmax.f32 %v4033_v32, 0.0 }
 0xcf7   : > { %v4073_v30 = vmax.f32 %v4025_v61, 0.0 }
 0xcf8   : > { %v4087_v40 = vpack.c.bf16 %v4075_v11, %v4074_v47 }
 0xcf9   : > { %v4086_v5 = vpack.c.bf16 %v4073_v30, %v4072_v12  ;;  %v5096_v55 = vpop.f32.mrb[80].mxu0 }
 0xcfa   : > { %v4046_v63 = vadd.f32 %v5096_v55, %v4771_v18  ;;  %v4037_v0 = vpop.f32.mrb[81].mxu0 }
 0xcfb   : > { %v4038_v10 = vadd.f32 %v4771_v18, %v4037_v0  ;;  %v5097_v17 = vpop.f32.mrb[82].mxu0  ;;  %5114 = vmatprep.mubr.msk.bf16.mxu1 %vm4131_vm14, %v4086_v5 }
 0xcfc   : > { %v4049_v51 = vadd.f32 %v5097_v17, %v4771_v18  ;;  %v4040_v4 = vpop.f32.mrb[83].mxu0  ;;  %5115 = vmatmul.mubr.msk.bf16.gmra.mrb[60].mxu1 %vm4131_vm14, %v4087_v40  ;;  %v4078_v16 = vmax.f32 %v4046_v63, 0.0 }
 0xcfd   : > { %v4041_v37 = vadd.f32 %v4771_v18, %v4040_v4  ;;  %v4076_v46 = vmax.f32 %v4038_v10, 0.0 }
 0xcfe   : > { %v4079_v52 = vmax.f32 %v4049_v51, 0.0 }
 0xcff   : > { %v4077_v60 = vmax.f32 %v4041_v37, 0.0 }
 0xd00   : > { %v4089_v50 = vpack.c.bf16 %v4079_v52, %v4078_v16 }
 0xd01   : > { %v4088_v45 = vpack.c.bf16 %v4077_v60, %v4076_v46  ;;  %v5100_v41 = vpop.f32.mrb[84].mxu0 }
 0xd02   : > { %v4062_v15 = vadd.f32 %v5100_v41, %v4771_v18  ;;  %v4053_v25 = vpop.f32.mrb[85].mxu0 }
 0xd03   : > { %v4054_v21 = vadd.f32 %v4771_v18, %v4053_v25  ;;  %v5101_v9 = vpop.f32.mrb[86].mxu0  ;;  %5118 = vmatprep.mubr.msk.bf16.mxu1 %vm4131_vm14, %v4088_v45 }
 0xd04   : > { %v4065_v53 = vadd.f32 %v5101_v9, %v4771_v18  ;;  %v4056_v42 = vpop.f32.mrb[87].mxu0  ;;  %5119 = vmatmul.mubr.msk.bf16.gmra.mrb[64].mxu1 %vm4131_vm14, %v4089_v50  ;;  %v4082_v58 = vmax.f32 %v4062_v15, 0.0 }
 0xd05   : > { %v4057_v49 = vadd.f32 %v4771_v18, %v4056_v42  ;;  %v4080_v38 = vmax.f32 %v4054_v21, 0.0 }
 0xd06   : > { %v4083_v28 = vmax.f32 %v4065_v53, 0.0 }
 0xd07   : > { %v4081_v43 = vmax.f32 %v4057_v49, 0.0 }
 0xd08   : > { %v4091_v56 = vpack.c.bf16 %v4083_v28, %v4082_v58 }
 0xd09   : > { %v4090_v48 = vpack.c.bf16 %v4081_v43, %v4080_v38 }
 0xd0b   : > { %5122 = vmatprep.mubr.msk.bf16.mxu1 %vm4131_vm14, %v4090_v48 }
 0xd0c   : > { %5123 = vmatmul.mubr.msk.bf16.gmra.mrb[68].mxu1 %vm4131_vm14, %v4091_v56  ;;  %vm8975_vm14 = vmmov %vm8961_vm0 }
 0xdc7   : > { %v5112_v7 = vpop.f32.mrb[56].mxu1 }
 0xdc8   : > { %v4199_v33 = vadd.f32 %v5112_v7, %v8209_v13  ;;  %v4190_v26 = vpop.f32.mrb[57].mxu1 }
 0xdc9   : > { %v4191_v18 = vadd.f32 %v8209_v13, %v4190_v26  ;;  %v5113_v2 = vpop.f32.mrb[58].mxu1 }
 0xdca   : > { %v8214_v6 = vadd.f32 %v4199_v33, %v8090_v34  ;;  %v4202_v59 = vadd.f32 %v5113_v2, %v8209_v13  ;;  %v4193_v35 = vpop.f32.mrb[59].mxu1 }
 0xdcb   : > { %v4194_v20 = vadd.f32 %v8209_v13, %v4193_v35  ;;  %v8219_v27 = vadd.f32 %v4191_v18, %v8059_v19 }
 0xdcc   : > { %v8222_v32 = vadd.f32 %v4202_v59, %v8096_v39  ;;  %v4277_v24 = vsel %vm8960_vm1, %v8214_v6, 0.0  ;;  %vm8976_vm1 = vmmov %vm8961_vm0 }
 0xdcd   : > { %4278 = vadd.xlane.f32.xlu1 %v4277_v24  ;;  %v8227_v61 = vadd.f32 %v4194_v20, %v8069_v29  ;;  %v4271_v19 = vsel %vm8962_vm2, %v8219_v27, 0.0  ;;  %vm8977_vm2 = vmmov %vm8961_vm0 }
 0xdce   : > { %v4280_v34 = vsel %vm8961_vm0, %v8222_v32, 0.0 }
 0xdcf   : > { %4281 = vadd.xlane.f32.xlu0 %v4280_v34  ;;  %v5116_v47 = vpop.f32.mrb[60].mxu1  ;;  %v4274_v55 = vsel %vm8963_vm3, %v8227_v61, 0.0  ;;  %vm8978_vm3 = vmmov %vm8961_vm0 }
 0xdd0   : > { %v4215_v11 = vadd.f32 %v5116_v47, %v8209_v13  ;;  %v4206_v12 = vpop.f32.mrb[61].mxu1 }
 0xdd1   : > { %v4207_v39 = vadd.f32 %v8209_v13, %v4206_v12  ;;  %4272 = vadd.xlane.f32.xlu1 %v4271_v19  ;;  %v5117_v30 = vpop.f32.mrb[62].mxu1 }
 0xdd2   : > { %v8236_v40 = vadd.f32 %v4215_v11, %v8131_v44  ;;  %v4218_v29 = vadd.f32 %v5117_v30, %v8209_v13  ;;  %v4209_v5 = vpop.f32.mrb[63].mxu1 }
 0xdd3   : > { %v4210_v63 = vadd.f32 %v8209_v13, %v4209_v5  ;;  %4275 = vadd.xlane.f32.xlu0 %v4274_v55  ;;  %v8243_v0 = vadd.f32 %v4207_v39, %v8099_v57 }
 0xdd4   : > { %v8246_v10 = vadd.f32 %v4218_v29, %v8126_v1  ;;  %v4289_v17 = vsel %vm8964_vm4, %v8236_v40, 0.0  ;;  %vm8979_vm4 = vmmov %vm8961_vm0 }
 0xdd5   : > { %4290 = vadd.xlane.f32.xlu1 %v4289_v17  ;;  %v8251_v44 = vadd.f32 %v4210_v63, %v8105_v23  ;;  %v4283_v57 = vsel %vm8966_vm6, %v8243_v0, 0.0  ;;  %vm8981_vm6 = vmmov %vm8961_vm0 }
 0xdd6   : > { %v4292_v51 = vsel %vm8965_vm5, %v8246_v10, 0.0  ;;  %vm8980_vm5 = vmmov %vm8961_vm0 }
 0xdd7   : > { %4293 = vadd.xlane.f32.xlu0 %v4292_v51  ;;  %v5120_v4 = vpop.f32.mrb[64].mxu1  ;;  %v4286_v50 = vsel %vm8967_vm7, %v8251_v44, 0.0  ;;  %vm8982_vm7 = vmmov %vm8961_vm0 }
 0xdd8   : > { %v4231_v37 = vadd.f32 %v5120_v4, %v8209_v13  ;;  %v4222_v16 = vpop.f32.mrb[65].mxu1 }
 0xdd9   : > { %v4223_v1 = vadd.f32 %v8209_v13, %v4222_v16  ;;  %4284 = vadd.xlane.f32.xlu1 %v4283_v57  ;;  %v5121_v52 = vpop.f32.mrb[66].mxu1 }
 0xdda   : > { %v8260_v46 = vadd.f32 %v4231_v37, %v8156_v22  ;;  %v4234_v23 = vadd.f32 %v5121_v52, %v8209_v13  ;;  %v4225_v60 = vpop.f32.mrb[67].mxu1 }
 0xddb   : > { %v4226_v45 = vadd.f32 %v8209_v13, %v4225_v60  ;;  %4287 = vadd.xlane.f32.xlu0 %v4286_v50  ;;  %v8267_v41 = vadd.f32 %v4223_v1, %v8142_v54 }
 0xddc   : > { %v8270_v15 = vadd.f32 %v4234_v23, %v8159_v3  ;;  %v4301_v25 = vsel %vm8968_vm8, %v8260_v46, 0.0  ;;  %vm8983_vm8 = vmmov %vm8961_vm0 }
 0xddd   : > { %4302 = vadd.xlane.f32.xlu1 %v4301_v25  ;;  %v8275_v22 = vadd.f32 %v4226_v45, %v8145_v8  ;;  %v4295_v54 = vsel %vm8970_vm10, %v8267_v41, 0.0  ;;  %vm8985_vm10 = vmmov %vm8961_vm0 }
 0xdde   : > { %v4304_v21 = vsel %vm8969_vm9, %v8270_v15, 0.0  ;;  %vm8984_vm9 = vmmov %vm8961_vm0 }
 0xddf   : > { %4305 = vadd.xlane.f32.xlu0 %v4304_v21  ;;  %v5124_v9 = vpop.f32.mrb[68].mxu1  ;;  %v4298_v8 = vsel %vm8971_vm12, %v8275_v22, 0.0  ;;  %vm8986_vm12 = vmmov %vm8961_vm0 }
 0xde0   : > { %v4238_v53 = vpop.f32.mrb[69].mxu1  ;;  %v4247_v42 = vadd.f32 %v5124_v9, %v8209_v13 }
 0xde1   : > { %v4239_v3 = vadd.f32 %v8209_v13, %v4238_v53  ;;  %4296 = vadd.xlane.f32.xlu1 %v4295_v54  ;;  %v5125_v49 = vpop.f32.mrb[70].mxu1 }
 0xde2   : > { %v4241_v58 = vpop.f32.mrb[71].mxu1  ;;  %v4250_v38 = vadd.f32 %v5125_v49, %v8209_v13  ;;  %v8291_v56 = vadd.f32 %v4247_v42, %v8180_v62 }
 0xde3   : > { %v8286_v28 = vadd.f32 %v4239_v3, %v8171_v36  ;;  %v4242_v43 = vadd.f32 %v8209_v13, %v4241_v58  ;;  %4299 = vadd.xlane.f32.xlu0 %v4298_v8 }
 0xde4   : > { %v8299_v33 = vadd.f32 %v4250_v38, %v8183_v14  ;;  %v4313_v13 = vsel %vm8974_vm13, %v8291_v56, 0.0  ;;  %vm8989_vm13 = vmmov %vm8961_vm0 }
 0xde5   : > { %v8294_v48 = vadd.f32 %v4242_v43, %v8174_v31  ;;  %v4307_v7 = vsel %vm8972_vm15, %v8286_v28, 0.0  ;;  %vm8987_vm15 = vmmov %vm8961_vm0 }
 0xde6   : > { %4308 = vadd.xlane.f32.xlu1 %v4307_v7  ;;  %v4316_v62 = vsel %vm8975_vm14, %v8299_v33, 0.0  ;;  %vm8990_vm14 = vmmov %vm8961_vm0 }
 0xde7   : > { %v4310_v36 = vsel %vm8973_vm11, %v8294_v48, 0.0  ;;  %vm8988_vm11 = vmmov %vm8961_vm0 }
 0xde8   : > { %4311 = vadd.xlane.f32.xlu0 %v4310_v36 }
 0xdea   : > { %4314 = vadd.xlane.f32.xlu1 %v4313_v13 }
 0xdec   : > { %4317 = vadd.xlane.f32.xlu0 %v4316_v62 }
 0xe5a   : > { %v4279_v31 = vpop.xlane.xlu1 %4278 }
 0xe5b   : > { %v4321_v26 = vmul.f32 0.03125, %v4279_v31 }
 0xe5c   : > { %v4282_v18 = vpop.xlane.xlu0 %4281 }
 0xe5d   : > { %v8308_v2 = vsub.f32 %v8214_v6, %v4321_v26  ;;  %v4322_v14 = vmul.f32 0.03125, %v4282_v18 }
 0xe5e   : > { %v4273_v59 = vpop.xlane.xlu1 %4272 }
 0xe5f   : > { %v8311_v35 = vsub.f32 %v8222_v32, %v4322_v14  ;;  %v4319_v20 = vmul.f32 0.03125, %v4273_v59  ;;  %v4353_v24 = vmul.f32 %v8308_v2, %v8308_v2 }
 0xe60   : > { %v4276_v34 = vpop.xlane.xlu0 %4275 }
 0xe61   : > { %v8316_v47 = vsub.f32 %v8219_v27, %v4319_v20  ;;  %v4320_v11 = vmul.f32 0.03125, %v4276_v34  ;;  %v4373_v12 = vsel %vm8976_vm1, %v4353_v24, 0.0  ;;  %v4354_v6 = vmul.f32 %v8311_v35, %v8311_v35 }
 0xe62   : > { %v4291_v19 = vpop.xlane.xlu1 %4290  ;;  %4374 = vadd.xlane.f32.xlu1 %v4373_v12 }
 0xe63   : > { %v8322_v39 = vsub.f32 %v8227_v61, %v4320_v11  ;;  %v4325_v32 = vmul.f32 0.03125, %v4291_v19  ;;  %v4376_v30 = vsel %vm8961_vm0, %v4354_v6, 0.0  ;;  %v4351_v29 = vmul.f32 %v8316_v47, %v8316_v47 }
 0xe64   : > { %4377 = vadd.xlane.f32.xlu0 %v4376_v30  ;;  %v4294_v27 = vpop.xlane.xlu0 %4293 }
 0xe65   : > { %v8328_v5 = vsub.f32 %v8236_v40, %v4325_v32  ;;  %v4326_v55 = vmul.f32 0.03125, %v4294_v27  ;;  %v4367_v63 = vsel %vm8977_vm2, %v4351_v29, 0.0  ;;  %v4352_v17 = vmul.f32 %v8322_v39, %v8322_v39 }
 0xe66   : > { %v4285_v51 = vpop.xlane.xlu1 %4284  ;;  %4368 = vadd.xlane.f32.xlu1 %v4367_v63 }
 0xe67   : > { %v8334_v61 = vsub.f32 %v8246_v10, %v4326_v55  ;;  %v4323_v4 = vmul.f32 0.03125, %v4285_v51  ;;  %v4370_v37 = vsel %vm8978_vm3, %v4352_v17, 0.0  ;;  %v4357_v16 = vmul.f32 %v8328_v5, %v8328_v5 }
 0xe68   : > { %4371 = vadd.xlane.f32.xlu0 %v4370_v37  ;;  %v4288_v40 = vpop.xlane.xlu0 %4287 }
 0xe69   : > { %v8340_v57 = vsub.f32 %v8243_v0, %v4323_v4  ;;  %v4324_v1 = vmul.f32 0.03125, %v4288_v40  ;;  %v4385_v52 = vsel %vm8979_vm4, %v4357_v16, 0.0  ;;  %v4358_v23 = vmul.f32 %v8334_v61, %v8334_v61 }
 0xe6a   : > { %v4303_v60 = vpop.xlane.xlu1 %4302  ;;  %4386 = vadd.xlane.f32.xlu1 %v4385_v52 }
 0xe6b   : > { %v8346_v10 = vsub.f32 %v8251_v44, %v4324_v1  ;;  %v4329_v50 = vmul.f32 0.03125, %v4303_v60  ;;  %v4388_v45 = vsel %vm8980_vm5, %v4358_v23, 0.0  ;;  %v4355_v25 = vmul.f32 %v8340_v57, %v8340_v57 }
 0xe6c   : > { %4389 = vadd.xlane.f32.xlu0 %v4388_v45  ;;  %v4306_v0 = vpop.xlane.xlu0 %4305 }
 0xe6d   : > { %v8352_v21 = vsub.f32 %v8260_v46, %v4329_v50  ;;  %v4330_v9 = vmul.f32 0.03125, %v4306_v0  ;;  %v4379_v53 = vsel %vm8981_vm6, %v4355_v25, 0.0  ;;  %v4356_v54 = vmul.f32 %v8346_v10, %v8346_v10 }
 0xe6e   : > { %v4297_v42 = vpop.xlane.xlu1 %4296  ;;  %4380 = vadd.xlane.f32.xlu1 %v4379_v53 }
 0xe6f   : > { %v8358_v44 = vsub.f32 %v8270_v15, %v4330_v9  ;;  %v4327_v3 = vmul.f32 0.03125, %v4297_v42  ;;  %v4382_v49 = vsel %vm8982_vm7, %v4356_v54, 0.0  ;;  %v4361_v58 = vmul.f32 %v8352_v21, %v8352_v21 }
 0xe70   : > { %4383 = vadd.xlane.f32.xlu0 %v4382_v49  ;;  %v4300_v46 = vpop.xlane.xlu0 %4299 }
 0xe71   : > { %v8364_v8 = vsub.f32 %v8267_v41, %v4327_v3  ;;  %v4328_v38 = vmul.f32 0.03125, %v4300_v46  ;;  %v4397_v43 = vsel %vm8983_vm8, %v4361_v58, 0.0  ;;  %v4362_v7 = vmul.f32 %v8358_v44, %v8358_v44 }
 0xe72   : > { %4398 = vadd.xlane.f32.xlu1 %v4397_v43 }
 0xe73   : > { %v8370_v15 = vsub.f32 %v8275_v22, %v4328_v38  ;;  %v4309_v36 = vpop.xlane.xlu1 %4308  ;;  %v4400_v13 = vsel %vm8984_vm9, %v4362_v7, 0.0  ;;  %v4359_v62 = vmul.f32 %v8364_v8, %v8364_v8 }
 0xe74   : > { %v4331_v31 = vmul.f32 0.03125, %v4309_v36  ;;  %4401 = vadd.xlane.f32.xlu0 %v4400_v13 }
 0xe75   : > { %v4312_v41 = vpop.xlane.xlu0 %4311  ;;  %v4391_v26 = vsel %vm8985_vm10, %v4359_v62, 0.0  ;;  %v4360_v18 = vmul.f32 %v8370_v15, %v8370_v15 }
 0xe76   : > { %v8379_v14 = vsub.f32 %v8286_v28, %v4331_v31  ;;  %v4332_v59 = vmul.f32 0.03125, %v4312_v41  ;;  %4392 = vadd.xlane.f32.xlu1 %v4391_v26 }
 0xe77   : > { %v4315_v22 = vpop.xlane.xlu1 %4314  ;;  %v4394_v20 = vsel %vm8986_vm12, %v4360_v18, 0.0 }
 0xe78   : > { %v8383_v24 = vsub.f32 %v8294_v48, %v4332_v59  ;;  %v4333_v34 = vmul.f32 0.03125, %v4315_v22  ;;  %4395 = vadd.xlane.f32.xlu0 %v4394_v20  ;;  %v4363_v11 = vmul.f32 %v8379_v14, %v8379_v14 }
 0xe79   : > { %v4318_v12 = vpop.xlane.xlu0 %4317 }
 0xe7a   : > { %v8388_v6 = vsub.f32 %v8291_v56, %v4333_v34  ;;  %v4334_v19 = vmul.f32 0.03125, %v4318_v12  ;;  %v4403_v28 = vsel %vm8987_vm15, %v4363_v11, 0.0  ;;  %v4364_v32 = vmul.f32 %v8383_v24, %v8383_v24 }
 0xe7b   : > { %4404 = vadd.xlane.f32.xlu1 %v4403_v28 }
 0xe7c   : > { %v8394_v30 = vsub.f32 %v8299_v33, %v4334_v19  ;;  %v4406_v48 = vsel %vm8988_vm11, %v4364_v32, 0.0  ;;  %v4365_v29 = vmul.f32 %v8388_v6, %v8388_v6 }
 0xe7d   : > { %4407 = vadd.xlane.f32.xlu0 %v4406_v48 }
 0xe7e   : > { %v4409_v27 = vsel %vm8989_vm13, %v4365_v29, 0.0  ;;  %v4366_v56 = vmul.f32 %v8394_v30, %v8394_v30 }
 0xe7f   : > { %4410 = vadd.xlane.f32.xlu1 %v4409_v27 }
 0xe80   : > { %v4412_v55 = vsel %vm8990_vm14, %v4366_v56, 0.0 }
 0xe81   : > { %4413 = vadd.xlane.f32.xlu0 %v4412_v55 }
 0xeef   : > { %v4375_v63 = vpop.xlane.xlu1 %4374 }
 0xef0   : > { %v4417_v17 = vmul.f32 0.03125, %v4375_v63 }
 0xef1   : > { %v4378_v51 = vpop.xlane.xlu0 %4377 }
 0xef2   : > { %v4433_v33 = vadd.f32 1e-05, %v4417_v17  ;;  %v4418_v4 = vmul.f32 0.03125, %v4378_v51 }
 0xef3   : > { %v4369_v37 = vpop.xlane.xlu1 %4368 }
 0xef4   : > { %5422 = vrsqrt.f32 %v4433_v33  ;;  %v4434_v16 = vadd.f32 1e-05, %v4418_v4  ;;  %v4415_v40 = vmul.f32 0.03125, %v4369_v37  ;;  %vm4463_vm1 = vcmp.eq.f32.partialorder %v4433_v33, inf }
 0xef5   : > { %v4372_v1 = vpop.xlane.xlu0 %4371  ;;  %vm4465_vm0 = vcmp.eq.f32.partialorder %v4433_v33, 0.0  ;;  %v4466_v58 = vand.u32 2147483648, %v4433_v33 }
 0xef6   : > { %v4416_v52 = vmul.f32 0.03125, %v4372_v1  ;;  %5424 = vrsqrt.f32 %v4434_v16  ;;  %v4431_v60 = vadd.f32 1e-05, %v4415_v40  ;;  %vm4470_vm2 = vcmp.eq.f32.partialorder %v4434_v16, inf }
 0xef7   : > { %v4387_v23 = vpop.xlane.xlu1 %4386  ;;  %vm4472_vm3 = vcmp.eq.f32.partialorder %v4434_v16, 0.0  ;;  %v4473_v31 = vand.u32 2147483648, %v4434_v16 }
 0xef8   : > { %v8403_v50 = vadd.f32 1e-05, %v4416_v52  ;;  %v4421_v45 = vmul.f32 0.03125, %v4387_v23  ;;  %5426 = vrsqrt.f32 %v4431_v60  ;;  %vm4449_vm4 = vcmp.eq.f32.partialorder %v4431_v60, inf }
 0xef9   : > { %v4390_v25 = vpop.xlane.xlu0 %4389  ;;  %vm4451_vm5 = vcmp.eq.f32.partialorder %v4431_v60, 0.0  ;;  %v4452_v59 = vand.u32 2147483648, %v4431_v60 }
 0xefa   : > { %5428 = vrsqrt.f32 %v8403_v50  ;;  %v8406_v9 = vadd.f32 1e-05, %v4421_v45  ;;  %v4422_v53 = vmul.f32 0.03125, %v4390_v25  ;;  %vm4456_vm6 = vcmp.eq.f32.partialorder %v8403_v50, inf }
 0xefb   : > { %v4381_v0 = vpop.xlane.xlu1 %4380  ;;  %vm4458_vm7 = vcmp.eq.f32.partialorder %v8403_v50, 0.0  ;;  %v4459_v11 = vand.u32 2147483648, %v8403_v50 }
 0xefc   : > { %v4419_v54 = vmul.f32 0.03125, %v4381_v0  ;;  %5430 = vrsqrt.f32 %v8406_v9  ;;  %v8409_v46 = vadd.f32 1e-05, %v4422_v53  ;;  %vm4491_vm8 = vcmp.eq.f32.partialorder %v8406_v9, inf }
 0xefd   : > { %v4384_v42 = vpop.xlane.xlu0 %4383  ;;  %vm4493_vm9 = vcmp.eq.f32.partialorder %v8406_v9, 0.0  ;;  %v4494_v17 = vand.u32 2147483648, %v8406_v9 }
 0xefe   : > { %v5423_v3 = vpop.eup %5422  ;;  %v8411_v38 = vadd.f32 1e-05, %v4419_v54  ;;  %v4420_v7 = vmul.f32 0.03125, %v4384_v42  ;;  %5432 = vrsqrt.f32 %v8409_v46  ;;  %vm4498_vm10 = vcmp.eq.f32.partialorder %v8409_v46, inf }
 0xeff   : > { %v4462_v49 = vmul.f32 %v5423_v3, %v4433_v33  ;;  %v4399_v43 = vpop.xlane.xlu1 %4398  ;;  %vm4500_vm12 = vcmp.eq.f32.partialorder %v8409_v46, 0.0  ;;  %v4501_v40 = vand.u32 2147483648, %v8409_v46 }
 0xf00   : > { %v4425_v36 = vmul.f32 0.03125, %v4399_v43  ;;  %v5425_v13 = vpop.eup %5424  ;;  %5434 = vrsqrt.f32 %v8411_v38  ;;  %v8420_v12 = vadd.f32 1e-05, %v4420_v7  ;;  %vm4477_vm15 = vcmp.eq.f32.partialorder %v8411_v38, inf }
 0xf01   : > { %v4464_v62 = vsel %vm4463_vm1, %v4433_v33, %v4462_v49  ;;  %v4402_v41 = vpop.xlane.xlu0 %4401  ;;  %v4469_v18 = vmul.f32 %v5425_v13, %v4434_v16  ;;  %vm4479_vm11 = vcmp.eq.f32.partialorder %v8411_v38, 0.0  ;;  %v8460_v49 = vld [vmem:[%s8659_s13] ss:$0 sm:$0xff] }
 0xf02   : > { %v4467_v26 = vsel %vm4465_vm0, %v4466_v58, %v4464_v62  ;;  %v5427_v20 = vpop.eup %5426  ;;  %v8422_v19 = vadd.f32 1e-05, %v4425_v36  ;;  %v4426_v27 = vmul.f32 0.03125, %v4402_v41  ;;  %vm4484_vm13 = vcmp.eq.f32.partialorder %v8420_v12, inf  ;;  %v8473_v13 = vld [vmem:[%s8660_s14] ss:$0 sm:$0xff] }
 0xf03   : > { %5436 = vrcp.f32 %v4467_v26  ;;  %v4393_v22 = vpop.xlane.xlu1 %4392  ;;  %v4471_v34 = vsel %vm4470_vm2, %v4434_v16, %v4469_v18  ;;  %v4448_v48 = vmul.f32 %v5427_v20, %v4431_v60  ;;  %vm4486_vm14 = vcmp.eq.f32.partialorder %v8420_v12, 0.0 }
 0xf04   : > { %v5429_v28 = vpop.eup %5428  ;;  %v4474_v32 = vsel %vm4472_vm3, %v4473_v31, %v4471_v34  ;;  %v4423_v56 = vmul.f32 0.03125, %v4393_v22  ;;  %v8443_v1 = vadd.f32 1e-05, %v4426_v27  ;;  %v4487_v36 = vand.u32 2147483648, %v8420_v12 }
 0xf05   : > { %5438 = vrcp.f32 %v4474_v32  ;;  %v4455_v29 = vmul.f32 %v5429_v28, %v8403_v50  ;;  %v4396_v55 = vpop.xlane.xlu0 %4395  ;;  %v4450_v63 = vsel %vm4449_vm4, %v4431_v60, %v4448_v48  ;;  %vm4519_vm1 = vcmp.eq.f32.partialorder %v8422_v19, inf }
 0xf06   : > { %5440 = vrsqrt.f32 %v8420_v12  ;;  %v5431_v51 = vpop.eup %5430  ;;  %v4453_v33 = vsel %vm4451_vm5, %v4452_v59, %v4450_v63  ;;  %v8445_v52 = vadd.f32 1e-05, %v4423_v56  ;;  %v4424_v54 = vmul.f32 0.03125, %v4396_v55 }
 0xf07   : > { %v4457_v4 = vsel %vm4456_vm6, %v8403_v50, %v4455_v29  ;;  %5442 = vrsqrt.f32 %v8422_v19  ;;  %v4490_v16 = vmul.f32 %v5431_v51, %v8406_v9  ;;  %v4480_v50 = vand.u32 2147483648, %v8411_v38 }
 0xf08   : > { %5444 = vrcp.f32 %v4453_v33  ;;  %v4460_v37 = vsel %vm4458_vm7, %v4459_v11, %v4457_v4  ;;  %v4405_v23 = vpop.xlane.xlu1 %4404  ;;  %v5433_v60 = vpop.eup %5432  ;;  %v8484_v59 = vadd.f32 1e-05, %v4424_v54  ;;  %vm4521_vm0 = vcmp.eq.f32.partialorder %v8422_v19, 0.0 }
 0xf09   : > { %5446 = vrcp.f32 %v4460_v37  ;;  %v4492_v45 = vsel %vm4491_vm8, %v8406_v9, %v4490_v16  ;;  %v4497_v53 = vmul.f32 %v5433_v60, %v8409_v46  ;;  %v4427_v43 = vmul.f32 0.03125, %v4405_v23 }
 0xf0a   : > { %v5435_v25 = vpop.eup %5434  ;;  %v4495_v0 = vsel %vm4493_vm9, %v4494_v17, %v4492_v45  ;;  %5448 = vrsqrt.f32 %v8443_v1  ;;  %v4408_v42 = vpop.xlane.xlu0 %4407  ;;  %v4522_v28 = vand.u32 2147483648, %v8422_v19  ;;  %vm4526_vm2 = vcmp.eq.f32.partialorder %v8443_v1, inf }
 0xf0b   : > { %5450 = vrcp.f32 %v4495_v0  ;;  %v4476_v58 = vmul.f32 %v5435_v25, %v8411_v38  ;;  %v4499_v7 = vsel %vm4498_vm10, %v8409_v46, %v4497_v53  ;;  %v4428_v31 = vmul.f32 0.03125, %v4408_v42 }
 0xf0c   : > { %5452 = vrsqrt.f32 %v8445_v52  ;;  %v4502_v62 = vsel %vm4500_vm12, %v4501_v40, %v4499_v7  ;;  %v8495_v20 = vadd.f32 1e-05, %v4427_v43  ;;  %vm4528_vm3 = vcmp.eq.f32.partialorder %v8443_v1, 0.0  ;;  %v4411_v23 = vpop.xlane.xlu1 %4410 }
 0xf0d   : > { %v5437_v3 = vpop.eup %5436  ;;  %5454 = vrcp.f32 %v4502_v62  ;;  %vm8991_vm4 = vcmask 261120   ;;  %v8512_v55 = vadd.f32 1e-05, %v4428_v31  ;;  %v4529_v16 = vand.u32 2147483648, %v8443_v1 }
 0xf0e   : > { %v4564_v9 = vmul.f32 %v5437_v3, %v8308_v2  ;;  %v4478_v2 = vsel %vm4477_vm15, %v8411_v38, %v4476_v58  ;;  %vm8992_vm5 = vmmov %vm8991_vm4  ;;  %vm4505_vm6 = vcmp.eq.f32.partialorder %v8445_v52, inf  ;;  %vm4507_vm7 = vcmp.eq.f32.partialorder %v8445_v52, 0.0 }
 0xf0f   : > { %v5439_v41 = vpop.eup %5438  ;;  %v4481_v18 = vsel %vm4479_vm11, %v4480_v50, %v4478_v2  ;;  %v4414_v50 = vpop.xlane.xlu0 %4413  ;;  %v4508_v54 = vand.u32 2147483648, %v8445_v52  ;;  %vm8993_vm8 = vmmov %vm8991_vm4  ;;  %vm4512_vm9 = vcmp.eq.f32.partialorder %v8484_v59, inf  ;;  %v4429_v58 = vmul.f32 0.03125, %v4411_v23 }
 0xf10   : > { %v4599_v26 = vmul.f32 %v8460_v49, %v4564_v9  ;;  %v5441_v22 = vpop.eup %5440  ;;  %v4566_v46 = vmul.f32 %v5439_v41, %v8311_v35  ;;  %5456 = vrcp.f32 %v4481_v18  ;;  %vm8994_vm10 = vmmov %vm8991_vm4  ;;  %vm4514_vm15 = vcmp.eq.f32.partialorder %v8484_v59, 0.0 }
 0xf11   : > { %v5443_v34 = vpop.eup %5442  ;;  %v4483_v11 = vmul.f32 %v5441_v22, %v8420_v12  ;;  %5458 = vrsqrt.f32 %v8484_v59  ;;  %v8556_v41 = vadd.f32 1e-05, %v4429_v58  ;;  %vm8995_vm12 = vmmov %vm8991_vm4  ;;  %vm4533_vm11 = vcmp.eq.f32.partialorder %v8495_v20, inf }
 0xf12   : > { %v4621_v38 = vadd.f32 %v8473_v13, %v4599_v26  ;;  %v5445_v32 = vpop.eup %5444  ;;  %v4600_v48 = vmul.f32 %v8460_v49, %v4566_v46  ;;  %v4518_v29 = vmul.f32 %v5443_v34, %v8422_v19  ;;  %5460 = vrsqrt.f32 %v8495_v20 }
 0xf13   : > { %v5447_v35 = vpop.eup %5446  ;;  %v4560_v27 = vmul.f32 %v5445_v32, %v8316_v47  ;;  %v4485_v56 = vsel %vm4484_vm13, %v8420_v12, %v4483_v11  ;;  %vm8996_vm13 = vmmov %vm8991_vm4 }
 0xf14   : > { %4637 = vst.msk [vmem:[%s8491_s22 + $0x10] sm:$0xff] %vm8991_vm4, %v4621_v38  ;;  %v4622_v63 = vadd.f32 %v8473_v13, %v4600_v48  ;;  %v4562_v17 = vmul.f32 %v5447_v35, %v8322_v39  ;;  %v4488_v51 = vsel %vm4486_vm14, %v4487_v36, %v4485_v56  ;;  %v4520_v33 = vsel %vm4519_vm1, %v8422_v19, %v4518_v29  ;;  %v5449_v47 = vpop.eup %5448  ;;  %vm8997_vm1 = vmmov %vm8991_vm4 }
 0xf15   : > { %v4597_v4 = vmul.f32 %v8460_v49, %v4560_v27  ;;  %5462 = vrcp.f32 %v4488_v51  ;;  %v4523_v37 = vsel %vm4521_vm0, %v4522_v28, %v4520_v33  ;;  %v5451_v40 = vpop.eup %5450  ;;  %v4525_v12 = vmul.f32 %v5449_v47, %v8443_v1  ;;  %vm8999_vm4 = vmmov %vm8997_vm1 }
 0xf16   : > { %4638 = vst.msk [vmem:[%s8491_s22 + $0x18] sm:$0xff] %vm8992_vm5, %v4622_v63  ;;  %v4598_v39 = vmul.f32 %v8460_v49, %v4562_v17  ;;  %5464 = vrcp.f32 %v4523_v37  ;;  %v5453_v60 = vpop.eup %5452  ;;  %v4572_v19 = vmul.f32 %v5451_v40, %v8328_v5  ;;  %v4430_v36 = vmul.f32 0.03125, %v4414_v50 }
 0xf17   : > { %v4619_v45 = vadd.f32 %v8473_v13, %v4597_v4  ;;  %5466 = vrsqrt.f32 %v8512_v55  ;;  %v4527_v0 = vsel %vm4526_vm2, %v8443_v1, %v4525_v12  ;;  %v4504_v53 = vmul.f32 %v5453_v60, %v8445_v52  ;;  %v5455_v42 = vpop.eup %5454 }
 0xf18   : > { %v4620_v25 = vadd.f32 %v8473_v13, %v4598_v39  ;;  %v4603_v5 = vmul.f32 %v8460_v49, %v4572_v19  ;;  %v4530_v3 = vsel %vm4528_vm3, %v4529_v16, %v4527_v0  ;;  %v4574_v9 = vmul.f32 %v5455_v42, %v8334_v61  ;;  %vm8998_vm3 = vmmov %vm8997_vm1 }
 0xf19   : > { %4635 = vst.msk [vmem:[%s8491_s22] sm:$0xff] %vm8993_vm8, %v4619_v45  ;;  %5468 = vrcp.f32 %v4530_v3  ;;  %v4506_v7 = vsel %vm4505_vm6, %v8445_v52, %v4504_v53  ;;  %v8560_v18 = vadd.f32 1e-05, %v4430_v36  ;;  %v4536_v48 = vand.u32 2147483648, %v8495_v20  ;;  %vm9000_vm8 = vmmov %vm8997_vm1 }
 0xf1a   : > { %v5457_v43 = vpop.eup %5456  ;;  %4636 = vst.msk [vmem:[%s8491_s22 + $0x8] sm:$0xff] %vm8994_vm10, %v4620_v25  ;;  %v4625_v2 = vadd.f32 %v8473_v13, %v4603_v5  ;;  %v4509_v31 = vsel %vm4507_vm7, %v4508_v54, %v4506_v7  ;;  %v4604_v26 = vmul.f32 %v8460_v49, %v4574_v9  ;;  %vm4535_vm14 = vcmp.eq.f32.partialorder %v8495_v20, 0.0  ;;  %vm9001_vm10 = vmmov %vm8997_vm1 }
 0xf1b   : > { %v5459_v62 = vpop.eup %5458  ;;  %v4568_v1 = vmul.f32 %v5457_v43, %v8340_v57  ;;  %5470 = vrcp.f32 %v4509_v31  ;;  %v4515_v57 = vand.u32 2147483648, %v8484_v59  ;;  %vm4540_vm0 = vcmp.eq.f32.partialorder %v8512_v55, inf }
 0xf1c   : > { %v4511_v61 = vmul.f32 %v5459_v62, %v8484_v59  ;;  %v5461_v22 = vpop.eup %5460  ;;  %4641 = vst.msk [vmem:[%s8491_s22 + $0x30] sm:$0xff] %vm8995_vm12, %v4625_v2  ;;  %5472 = vrsqrt.f32 %v8556_v41  ;;  %v4626_v52 = vadd.f32 %v8473_v13, %v4604_v26  ;;  %v4543_v33 = vand.u32 2147483648, %v8512_v55  ;;  %vm9002_vm12 = vmmov %vm8997_vm1 }
 0xf1d   : > { %v4601_v46 = vmul.f32 %v8460_v49, %v4568_v1  ;;  %v4532_v38 = vmul.f32 %v5461_v22, %v8495_v20  ;;  %5474 = vrsqrt.f32 %v8560_v18  ;;  %vm4542_vm2 = vcmp.eq.f32.partialorder %v8512_v55, 0.0 }
 0xf1e   : > { %v4513_v34 = vsel %vm4512_vm9, %v8484_v59, %v4511_v61  ;;  %4642 = vst.msk [vmem:[%s8491_s22 + $0x38] sm:$0xff] %vm8996_vm13, %v4626_v52  ;;  %vm4547_vm5 = vcmp.eq.f32.partialorder %v8556_v41, inf  ;;  %v4550_v19 = vand.u32 2147483648, %v8556_v41  ;;  %vm4549_vm6 = vcmp.eq.f32.partialorder %v8556_v41, 0.0  ;;  %vm9005_vm13 = vmmov %vm8997_vm1 }
 0xf1f   : > { %v5463_v11 = vpop.eup %5462  ;;  %v4623_v28 = vadd.f32 %v8473_v13, %v4601_v46  ;;  %v4516_v32 = vsel %vm4514_vm15, %v4515_v57, %v4513_v34  ;;  %v4534_v59 = vsel %vm4533_vm11, %v8495_v20, %v4532_v38  ;;  %vm4554_vm7 = vcmp.eq.f32.partialorder %v8560_v18, inf  ;;  %vm9003_vm15 = vmmov %vm8997_vm1 }
 0xf20   : > { %v5465_v29 = vpop.eup %5464  ;;  %v4570_v35 = vmul.f32 %v5463_v11, %v8346_v10  ;;  %5476 = vrcp.f32 %v4516_v32  ;;  %v4537_v63 = vsel %vm4535_vm14, %v4536_v48, %v4534_v59  ;;  %v4557_v42 = vand.u32 2147483648, %v8560_v18  ;;  %vm9004_vm11 = vmmov %vm8997_vm1 }
 0xf21   : > { %v5467_v27 = vpop.eup %5466  ;;  %4639 = vst.msk [vmem:[%s8491_s22 + $0x20] sm:$0xff] %vm8997_vm1, %v4623_v28  ;;  %v4580_v56 = vmul.f32 %v5465_v29, %v8352_v21  ;;  %5478 = vrcp.f32 %v4537_v63  ;;  %vm4556_vm9 = vcmp.eq.f32.partialorder %v8560_v18, 0.0  ;;  %vm9006_vm14 = vmmov %vm8997_vm1 }
 0xf22   : > { %v4602_v17 = vmul.f32 %v8460_v49, %v4570_v35  ;;  %v4539_v51 = vmul.f32 %v5467_v27, %v8512_v55 }
 0xf23   : > { %v4607_v10 = vmul.f32 %v8460_v49, %v4580_v56  ;;  %v5469_v20 = vpop.eup %5468 }
 0xf24   : > { %v4624_v47 = vadd.f32 %v8473_v13, %v4602_v17  ;;  %v4541_v4 = vsel %vm4540_vm0, %v8512_v55, %v4539_v51  ;;  %v4582_v37 = vmul.f32 %v5469_v20, %v8358_v44 }
 0xf25   : > { %v4629_v21 = vadd.f32 %v8473_v13, %v4607_v10  ;;  %v4544_v16 = vsel %vm4542_vm2, %v4543_v33, %v4541_v4  ;;  %v5471_v40 = vpop.eup %5470 }
 0xf26   : > { %4640 = vst.msk [vmem:[%s8491_s22 + $0x28] sm:$0xff] %vm8998_vm3, %v4624_v47  ;;  %5480 = vrcp.f32 %v4544_v16  ;;  %v5473_v39 = vpop.eup %5472  ;;  %v4608_v12 = vmul.f32 %v8460_v49, %v4582_v37  ;;  %v4576_v23 = vmul.f32 %v5471_v40, %v8364_v8 }
 0xf27   : > { %4645 = vst.msk [vmem:[%s8491_s22 + $0x50] sm:$0xff] %vm8999_vm4, %v4629_v21  ;;  %v4546_v60 = vmul.f32 %v5473_v39, %v8556_v41  ;;  %v5475_v55 = vpop.eup %5474 }
 0xf28   : > { %v4630_v45 = vadd.f32 %v8473_v13, %v4608_v12  ;;  %v4605_v44 = vmul.f32 %v8460_v49, %v4576_v23  ;;  %v4553_v0 = vmul.f32 %v5475_v55, %v8560_v18 }
 0xf29   : > { %v4548_v25 = vsel %vm4547_vm5, %v8556_v41, %v4546_v60 }
 0xf2a   : > { %v5477_v50 = vpop.eup %5476  ;;  %4646 = vst.msk [vmem:[%s8491_s22 + $0x58] sm:$0xff] %vm9000_vm8, %v4630_v45  ;;  %v4627_v8 = vadd.f32 %v8473_v13, %v4605_v44  ;;  %v4551_v54 = vsel %vm4549_vm6, %v4550_v19, %v4548_v25  ;;  %v4555_v3 = vsel %vm4554_vm7, %v8560_v18, %v4553_v0 }
 0xf2b   : > { %v4578_v53 = vmul.f32 %v5477_v50, %v8370_v15  ;;  %v5479_v5 = vpop.eup %5478  ;;  %5482 = vrcp.f32 %v4551_v54  ;;  %v4558_v9 = vsel %vm4556_vm9, %v4557_v42, %v4555_v3 }
 0xf2c   : > { %4643 = vst.msk [vmem:[%s8491_s22 + $0x40] sm:$0xff] %vm9001_vm10, %v4627_v8  ;;  %v4584_v43 = vmul.f32 %v5479_v5, %v8379_v14  ;;  %5484 = vrcp.f32 %v4558_v9 }
 0xf2d   : > { %v4606_v58 = vmul.f32 %v8460_v49, %v4578_v53 }
 0xf2e   : > { %v4609_v7 = vmul.f32 %v8460_v49, %v4584_v43 }
 0xf2f   : > { %v4628_v15 = vadd.f32 %v8473_v13, %v4606_v58 }
 0xf30   : > { %v5481_v36 = vpop.eup %5480  ;;  %v4631_v62 = vadd.f32 %v8473_v13, %v4609_v7 }
 0xf31   : > { %4644 = vst.msk [vmem:[%s8491_s22 + $0x48] sm:$0xff] %vm9002_vm12, %v4628_v15  ;;  %v4586_v2 = vmul.f32 %v5481_v36, %v8383_v24 }
 0xf32   : > { %4647 = vst.msk [vmem:[%s8491_s22 + $0x60] sm:$0xff] %vm9003_vm15, %v4631_v62 }
 0xf33   : > { %v4610_v1 = vmul.f32 %v8460_v49, %v4586_v2 }
 0xf35   : > { %v4632_v14 = vadd.f32 %v8473_v13, %v4610_v1  ;;  %v5483_v31 = vpop.eup %5482 }
 0xf36   : > { %v4588_v41 = vmul.f32 %v5483_v31, %v8388_v6  ;;  %v5485_v26 = vpop.eup %5484 }
 0xf37   : > { %4648 = vst.msk [vmem:[%s8491_s22 + $0x68] sm:$0xff] %vm9004_vm11, %v4632_v14  ;;  %v4590_v18 = vmul.f32 %v5485_v26, %v8394_v30 }
 0xf38   : > { %v4611_v61 = vmul.f32 %v8460_v49, %v4588_v41 }
 0xf39   : > { %v4612_v24 = vmul.f32 %v8460_v49, %v4590_v18 }
 0xf3a   : > { %v4633_v22 = vadd.f32 %v8473_v13, %v4611_v61 }
 0xf3b   : > { %v4634_v46 = vadd.f32 %v8473_v13, %v4612_v24 }
 0xf3c   : > { %4649 = vst.msk [vmem:[%s8491_s22 + $0x70] sm:$0xff] %vm9005_vm13, %v4633_v22 }
 0xf3d   : > { %4650 = vst.msk [vmem:[%s8491_s22 + $0x78] sm:$0xff] %vm9006_vm14, %v4634_v46 }
 0xf3e PF: > { %s25_s18 = sadd.s32 1, %s5508_s18  }
 0xf3f   : > { %p22_p4 = scmp.ge.s32.totalorder %s25_s18, 4  }
 0xf41   :  { %24 = sbr.rel (!%p22_p4) target bundleno = 1 (0x1), region = 110 }

</bundles_post_ra>
